<compile_context>
chip_gen: v5e
topology: v5e:2x2
jax: 0.10.0
libtpu: 0.0.40
codegen_flags: <defaults>
</compile_context>

<pallas_src>
import jax
import jax.numpy as jnp
from jax.experimental import pallas as pl
from jax.experimental.pallas import tpu as pltpu

# ----------------------------- configuration --------------------------------
B = 2              # batch
L = 165            # raw audio samples
CONV_K = 10        # conv kernel size (feature extractor)
CONV_S = 5         # conv stride
T = (L - CONV_K) // CONV_S + 1   # 32 frames after feature extraction
CONV_DIM = 32      # conv feature dim
HIDDEN = 32        # wav2vec2 hidden_size (stand-in)
NUM_HEADS = 4
HEAD_DIM = HIDDEN // NUM_HEADS
FFN = 64           # encoder intermediate size
NUM_CLASSES = 2
LOGITS_PAD = 128   # lane-dense output width (sliced back to NUM_CLASSES outside)
LN_EPS = 1e-5
PATCH_PAD = 16     # patches last dim padded 10 -> 16 (unmasked vector loads)

# ---- packed weight slab layout: (W_ROWS, 128), all offsets multiples of 8 ----
R_CONV = 0                         # (PATCH_PAD, CONV_DIM)   conv feature extractor
R_FP   = R_CONV + PATCH_PAD        # (CONV_DIM, HIDDEN)      feature projection
R_QKV  = R_FP + CONV_DIM           # (HIDDEN, 3*HIDDEN)      fused Q|K|V  (scale folded into Q)
R_WO   = R_QKV + HIDDEN            # (HIDDEN, HIDDEN)        attention output proj
R_FFN1 = R_WO + HIDDEN             # (HIDDEN, FFN)
R_FFN2 = R_FFN1 + HIDDEN           # (FFN, HIDDEN)
R_CLS  = R_FFN2 + FFN              # (HIDDEN, LOGITS_PAD)    classifier (lane padded)
W_ROWS = R_CLS + HIDDEN            # = 240

# ---- packed bias/LN slab layout: (B_ROWS, 128), one vector per row ----------
BR_CONV_B, BR_FPLN_G, BR_FPLN_B, BR_FP_B = 0, 1, 2, 3
BR_QKV_B, BR_O_B = 4, 5
BR_LN1_G, BR_LN1_B = 6, 7
BR_FFN1_B, BR_FFN2_B = 8, 9
BR_LN2_G, BR_LN2_B = 10, 11
BR_CLS_B = 12
B_ROWS = 16


# ------------------------------ fused Pallas kernel ---------------------------
def _fused_forward_kernel(patches_ref, w_ref, b_ref, out_ref):
    f32 = jnp.float32

    def wblk(r0, rows, cols):
        # static, sublane-aligned slice of the packed weight slab (free)
        return w_ref[r0:r0 + rows, 0:cols]

    def brow(r, cols):
        return b_ref[r:r + 1, 0:cols]

    def layernorm(x, g, b):
        mu = jnp.mean(x, axis=-1, keepdims=True)
        var = jnp.mean((x - mu) ** 2, axis=-1, keepdims=True)
        return (x - mu) * jax.lax.rsqrt(var + LN_EPS) * g + b

    def erf(x):
        # Abramowitz & Stegun 7.1.26 (max abs err ~1.5e-7): exact-GELU parity
        # with PyTorch/HF without relying on a lax.erf Mosaic lowering.
        a1, a2, a3, a4, a5 = 0.254829592, -0.284496736, 1.421413741, -1.453152027, 1.061405429
        p = 0.3275911
        ax = jnp.abs(x)
        t = 1.0 / (1.0 + p * ax)
        poly = ((((a5 * t + a4) * t + a3) * t + a2) * t + a1) * t
        y = 1.0 - poly * jnp.exp(-ax * ax)
        return jnp.where(x >= 0, y, -y)

    def gelu(x):  # exact erf GELU (HF Wav2Vec2 / torch default)
        return 0.5 * x * (1.0 + erf(x * 0.7071067811865476))

    # ---- feature extractor conv (im2col patches built once in the wrapper) ----
    x = patches_ref[...]                                                    # (B*T, 16)
    feats = jnp.dot(x, wblk(R_CONV, PATCH_PAD, CONV_DIM),
                    preferred_element_type=f32) + brow(BR_CONV_B, CONV_DIM)
    feats = gelu(feats)                                                     # (B*T, CONV_DIM)

    # ---- feature projection: LayerNorm + Linear ----
    feats = layernorm(feats, brow(BR_FPLN_G, CONV_DIM), brow(BR_FPLN_B, CONV_DIM))
    h = jnp.dot(feats, wblk(R_FP, CONV_DIM, HIDDEN),
                preferred_element_type=f32) + brow(BR_FP_B, HIDDEN)         # (B*T, HIDDEN)

    # ---- one transformer encoder layer (post-norm) ----
    # TODO(synk): attention_mask handling (mask=None in the reference forward call).
    # fused QKV projection; 1/sqrt(HEAD_DIM) already folded into Wq/bq at pack time
    qkv = jnp.dot(h, wblk(R_QKV, HIDDEN, 3 * HIDDEN),
                  preferred_element_type=f32) + brow(BR_QKV_B, 3 * HIDDEN)  # (B*T, 96)

    head_rows = []
    for bidx in range(B):                    # unrolled at trace time
        r0 = bidx * T                        # sublane-aligned row slice (multiple of 8)
        heads = []
        for hd in range(NUM_HEADS):          # unrolled at trace time
            lo = hd * HEAD_DIM
            qh = qkv[r0:r0 + T, lo:lo + HEAD_DIM]                           # (T, 8)
            kh = qkv[r0:r0 + T, HIDDEN + lo:HIDDEN + lo + HEAD_DIM]
            vh = qkv[r0:r0 + T, 2 * HIDDEN + lo:2 * HIDDEN + lo + HEAD_DIM]
            # scores: contract head dim of both (no explicit transpose, no 3-D reshapes)
            s = jax.lax.dot_general(qh, kh, (((1,), (1,)), ((), ())),
                                    preferred_element_type=f32)             # (T, T)
            m = jnp.max(s, axis=-1, keepdims=True)
            e = jnp.exp(s - m)
            pr = e * pl.reciprocal(jnp.sum(e, axis=-1, keepdims=True), approx=True)
            heads.append(jnp.dot(pr, vh, preferred_element_type=f32))       # (T, 8)
        head_rows.append(jnp.concatenate(heads, axis=-1))                   # (T, HIDDEN)
    attn = jnp.concatenate(head_rows, axis=0)                               # (B*T, HIDDEN)
    # single K=HIDDEN output projection on lane-concatenated head outputs
    attn = jnp.dot(attn, wblk(R_WO, HIDDEN, HIDDEN),
                   preferred_element_type=f32) + brow(BR_O_B, HIDDEN)

    h = layernorm(h + attn, brow(BR_LN1_G, HIDDEN), brow(BR_LN1_B, HIDDEN))

    f = gelu(jnp.dot(h, wblk(R_FFN1, HIDDEN, FFN),
                     preferred_element_type=f32) + brow(BR_FFN1_B, FFN))
    f = jnp.dot(f, wblk(R_FFN2, FFN, HIDDEN),
                preferred_element_type=f32) + brow(BR_FFN2_B, HIDDEN)
    h = layernorm(h + f, brow(BR_LN2_G, HIDDEN), brow(BR_LN2_B, HIDDEN))     # (B*T, HIDDEN)

    # ---- LieDetectionModel head: mean over time, dropout(eval)=identity, classifier ----
    pooled = jnp.concatenate(
        [jnp.mean(h[bidx * T:(bidx + 1) * T, :], axis=0, keepdims=True) for bidx in range(B)],
        axis=0)                                                              # (B, HIDDEN)
    logits = jnp.dot(pooled, wblk(R_CLS, HIDDEN, LOGITS_PAD),
                     preferred_element_type=f32) + brow(BR_CLS_B, LOGITS_PAD)  # (B, 128)
    out_ref[...] = logits.astype(out_ref.dtype)


# --------------------------- parameters (synthetic) ---------------------------
def init_params(key):
    ks = jax.random.split(key, 14)

    def w(k, shape, fan_in):
        return jax.random.normal(k, shape, jnp.float32) * (1.0 / jnp.sqrt(fan_in))

    p = {
        # feature extractor conv (kernel unrolled as im2col matmul)
        "conv_w": w(ks[0], (CONV_K, CONV_DIM), CONV_K),
        "conv_b": jnp.zeros((CONV_DIM,), jnp.float32),
        # feature projection
        "fp_ln_g": jnp.ones((CONV_DIM,), jnp.float32),
        "fp_ln_b": jnp.zeros((CONV_DIM,), jnp.float32),
        "fp_w": w(ks[1], (CONV_DIM, HIDDEN), CONV_DIM),
        "fp_b": jnp.zeros((HIDDEN,), jnp.float32),
        # transformer encoder layer
        "wq": w(ks[2], (HIDDEN, HIDDEN), HIDDEN), "bq": jnp.zeros((HIDDEN,), jnp.float32),
        "wk": w(ks[3], (HIDDEN, HIDDEN), HIDDEN), "bk": jnp.zeros((HIDDEN,), jnp.float32),
        "wv": w(ks[4], (HIDDEN, HIDDEN), HIDDEN), "bv": jnp.zeros((HIDDEN,), jnp.float32),
        "wo": w(ks[5], (HIDDEN, HIDDEN), HIDDEN), "bo": jnp.zeros((HIDDEN,), jnp.float32),
        "ln1_g": jnp.ones((HIDDEN,), jnp.float32), "ln1_b": jnp.zeros((HIDDEN,), jnp.float32),
        "ffn_w1": w(ks[6], (HIDDEN, FFN), HIDDEN), "ffn_b1": jnp.zeros((FFN,), jnp.float32),
        "ffn_w2": w(ks[7], (FFN, HIDDEN), FFN), "ffn_b2": jnp.zeros((HIDDEN,), jnp.float32),
        "ln2_g": jnp.ones((HIDDEN,), jnp.float32), "ln2_b": jnp.zeros((HIDDEN,), jnp.float32),
        # classifier head (stored as (in, out), i.e. torch Linear weight transposed)
        "cls_w": w(ks[8], (HIDDEN, NUM_CLASSES), HIDDEN),
        "cls_b": jnp.zeros((NUM_CLASSES,), jnp.float32),
    }
    return p


# ------------------------ pack params into 2 VMEM slabs -----------------------
def pack_params(p):
    scale = 1.0 / (HEAD_DIM ** 0.5)

    w = jnp.zeros((W_ROWS, 128), jnp.float32)
    w = w.at[R_CONV:R_CONV + CONV_K, :CONV_DIM].set(p["conv_w"])     # rows 10..15 zero
    w = w.at[R_FP:R_FP + CONV_DIM, :HIDDEN].set(p["fp_w"])
    wqkv = jnp.concatenate([p["wq"] * scale, p["wk"], p["wv"]], axis=1)   # (32, 96)
    w = w.at[R_QKV:R_QKV + HIDDEN, :3 * HIDDEN].set(wqkv)
    w = w.at[R_WO:R_WO + HIDDEN, :HIDDEN].set(p["wo"])
    w = w.at[R_FFN1:R_FFN1 + HIDDEN, :FFN].set(p["ffn_w1"])
    w = w.at[R_FFN2:R_FFN2 + FFN, :HIDDEN].set(p["ffn_w2"])
    w = w.at[R_CLS:R_CLS + HIDDEN, :NUM_CLASSES].set(p["cls_w"])

    b = jnp.zeros((B_ROWS, 128), jnp.float32)
    b = b.at[BR_CONV_B, :CONV_DIM].set(p["conv_b"])
    b = b.at[BR_FPLN_G, :CONV_DIM].set(p["fp_ln_g"])
    b = b.at[BR_FPLN_B, :CONV_DIM].set(p["fp_ln_b"])
    b = b.at[BR_FP_B, :HIDDEN].set(p["fp_b"])
    bqkv = jnp.concatenate([p["bq"] * scale, p["bk"], p["bv"]])
    b = b.at[BR_QKV_B, :3 * HIDDEN].set(bqkv)
    b = b.at[BR_O_B, :HIDDEN].set(p["bo"])
    b = b.at[BR_LN1_G, :HIDDEN].set(p["ln1_g"])
    b = b.at[BR_LN1_B, :HIDDEN].set(p["ln1_b"])
    b = b.at[BR_FFN1_B, :FFN].set(p["ffn_b1"])
    b = b.at[BR_FFN2_B, :HIDDEN].set(p["ffn_b2"])
    b = b.at[BR_LN2_G, :HIDDEN].set(p["ln2_g"])
    b = b.at[BR_LN2_B, :HIDDEN].set(p["ln2_b"])
    b = b.at[BR_CLS_B, :NUM_CLASSES].set(p["cls_b"])
    return w, b


# ------------------------------- forward pass --------------------------------
def forward(w_slab, b_slab, input_values):
    # One-time XLA im2col; (B*T, 16) patches are the only activation HBM input.
    idx = (jnp.arange(T) * CONV_S)[:, None] + jnp.arange(CONV_K)[None, :]   # (T, K)
    patches = input_values[:, idx].reshape(B * T, CONV_K)                   # (B*T, K)
    patches = jnp.pad(patches, ((0, 0), (0, PATCH_PAD - CONV_K)))           # (B*T, 16)

    args = (patches, w_slab, b_slab)
    logits_pad = pl.pallas_call(
        _fused_forward_kernel,
        out_shape=jax.ShapeDtypeStruct((B, LOGITS_PAD), jnp.float32),
        # no grid: single invocation, everything resident as full VMEM blocks
        in_specs=[pl.BlockSpec(memory_space=pltpu.MemorySpace.VMEM) for _ in args],
        out_specs=pl.BlockSpec(memory_space=pltpu.MemorySpace.VMEM),
        compiler_params=pltpu.CompilerParams(vmem_limit_bytes=4 * 1024 * 1024),
    )(*args)

    return logits_pad[:, :NUM_CLASSES]                                      # (B, NUM_CLASSES)


# ----------------------------------- main -------------------------------------
if __name__ == "__main__":
    key = jax.random.PRNGKey(0)
    k_params, k_x = jax.random.split(key)
    params = init_params(k_params)
    w_slab, b_slab = pack_params(params)          # packed once, outside jit
    input_values = jax.random.normal(k_x, (B, L), jnp.float32)

    logits = jax.jit(forward)(w_slab, b_slab, input_values)
    logits = jax.block_until_ready(logits)

    assert logits.shape == (B, NUM_CLASSES), logits.shape
    assert bool(jnp.all(jnp.isfinite(logits)))
    print("KERNEL_OK")
</pallas_src>

<mosaic_0001>
module attributes {stable_mosaic.version = 11 : i64} {
  func.func @_fused_forward_kernel(%arg0: memref<64x16xf32, #tpu.memory_space<vmem>>, %arg1: memref<240x128xf32, #tpu.memory_space<vmem>>, %arg2: memref<16x128xf32, #tpu.memory_space<vmem>>, %arg3: memref<2x128xf32, #tpu.memory_space<vmem>>) attributes {dimension_semantics = [], scalar_prefetch = 0 : i64, scratch_operands = 0 : i64, tpu.core_type = #tpu.core_type<tc>} {
    %c0 = arith.constant 0 : index
    %c0_0 = arith.constant 0 : index
    %0 = vector.load %arg0[%c0, %c0_0] : memref<64x16xf32, #tpu.memory_space<vmem>>, vector<64x16xf32>
    %c0_1 = arith.constant 0 : index
    %c0_2 = arith.constant 0 : index
    %1 = vector.load %arg1[%c0_1, %c0_2] : memref<240x128xf32, #tpu.memory_space<vmem>>, vector<16x32xf32>
    %cst = arith.constant dense<0.000000e+00> : vector<64x32xf32>
    %2 = tpu.matmul %0, %1, %cst {dimension_numbers = #tpu.dot_dimension_numbers<[1], [0], [0], [1], [0, 0, 1, 1], [], []>} : vector<64x16xf32>, vector<16x32xf32>, vector<64x32xf32> -> vector<64x32xf32>
    %c0_3 = arith.constant 0 : index
    %c0_4 = arith.constant 0 : index
    %3 = vector.load %arg2[%c0_3, %c0_4] : memref<16x128xf32, #tpu.memory_space<vmem>>, vector<1x32xf32>
    %4 = vector.broadcast %3 : vector<1x32xf32> to vector<64x32xf32>
    %5 = arith.addf %2, %4 : vector<64x32xf32>
    %cst_5 = arith.constant 5.000000e-01 : f32
    %6 = vector.broadcast %cst_5 : f32 to vector<64x32xf32>
    %7 = arith.mulf %6, %5 : vector<64x32xf32>
    %cst_6 = arith.constant 0.707106769 : f32
    %8 = vector.broadcast %cst_6 : f32 to vector<64x32xf32>
    %9 = arith.mulf %5, %8 : vector<64x32xf32>
    %10 = math.absf %9 : vector<64x32xf32>
    %cst_7 = arith.constant 0.327591091 : f32
    %11 = vector.broadcast %cst_7 : f32 to vector<64x32xf32>
    %12 = arith.mulf %11, %10 : vector<64x32xf32>
    %cst_8 = arith.constant 1.000000e+00 : f32
    %13 = vector.broadcast %cst_8 : f32 to vector<64x32xf32>
    %14 = arith.addf %13, %12 : vector<64x32xf32>
    %cst_9 = arith.constant 1.000000e+00 : f32
    %15 = vector.broadcast %cst_9 : f32 to vector<64x32xf32>
    %16 = arith.divf %15, %14 : vector<64x32xf32>
    %cst_10 = arith.constant 1.06140542 : f32
    %17 = vector.broadcast %cst_10 : f32 to vector<64x32xf32>
    %18 = arith.mulf %17, %16 : vector<64x32xf32>
    %cst_11 = arith.constant -1.45315206 : f32
    %19 = vector.broadcast %cst_11 : f32 to vector<64x32xf32>
    %20 = arith.addf %18, %19 : vector<64x32xf32>
    %21 = arith.mulf %20, %16 : vector<64x32xf32>
    %cst_12 = arith.constant 1.42141378 : f32
    %22 = vector.broadcast %cst_12 : f32 to vector<64x32xf32>
    %23 = arith.addf %21, %22 : vector<64x32xf32>
    %24 = arith.mulf %23, %16 : vector<64x32xf32>
    %cst_13 = arith.constant -0.284496725 : f32
    %25 = vector.broadcast %cst_13 : f32 to vector<64x32xf32>
    %26 = arith.addf %24, %25 : vector<64x32xf32>
    %27 = arith.mulf %26, %16 : vector<64x32xf32>
    %cst_14 = arith.constant 0.254829586 : f32
    %28 = vector.broadcast %cst_14 : f32 to vector<64x32xf32>
    %29 = arith.addf %27, %28 : vector<64x32xf32>
    %30 = arith.mulf %29, %16 : vector<64x32xf32>
    %cst_15 = arith.constant 0.000000e+00 : f32
    %31 = vector.broadcast %cst_15 : f32 to vector<64x32xf32>
    %32 = arith.subf %31, %10 : vector<64x32xf32>
    %33 = arith.mulf %32, %10 : vector<64x32xf32>
    %34 = math.exp %33 : vector<64x32xf32>
    %35 = arith.mulf %30, %34 : vector<64x32xf32>
    %cst_16 = arith.constant 1.000000e+00 : f32
    %36 = vector.broadcast %cst_16 : f32 to vector<64x32xf32>
    %37 = arith.subf %36, %35 : vector<64x32xf32>
    %cst_17 = arith.constant 0.000000e+00 : f32
    %38 = vector.broadcast %cst_17 : f32 to vector<64x32xf32>
    %39 = arith.cmpf oge, %9, %38 : vector<64x32xf32>
    %cst_18 = arith.constant 0.000000e+00 : f32
    %40 = vector.broadcast %cst_18 : f32 to vector<64x32xf32>
    %41 = arith.subf %40, %37 : vector<64x32xf32>
    %42 = arith.select %39, %37, %41 : vector<64x32xi1>, vector<64x32xf32>
    %cst_19 = arith.constant 1.000000e+00 : f32
    %43 = vector.broadcast %cst_19 : f32 to vector<64x32xf32>
    %44 = arith.addf %43, %42 : vector<64x32xf32>
    %45 = arith.mulf %7, %44 : vector<64x32xf32>
    %c1 = arith.constant 1 : index
    %c0_20 = arith.constant 0 : index
    %46 = vector.load %arg2[%c1, %c0_20] : memref<16x128xf32, #tpu.memory_space<vmem>>, vector<1x32xf32>
    %c2 = arith.constant 2 : index
    %c0_21 = arith.constant 0 : index
    %47 = vector.load %arg2[%c2, %c0_21] : memref<16x128xf32, #tpu.memory_space<vmem>>, vector<1x32xf32>
    %cst_22 = arith.constant dense<0.000000e+00> : vector<64xf32>
    %48 = vector.multi_reduction <add>, %45, %cst_22 [1] : vector<64x32xf32> to vector<64xf32>
    %49 = vector.shape_cast %48 : vector<64xf32> to vector<64x1xf32>
    %cst_23 = arith.constant 3.200000e+01 : f32
    %50 = vector.broadcast %cst_23 : f32 to vector<64x1xf32>
    %51 = arith.divf %49, %50 : vector<64x1xf32>
    %52 = vector.broadcast %51 : vector<64x1xf32> to vector<64x32xf32>
    %53 = arith.subf %45, %52 : vector<64x32xf32>
    %54 = arith.mulf %53, %53 : vector<64x32xf32>
    %cst_24 = arith.constant dense<0.000000e+00> : vector<64xf32>
    %55 = vector.multi_reduction <add>, %54, %cst_24 [1] : vector<64x32xf32> to vector<64xf32>
    %56 = vector.shape_cast %55 : vector<64xf32> to vector<64x1xf32>
    %cst_25 = arith.constant 3.200000e+01 : f32
    %57 = vector.broadcast %cst_25 : f32 to vector<64x1xf32>
    %58 = arith.divf %56, %57 : vector<64x1xf32>
    %59 = vector.broadcast %51 : vector<64x1xf32> to vector<64x32xf32>
    %60 = arith.subf %45, %59 : vector<64x32xf32>
    %cst_26 = arith.constant 9.99999974E-6 : f32
    %61 = vector.broadcast %cst_26 : f32 to vector<64x1xf32>
    %62 = arith.addf %58, %61 : vector<64x1xf32>
    %63 = math.rsqrt %62 : vector<64x1xf32>
    %64 = vector.broadcast %63 : vector<64x1xf32> to vector<64x32xf32>
    %65 = arith.mulf %60, %64 : vector<64x32xf32>
    %66 = vector.broadcast %46 : vector<1x32xf32> to vector<64x32xf32>
    %67 = arith.mulf %65, %66 : vector<64x32xf32>
    %68 = vector.broadcast %47 : vector<1x32xf32> to vector<64x32xf32>
    %69 = arith.addf %67, %68 : vector<64x32xf32>
    %c16 = arith.constant 16 : index
    %c0_27 = arith.constant 0 : index
    %70 = vector.load %arg1[%c16, %c0_27] : memref<240x128xf32, #tpu.memory_space<vmem>>, vector<32x32xf32>
    %cst_28 = arith.constant dense<0.000000e+00> : vector<64x32xf32>
    %71 = tpu.matmul %69, %70, %cst_28 {dimension_numbers = #tpu.dot_dimension_numbers<[1], [0], [0], [1], [0, 0, 1, 1], [], []>} : vector<64x32xf32>, vector<32x32xf32>, vector<64x32xf32> -> vector<64x32xf32>
    %c3 = arith.constant 3 : index
    %c0_29 = arith.constant 0 : index
    %72 = vector.load %arg2[%c3, %c0_29] : memref<16x128xf32, #tpu.memory_space<vmem>>, vector<1x32xf32>
    %73 = vector.broadcast %72 : vector<1x32xf32> to vector<64x32xf32>
    %74 = arith.addf %71, %73 : vector<64x32xf32>
    %c48 = arith.constant 48 : index
    %c0_30 = arith.constant 0 : index
    %75 = vector.load %arg1[%c48, %c0_30] : memref<240x128xf32, #tpu.memory_space<vmem>>, vector<32x96xf32>
    %cst_31 = arith.constant dense<0.000000e+00> : vector<64x96xf32>
    %76 = tpu.matmul %74, %75, %cst_31 {dimension_numbers = #tpu.dot_dimension_numbers<[1], [0], [0], [1], [0, 0, 1, 1], [], []>} : vector<64x32xf32>, vector<32x96xf32>, vector<64x96xf32> -> vector<64x96xf32>
    %c4 = arith.constant 4 : index
    %c0_32 = arith.constant 0 : index
    %77 = vector.load %arg2[%c4, %c0_32] : memref<16x128xf32, #tpu.memory_space<vmem>>, vector<1x96xf32>
    %78 = vector.broadcast %77 : vector<1x96xf32> to vector<64x96xf32>
    %79 = arith.addf %76, %78 : vector<64x96xf32>
    %80 = vector.extract_strided_slice %79 {offsets = [0, 0], sizes = [32, 8], strides = [1, 1]} : vector<64x96xf32> to vector<32x8xf32>
    %81 = vector.extract_strided_slice %79 {offsets = [0, 32], sizes = [32, 8], strides = [1, 1]} : vector<64x96xf32> to vector<32x8xf32>
    %82 = vector.extract_strided_slice %79 {offsets = [0, 64], sizes = [32, 8], strides = [1, 1]} : vector<64x96xf32> to vector<32x8xf32>
    %cst_33 = arith.constant dense<0.000000e+00> : vector<32x32xf32>
    %83 = tpu.matmul %80, %81, %cst_33 {dimension_numbers = #tpu.dot_dimension_numbers<[1], [1], [0], [0], [0, 0, 1, 0], [], []>} : vector<32x8xf32>, vector<32x8xf32>, vector<32x32xf32> -> vector<32x32xf32>
    %cst_34 = arith.constant dense<0xFF800000> : vector<32xf32>
    %84 = vector.multi_reduction <maximumf>, %83, %cst_34 [1] : vector<32x32xf32> to vector<32xf32>
    %85 = vector.shape_cast %84 : vector<32xf32> to vector<32x1xf32>
    %86 = vector.broadcast %85 : vector<32x1xf32> to vector<32x32xf32>
    %87 = arith.subf %83, %86 : vector<32x32xf32>
    %88 = math.exp %87 : vector<32x32xf32>
    %cst_35 = arith.constant dense<0.000000e+00> : vector<32xf32>
    %89 = vector.multi_reduction <add>, %88, %cst_35 [1] : vector<32x32xf32> to vector<32xf32>
    %90 = vector.shape_cast %89 : vector<32xf32> to vector<32x1xf32>
    %91 = tpu.reciprocal %90 {approx = true} : vector<32x1xf32> -> vector<32x1xf32>
    %92 = vector.broadcast %91 : vector<32x1xf32> to vector<32x32xf32>
    %93 = arith.mulf %88, %92 : vector<32x32xf32>
    %cst_36 = arith.constant dense<0.000000e+00> : vector<32x8xf32>
    %94 = tpu.matmul %93, %82, %cst_36 {dimension_numbers = #tpu.dot_dimension_numbers<[1], [0], [0], [1], [0, 0, 1, 1], [], []>} : vector<32x32xf32>, vector<32x8xf32>, vector<32x8xf32> -> vector<32x8xf32>
    %95 = vector.extract_strided_slice %79 {offsets = [0, 8], sizes = [32, 8], strides = [1, 1]} : vector<64x96xf32> to vector<32x8xf32>
    %96 = vector.extract_strided_slice %79 {offsets = [0, 40], sizes = [32, 8], strides = [1, 1]} : vector<64x96xf32> to vector<32x8xf32>
    %97 = vector.extract_strided_slice %79 {offsets = [0, 72], sizes = [32, 8], strides = [1, 1]} : vector<64x96xf32> to vector<32x8xf32>
    %cst_37 = arith.constant dense<0.000000e+00> : vector<32x32xf32>
    %98 = tpu.matmul %95, %96, %cst_37 {dimension_numbers = #tpu.dot_dimension_numbers<[1], [1], [0], [0], [0, 0, 1, 0], [], []>} : vector<32x8xf32>, vector<32x8xf32>, vector<32x32xf32> -> vector<32x32xf32>
    %cst_38 = arith.constant dense<0xFF800000> : vector<32xf32>
    %99 = vector.multi_reduction <maximumf>, %98, %cst_38 [1] : vector<32x32xf32> to vector<32xf32>
    %100 = vector.shape_cast %99 : vector<32xf32> to vector<32x1xf32>
    %101 = vector.broadcast %100 : vector<32x1xf32> to vector<32x32xf32>
    %102 = arith.subf %98, %101 : vector<32x32xf32>
    %103 = math.exp %102 : vector<32x32xf32>
    %cst_39 = arith.constant dense<0.000000e+00> : vector<32xf32>
    %104 = vector.multi_reduction <add>, %103, %cst_39 [1] : vector<32x32xf32> to vector<32xf32>
    %105 = vector.shape_cast %104 : vector<32xf32> to vector<32x1xf32>
    %106 = tpu.reciprocal %105 {approx = true} : vector<32x1xf32> -> vector<32x1xf32>
    %107 = vector.broadcast %106 : vector<32x1xf32> to vector<32x32xf32>
    %108 = arith.mulf %103, %107 : vector<32x32xf32>
    %cst_40 = arith.constant dense<0.000000e+00> : vector<32x8xf32>
    %109 = tpu.matmul %108, %97, %cst_40 {dimension_numbers = #tpu.dot_dimension_numbers<[1], [0], [0], [1], [0, 0, 1, 1], [], []>} : vector<32x32xf32>, vector<32x8xf32>, vector<32x8xf32> -> vector<32x8xf32>
    %110 = vector.extract_strided_slice %79 {offsets = [0, 16], sizes = [32, 8], strides = [1, 1]} : vector<64x96xf32> to vector<32x8xf32>
    %111 = vector.extract_strided_slice %79 {offsets = [0, 48], sizes = [32, 8], strides = [1, 1]} : vector<64x96xf32> to vector<32x8xf32>
    %112 = vector.extract_strided_slice %79 {offsets = [0, 80], sizes = [32, 8], strides = [1, 1]} : vector<64x96xf32> to vector<32x8xf32>
    %cst_41 = arith.constant dense<0.000000e+00> : vector<32x32xf32>
    %113 = tpu.matmul %110, %111, %cst_41 {dimension_numbers = #tpu.dot_dimension_numbers<[1], [1], [0], [0], [0, 0, 1, 0], [], []>} : vector<32x8xf32>, vector<32x8xf32>, vector<32x32xf32> -> vector<32x32xf32>
    %cst_42 = arith.constant dense<0xFF800000> : vector<32xf32>
    %114 = vector.multi_reduction <maximumf>, %113, %cst_42 [1] : vector<32x32xf32> to vector<32xf32>
    %115 = vector.shape_cast %114 : vector<32xf32> to vector<32x1xf32>
    %116 = vector.broadcast %115 : vector<32x1xf32> to vector<32x32xf32>
    %117 = arith.subf %113, %116 : vector<32x32xf32>
    %118 = math.exp %117 : vector<32x32xf32>
    %cst_43 = arith.constant dense<0.000000e+00> : vector<32xf32>
    %119 = vector.multi_reduction <add>, %118, %cst_43 [1] : vector<32x32xf32> to vector<32xf32>
    %120 = vector.shape_cast %119 : vector<32xf32> to vector<32x1xf32>
    %121 = tpu.reciprocal %120 {approx = true} : vector<32x1xf32> -> vector<32x1xf32>
    %122 = vector.broadcast %121 : vector<32x1xf32> to vector<32x32xf32>
    %123 = arith.mulf %118, %122 : vector<32x32xf32>
    %cst_44 = arith.constant dense<0.000000e+00> : vector<32x8xf32>
    %124 = tpu.matmul %123, %112, %cst_44 {dimension_numbers = #tpu.dot_dimension_numbers<[1], [0], [0], [1], [0, 0, 1, 1], [], []>} : vector<32x32xf32>, vector<32x8xf32>, vector<32x8xf32> -> vector<32x8xf32>
    %125 = vector.extract_strided_slice %79 {offsets = [0, 24], sizes = [32, 8], strides = [1, 1]} : vector<64x96xf32> to vector<32x8xf32>
    %126 = vector.extract_strided_slice %79 {offsets = [0, 56], sizes = [32, 8], strides = [1, 1]} : vector<64x96xf32> to vector<32x8xf32>
    %127 = vector.extract_strided_slice %79 {offsets = [0, 88], sizes = [32, 8], strides = [1, 1]} : vector<64x96xf32> to vector<32x8xf32>
    %cst_45 = arith.constant dense<0.000000e+00> : vector<32x32xf32>
    %128 = tpu.matmul %125, %126, %cst_45 {dimension_numbers = #tpu.dot_dimension_numbers<[1], [1], [0], [0], [0, 0, 1, 0], [], []>} : vector<32x8xf32>, vector<32x8xf32>, vector<32x32xf32> -> vector<32x32xf32>
    %cst_46 = arith.constant dense<0xFF800000> : vector<32xf32>
    %129 = vector.multi_reduction <maximumf>, %128, %cst_46 [1] : vector<32x32xf32> to vector<32xf32>
    %130 = vector.shape_cast %129 : vector<32xf32> to vector<32x1xf32>
    %131 = vector.broadcast %130 : vector<32x1xf32> to vector<32x32xf32>
    %132 = arith.subf %128, %131 : vector<32x32xf32>
    %133 = math.exp %132 : vector<32x32xf32>
    %cst_47 = arith.constant dense<0.000000e+00> : vector<32xf32>
    %134 = vector.multi_reduction <add>, %133, %cst_47 [1] : vector<32x32xf32> to vector<32xf32>
    %135 = vector.shape_cast %134 : vector<32xf32> to vector<32x1xf32>
    %136 = tpu.reciprocal %135 {approx = true} : vector<32x1xf32> -> vector<32x1xf32>
    %137 = vector.broadcast %136 : vector<32x1xf32> to vector<32x32xf32>
    %138 = arith.mulf %133, %137 : vector<32x32xf32>
    %cst_48 = arith.constant dense<0.000000e+00> : vector<32x8xf32>
    %139 = tpu.matmul %138, %127, %cst_48 {dimension_numbers = #tpu.dot_dimension_numbers<[1], [0], [0], [1], [0, 0, 1, 1], [], []>} : vector<32x32xf32>, vector<32x8xf32>, vector<32x8xf32> -> vector<32x8xf32>
    %140 = tpu.concatenate %94, %109, %124, %139 in 1 : vector<32x8xf32>, vector<32x8xf32>, vector<32x8xf32>, vector<32x8xf32> -> vector<32x32xf32>
    %141 = vector.extract_strided_slice %79 {offsets = [32, 0], sizes = [32, 8], strides = [1, 1]} : vector<64x96xf32> to vector<32x8xf32>
    %142 = vector.extract_strided_slice %79 {offsets = [32, 32], sizes = [32, 8], strides = [1, 1]} : vector<64x96xf32> to vector<32x8xf32>
    %143 = vector.extract_strided_slice %79 {offsets = [32, 64], sizes = [32, 8], strides = [1, 1]} : vector<64x96xf32> to vector<32x8xf32>
    %cst_49 = arith.constant dense<0.000000e+00> : vector<32x32xf32>
    %144 = tpu.matmul %141, %142, %cst_49 {dimension_numbers = #tpu.dot_dimension_numbers<[1], [1], [0], [0], [0, 0, 1, 0], [], []>} : vector<32x8xf32>, vector<32x8xf32>, vector<32x32xf32> -> vector<32x32xf32>
    %cst_50 = arith.constant dense<0xFF800000> : vector<32xf32>
    %145 = vector.multi_reduction <maximumf>, %144, %cst_50 [1] : vector<32x32xf32> to vector<32xf32>
    %146 = vector.shape_cast %145 : vector<32xf32> to vector<32x1xf32>
    %147 = vector.broadcast %146 : vector<32x1xf32> to vector<32x32xf32>
    %148 = arith.subf %144, %147 : vector<32x32xf32>
    %149 = math.exp %148 : vector<32x32xf32>
    %cst_51 = arith.constant dense<0.000000e+00> : vector<32xf32>
    %150 = vector.multi_reduction <add>, %149, %cst_51 [1] : vector<32x32xf32> to vector<32xf32>
    %151 = vector.shape_cast %150 : vector<32xf32> to vector<32x1xf32>
    %152 = tpu.reciprocal %151 {approx = true} : vector<32x1xf32> -> vector<32x1xf32>
    %153 = vector.broadcast %152 : vector<32x1xf32> to vector<32x32xf32>
    %154 = arith.mulf %149, %153 : vector<32x32xf32>
    %cst_52 = arith.constant dense<0.000000e+00> : vector<32x8xf32>
    %155 = tpu.matmul %154, %143, %cst_52 {dimension_numbers = #tpu.dot_dimension_numbers<[1], [0], [0], [1], [0, 0, 1, 1], [], []>} : vector<32x32xf32>, vector<32x8xf32>, vector<32x8xf32> -> vector<32x8xf32>
    %156 = vector.extract_strided_slice %79 {offsets = [32, 8], sizes = [32, 8], strides = [1, 1]} : vector<64x96xf32> to vector<32x8xf32>
    %157 = vector.extract_strided_slice %79 {offsets = [32, 40], sizes = [32, 8], strides = [1, 1]} : vector<64x96xf32> to vector<32x8xf32>
    %158 = vector.extract_strided_slice %79 {offsets = [32, 72], sizes = [32, 8], strides = [1, 1]} : vector<64x96xf32> to vector<32x8xf32>
    %cst_53 = arith.constant dense<0.000000e+00> : vector<32x32xf32>
    %159 = tpu.matmul %156, %157, %cst_53 {dimension_numbers = #tpu.dot_dimension_numbers<[1], [1], [0], [0], [0, 0, 1, 0], [], []>} : vector<32x8xf32>, vector<32x8xf32>, vector<32x32xf32> -> vector<32x32xf32>
    %cst_54 = arith.constant dense<0xFF800000> : vector<32xf32>
    %160 = vector.multi_reduction <maximumf>, %159, %cst_54 [1] : vector<32x32xf32> to vector<32xf32>
    %161 = vector.shape_cast %160 : vector<32xf32> to vector<32x1xf32>
    %162 = vector.broadcast %161 : vector<32x1xf32> to vector<32x32xf32>
    %163 = arith.subf %159, %162 : vector<32x32xf32>
    %164 = math.exp %163 : vector<32x32xf32>
    %cst_55 = arith.constant dense<0.000000e+00> : vector<32xf32>
    %165 = vector.multi_reduction <add>, %164, %cst_55 [1] : vector<32x32xf32> to vector<32xf32>
    %166 = vector.shape_cast %165 : vector<32xf32> to vector<32x1xf32>
    %167 = tpu.reciprocal %166 {approx = true} : vector<32x1xf32> -> vector<32x1xf32>
    %168 = vector.broadcast %167 : vector<32x1xf32> to vector<32x32xf32>
    %169 = arith.mulf %164, %168 : vector<32x32xf32>
    %cst_56 = arith.constant dense<0.000000e+00> : vector<32x8xf32>
    %170 = tpu.matmul %169, %158, %cst_56 {dimension_numbers = #tpu.dot_dimension_numbers<[1], [0], [0], [1], [0, 0, 1, 1], [], []>} : vector<32x32xf32>, vector<32x8xf32>, vector<32x8xf32> -> vector<32x8xf32>
    %171 = vector.extract_strided_slice %79 {offsets = [32, 16], sizes = [32, 8], strides = [1, 1]} : vector<64x96xf32> to vector<32x8xf32>
    %172 = vector.extract_strided_slice %79 {offsets = [32, 48], sizes = [32, 8], strides = [1, 1]} : vector<64x96xf32> to vector<32x8xf32>
    %173 = vector.extract_strided_slice %79 {offsets = [32, 80], sizes = [32, 8], strides = [1, 1]} : vector<64x96xf32> to vector<32x8xf32>
    %cst_57 = arith.constant dense<0.000000e+00> : vector<32x32xf32>
    %174 = tpu.matmul %171, %172, %cst_57 {dimension_numbers = #tpu.dot_dimension_numbers<[1], [1], [0], [0], [0, 0, 1, 0], [], []>} : vector<32x8xf32>, vector<32x8xf32>, vector<32x32xf32> -> vector<32x32xf32>
    %cst_58 = arith.constant dense<0xFF800000> : vector<32xf32>
    %175 = vector.multi_reduction <maximumf>, %174, %cst_58 [1] : vector<32x32xf32> to vector<32xf32>
    %176 = vector.shape_cast %175 : vector<32xf32> to vector<32x1xf32>
    %177 = vector.broadcast %176 : vector<32x1xf32> to vector<32x32xf32>
    %178 = arith.subf %174, %177 : vector<32x32xf32>
    %179 = math.exp %178 : vector<32x32xf32>
    %cst_59 = arith.constant dense<0.000000e+00> : vector<32xf32>
    %180 = vector.multi_reduction <add>, %179, %cst_59 [1] : vector<32x32xf32> to vector<32xf32>
    %181 = vector.shape_cast %180 : vector<32xf32> to vector<32x1xf32>
    %182 = tpu.reciprocal %181 {approx = true} : vector<32x1xf32> -> vector<32x1xf32>
    %183 = vector.broadcast %182 : vector<32x1xf32> to vector<32x32xf32>
    %184 = arith.mulf %179, %183 : vector<32x32xf32>
    %cst_60 = arith.constant dense<0.000000e+00> : vector<32x8xf32>
    %185 = tpu.matmul %184, %173, %cst_60 {dimension_numbers = #tpu.dot_dimension_numbers<[1], [0], [0], [1], [0, 0, 1, 1], [], []>} : vector<32x32xf32>, vector<32x8xf32>, vector<32x8xf32> -> vector<32x8xf32>
    %186 = vector.extract_strided_slice %79 {offsets = [32, 24], sizes = [32, 8], strides = [1, 1]} : vector<64x96xf32> to vector<32x8xf32>
    %187 = vector.extract_strided_slice %79 {offsets = [32, 56], sizes = [32, 8], strides = [1, 1]} : vector<64x96xf32> to vector<32x8xf32>
    %188 = vector.extract_strided_slice %79 {offsets = [32, 88], sizes = [32, 8], strides = [1, 1]} : vector<64x96xf32> to vector<32x8xf32>
    %cst_61 = arith.constant dense<0.000000e+00> : vector<32x32xf32>
    %189 = tpu.matmul %186, %187, %cst_61 {dimension_numbers = #tpu.dot_dimension_numbers<[1], [1], [0], [0], [0, 0, 1, 0], [], []>} : vector<32x8xf32>, vector<32x8xf32>, vector<32x32xf32> -> vector<32x32xf32>
    %cst_62 = arith.constant dense<0xFF800000> : vector<32xf32>
    %190 = vector.multi_reduction <maximumf>, %189, %cst_62 [1] : vector<32x32xf32> to vector<32xf32>
    %191 = vector.shape_cast %190 : vector<32xf32> to vector<32x1xf32>
    %192 = vector.broadcast %191 : vector<32x1xf32> to vector<32x32xf32>
    %193 = arith.subf %189, %192 : vector<32x32xf32>
    %194 = math.exp %193 : vector<32x32xf32>
    %cst_63 = arith.constant dense<0.000000e+00> : vector<32xf32>
    %195 = vector.multi_reduction <add>, %194, %cst_63 [1] : vector<32x32xf32> to vector<32xf32>
    %196 = vector.shape_cast %195 : vector<32xf32> to vector<32x1xf32>
    %197 = tpu.reciprocal %196 {approx = true} : vector<32x1xf32> -> vector<32x1xf32>
    %198 = vector.broadcast %197 : vector<32x1xf32> to vector<32x32xf32>
    %199 = arith.mulf %194, %198 : vector<32x32xf32>
    %cst_64 = arith.constant dense<0.000000e+00> : vector<32x8xf32>
    %200 = tpu.matmul %199, %188, %cst_64 {dimension_numbers = #tpu.dot_dimension_numbers<[1], [0], [0], [1], [0, 0, 1, 1], [], []>} : vector<32x32xf32>, vector<32x8xf32>, vector<32x8xf32> -> vector<32x8xf32>
    %201 = tpu.concatenate %155, %170, %185, %200 in 1 : vector<32x8xf32>, vector<32x8xf32>, vector<32x8xf32>, vector<32x8xf32> -> vector<32x32xf32>
    %202 = tpu.concatenate %140, %201 in 0 : vector<32x32xf32>, vector<32x32xf32> -> vector<64x32xf32>
    %c80 = arith.constant 80 : index
    %c0_65 = arith.constant 0 : index
    %203 = vector.load %arg1[%c80, %c0_65] : memref<240x128xf32, #tpu.memory_space<vmem>>, vector<32x32xf32>
    %cst_66 = arith.constant dense<0.000000e+00> : vector<64x32xf32>
    %204 = tpu.matmul %202, %203, %cst_66 {dimension_numbers = #tpu.dot_dimension_numbers<[1], [0], [0], [1], [0, 0, 1, 1], [], []>} : vector<64x32xf32>, vector<32x32xf32>, vector<64x32xf32> -> vector<64x32xf32>
    %c5 = arith.constant 5 : index
    %c0_67 = arith.constant 0 : index
    %205 = vector.load %arg2[%c5, %c0_67] : memref<16x128xf32, #tpu.memory_space<vmem>>, vector<1x32xf32>
    %206 = vector.broadcast %205 : vector<1x32xf32> to vector<64x32xf32>
    %207 = arith.addf %204, %206 : vector<64x32xf32>
    %208 = arith.addf %74, %207 : vector<64x32xf32>
    %c6 = arith.constant 6 : index
    %c0_68 = arith.constant 0 : index
    %209 = vector.load %arg2[%c6, %c0_68] : memref<16x128xf32, #tpu.memory_space<vmem>>, vector<1x32xf32>
    %c7 = arith.constant 7 : index
    %c0_69 = arith.constant 0 : index
    %210 = vector.load %arg2[%c7, %c0_69] : memref<16x128xf32, #tpu.memory_space<vmem>>, vector<1x32xf32>
    %cst_70 = arith.constant dense<0.000000e+00> : vector<64xf32>
    %211 = vector.multi_reduction <add>, %208, %cst_70 [1] : vector<64x32xf32> to vector<64xf32>
    %212 = vector.shape_cast %211 : vector<64xf32> to vector<64x1xf32>
    %cst_71 = arith.constant 3.200000e+01 : f32
    %213 = vector.broadcast %cst_71 : f32 to vector<64x1xf32>
    %214 = arith.divf %212, %213 : vector<64x1xf32>
    %215 = vector.broadcast %214 : vector<64x1xf32> to vector<64x32xf32>
    %216 = arith.subf %208, %215 : vector<64x32xf32>
    %217 = arith.mulf %216, %216 : vector<64x32xf32>
    %cst_72 = arith.constant dense<0.000000e+00> : vector<64xf32>
    %218 = vector.multi_reduction <add>, %217, %cst_72 [1] : vector<64x32xf32> to vector<64xf32>
    %219 = vector.shape_cast %218 : vector<64xf32> to vector<64x1xf32>
    %cst_73 = arith.constant 3.200000e+01 : f32
    %220 = vector.broadcast %cst_73 : f32 to vector<64x1xf32>
    %221 = arith.divf %219, %220 : vector<64x1xf32>
    %222 = vector.broadcast %214 : vector<64x1xf32> to vector<64x32xf32>
    %223 = arith.subf %208, %222 : vector<64x32xf32>
    %cst_74 = arith.constant 9.99999974E-6 : f32
    %224 = vector.broadcast %cst_74 : f32 to vector<64x1xf32>
    %225 = arith.addf %221, %224 : vector<64x1xf32>
    %226 = math.rsqrt %225 : vector<64x1xf32>
    %227 = vector.broadcast %226 : vector<64x1xf32> to vector<64x32xf32>
    %228 = arith.mulf %223, %227 : vector<64x32xf32>
    %229 = vector.broadcast %209 : vector<1x32xf32> to vector<64x32xf32>
    %230 = arith.mulf %228, %229 : vector<64x32xf32>
    %231 = vector.broadcast %210 : vector<1x32xf32> to vector<64x32xf32>
    %232 = arith.addf %230, %231 : vector<64x32xf32>
    %c112 = arith.constant 112 : index
    %c0_75 = arith.constant 0 : index
    %233 = vector.load %arg1[%c112, %c0_75] : memref<240x128xf32, #tpu.memory_space<vmem>>, vector<32x64xf32>
    %cst_76 = arith.constant dense<0.000000e+00> : vector<64x64xf32>
    %234 = tpu.matmul %232, %233, %cst_76 {dimension_numbers = #tpu.dot_dimension_numbers<[1], [0], [0], [1], [0, 0, 1, 1], [], []>} : vector<64x32xf32>, vector<32x64xf32>, vector<64x64xf32> -> vector<64x64xf32>
    %c8 = arith.constant 8 : index
    %c0_77 = arith.constant 0 : index
    %235 = vector.load %arg2[%c8, %c0_77] : memref<16x128xf32, #tpu.memory_space<vmem>>, vector<1x64xf32>
    %236 = vector.broadcast %235 : vector<1x64xf32> to vector<64x64xf32>
    %237 = arith.addf %234, %236 : vector<64x64xf32>
    %cst_78 = arith.constant 5.000000e-01 : f32
    %238 = vector.broadcast %cst_78 : f32 to vector<64x64xf32>
    %239 = arith.mulf %238, %237 : vector<64x64xf32>
    %cst_79 = arith.constant 0.707106769 : f32
    %240 = vector.broadcast %cst_79 : f32 to vector<64x64xf32>
    %241 = arith.mulf %237, %240 : vector<64x64xf32>
    %242 = math.absf %241 : vector<64x64xf32>
    %cst_80 = arith.constant 0.327591091 : f32
    %243 = vector.broadcast %cst_80 : f32 to vector<64x64xf32>
    %244 = arith.mulf %243, %242 : vector<64x64xf32>
    %cst_81 = arith.constant 1.000000e+00 : f32
    %245 = vector.broadcast %cst_81 : f32 to vector<64x64xf32>
    %246 = arith.addf %245, %244 : vector<64x64xf32>
    %cst_82 = arith.constant 1.000000e+00 : f32
    %247 = vector.broadcast %cst_82 : f32 to vector<64x64xf32>
    %248 = arith.divf %247, %246 : vector<64x64xf32>
    %cst_83 = arith.constant 1.06140542 : f32
    %249 = vector.broadcast %cst_83 : f32 to vector<64x64xf32>
    %250 = arith.mulf %249, %248 : vector<64x64xf32>
    %cst_84 = arith.constant -1.45315206 : f32
    %251 = vector.broadcast %cst_84 : f32 to vector<64x64xf32>
    %252 = arith.addf %250, %251 : vector<64x64xf32>
    %253 = arith.mulf %252, %248 : vector<64x64xf32>
    %cst_85 = arith.constant 1.42141378 : f32
    %254 = vector.broadcast %cst_85 : f32 to vector<64x64xf32>
    %255 = arith.addf %253, %254 : vector<64x64xf32>
    %256 = arith.mulf %255, %248 : vector<64x64xf32>
    %cst_86 = arith.constant -0.284496725 : f32
    %257 = vector.broadcast %cst_86 : f32 to vector<64x64xf32>
    %258 = arith.addf %256, %257 : vector<64x64xf32>
    %259 = arith.mulf %258, %248 : vector<64x64xf32>
    %cst_87 = arith.constant 0.254829586 : f32
    %260 = vector.broadcast %cst_87 : f32 to vector<64x64xf32>
    %261 = arith.addf %259, %260 : vector<64x64xf32>
    %262 = arith.mulf %261, %248 : vector<64x64xf32>
    %cst_88 = arith.constant 0.000000e+00 : f32
    %263 = vector.broadcast %cst_88 : f32 to vector<64x64xf32>
    %264 = arith.subf %263, %242 : vector<64x64xf32>
    %265 = arith.mulf %264, %242 : vector<64x64xf32>
    %266 = math.exp %265 : vector<64x64xf32>
    %267 = arith.mulf %262, %266 : vector<64x64xf32>
    %cst_89 = arith.constant 1.000000e+00 : f32
    %268 = vector.broadcast %cst_89 : f32 to vector<64x64xf32>
    %269 = arith.subf %268, %267 : vector<64x64xf32>
    %cst_90 = arith.constant 0.000000e+00 : f32
    %270 = vector.broadcast %cst_90 : f32 to vector<64x64xf32>
    %271 = arith.cmpf oge, %241, %270 : vector<64x64xf32>
    %cst_91 = arith.constant 0.000000e+00 : f32
    %272 = vector.broadcast %cst_91 : f32 to vector<64x64xf32>
    %273 = arith.subf %272, %269 : vector<64x64xf32>
    %274 = arith.select %271, %269, %273 : vector<64x64xi1>, vector<64x64xf32>
    %cst_92 = arith.constant 1.000000e+00 : f32
    %275 = vector.broadcast %cst_92 : f32 to vector<64x64xf32>
    %276 = arith.addf %275, %274 : vector<64x64xf32>
    %277 = arith.mulf %239, %276 : vector<64x64xf32>
    %c144 = arith.constant 144 : index
    %c0_93 = arith.constant 0 : index
    %278 = vector.load %arg1[%c144, %c0_93] : memref<240x128xf32, #tpu.memory_space<vmem>>, vector<64x32xf32>
    %cst_94 = arith.constant dense<0.000000e+00> : vector<64x32xf32>
    %279 = tpu.matmul %277, %278, %cst_94 {dimension_numbers = #tpu.dot_dimension_numbers<[1], [0], [0], [1], [0, 0, 1, 1], [], []>} : vector<64x64xf32>, vector<64x32xf32>, vector<64x32xf32> -> vector<64x32xf32>
    %c9 = arith.constant 9 : index
    %c0_95 = arith.constant 0 : index
    %280 = vector.load %arg2[%c9, %c0_95] : memref<16x128xf32, #tpu.memory_space<vmem>>, vector<1x32xf32>
    %281 = vector.broadcast %280 : vector<1x32xf32> to vector<64x32xf32>
    %282 = arith.addf %279, %281 : vector<64x32xf32>
    %283 = arith.addf %232, %282 : vector<64x32xf32>
    %c10 = arith.constant 10 : index
    %c0_96 = arith.constant 0 : index
    %284 = vector.load %arg2[%c10, %c0_96] : memref<16x128xf32, #tpu.memory_space<vmem>>, vector<1x32xf32>
    %c11 = arith.constant 11 : index
    %c0_97 = arith.constant 0 : index
    %285 = vector.load %arg2[%c11, %c0_97] : memref<16x128xf32, #tpu.memory_space<vmem>>, vector<1x32xf32>
    %cst_98 = arith.constant dense<0.000000e+00> : vector<64xf32>
    %286 = vector.multi_reduction <add>, %283, %cst_98 [1] : vector<64x32xf32> to vector<64xf32>
    %287 = vector.shape_cast %286 : vector<64xf32> to vector<64x1xf32>
    %cst_99 = arith.constant 3.200000e+01 : f32
    %288 = vector.broadcast %cst_99 : f32 to vector<64x1xf32>
    %289 = arith.divf %287, %288 : vector<64x1xf32>
    %290 = vector.broadcast %289 : vector<64x1xf32> to vector<64x32xf32>
    %291 = arith.subf %283, %290 : vector<64x32xf32>
    %292 = arith.mulf %291, %291 : vector<64x32xf32>
    %cst_100 = arith.constant dense<0.000000e+00> : vector<64xf32>
    %293 = vector.multi_reduction <add>, %292, %cst_100 [1] : vector<64x32xf32> to vector<64xf32>
    %294 = vector.shape_cast %293 : vector<64xf32> to vector<64x1xf32>
    %cst_101 = arith.constant 3.200000e+01 : f32
    %295 = vector.broadcast %cst_101 : f32 to vector<64x1xf32>
    %296 = arith.divf %294, %295 : vector<64x1xf32>
    %297 = vector.broadcast %289 : vector<64x1xf32> to vector<64x32xf32>
    %298 = arith.subf %283, %297 : vector<64x32xf32>
    %cst_102 = arith.constant 9.99999974E-6 : f32
    %299 = vector.broadcast %cst_102 : f32 to vector<64x1xf32>
    %300 = arith.addf %296, %299 : vector<64x1xf32>
    %301 = math.rsqrt %300 : vector<64x1xf32>
    %302 = vector.broadcast %301 : vector<64x1xf32> to vector<64x32xf32>
    %303 = arith.mulf %298, %302 : vector<64x32xf32>
    %304 = vector.broadcast %284 : vector<1x32xf32> to vector<64x32xf32>
    %305 = arith.mulf %303, %304 : vector<64x32xf32>
    %306 = vector.broadcast %285 : vector<1x32xf32> to vector<64x32xf32>
    %307 = arith.addf %305, %306 : vector<64x32xf32>
    %308 = vector.extract_strided_slice %307 {offsets = [0, 0], sizes = [32, 32], strides = [1, 1]} : vector<64x32xf32> to vector<32x32xf32>
    %cst_103 = arith.constant dense<0.000000e+00> : vector<32xf32>
    %309 = vector.multi_reduction <add>, %308, %cst_103 [0] : vector<32x32xf32> to vector<32xf32>
    %310 = vector.shape_cast %309 : vector<32xf32> to vector<1x32xf32>
    %cst_104 = arith.constant 3.200000e+01 : f32
    %311 = vector.broadcast %cst_104 : f32 to vector<1x32xf32>
    %312 = arith.divf %310, %311 : vector<1x32xf32>
    %313 = vector.extract_strided_slice %307 {offsets = [32, 0], sizes = [32, 32], strides = [1, 1]} : vector<64x32xf32> to vector<32x32xf32>
    %cst_105 = arith.constant dense<0.000000e+00> : vector<32xf32>
    %314 = vector.multi_reduction <add>, %313, %cst_105 [0] : vector<32x32xf32> to vector<32xf32>
    %315 = vector.shape_cast %314 : vector<32xf32> to vector<1x32xf32>
    %cst_106 = arith.constant 3.200000e+01 : f32
    %316 = vector.broadcast %cst_106 : f32 to vector<1x32xf32>
    %317 = arith.divf %315, %316 : vector<1x32xf32>
    %318 = tpu.concatenate %312, %317 in 0 : vector<1x32xf32>, vector<1x32xf32> -> vector<2x32xf32>
    %c208 = arith.constant 208 : index
    %c0_107 = arith.constant 0 : index
    %319 = vector.load %arg1[%c208, %c0_107] : memref<240x128xf32, #tpu.memory_space<vmem>>, vector<32x128xf32>
    %cst_108 = arith.constant dense<0.000000e+00> : vector<2x128xf32>
    %320 = tpu.matmul %318, %319, %cst_108 {dimension_numbers = #tpu.dot_dimension_numbers<[1], [0], [0], [1], [0, 0, 1, 1], [], []>} : vector<2x32xf32>, vector<32x128xf32>, vector<2x128xf32> -> vector<2x128xf32>
    %c12 = arith.constant 12 : index
    %c0_109 = arith.constant 0 : index
    %321 = vector.load %arg2[%c12, %c0_109] : memref<16x128xf32, #tpu.memory_space<vmem>>, vector<1x128xf32>
    %322 = vector.broadcast %321 : vector<1x128xf32> to vector<2x128xf32>
    %323 = arith.addf %320, %322 : vector<2x128xf32>
    %c0_110 = arith.constant 0 : index
    %c0_111 = arith.constant 0 : index
    %324 = vector.load %arg3[%c0_110, %c0_111] : memref<2x128xf32, #tpu.memory_space<vmem>>, vector<2x128xf32>
    tpu.vector_store %arg3[%c0_110, %c0_111], %323 {strides = array<i32>} : memref<2x128xf32, #tpu.memory_space<vmem>>, vector<2x128xf32>,
    return
  }
}

</mosaic_0001>

<bundles_post_ra>
// kernel: forward.1
= control target key start
LH: loop header
LB: loop body
LE: loop exit
PB: predicated region body
PF: predicated region fallthrough
CT: control target
= control target key end

     0   :  { %vm27_vm0 = vcmask 130048   ;;  %s5474_s0 = inlined_call_operand.vmem [shape: f32[64,16], index: 0, kind: input, shape index: {}]   ;;  %s5475_s1 = inlined_call_operand.vmem [shape: f32[240,128], index: 1, kind: input, shape index: {}]   ;;  %s5476_s2 = inlined_call_operand.vmem [shape: f32[16,128], index: 2, kind: input, shape index: {}]   ;;  %s5477_s3 = inlined_call_operand.hbm [shape: f32[2,128], index: 3, kind: output, shape index: {}]  }
   0x1   :  { %v24_v0 = vld [vmem:[%s5475_s1 + $0x8] sm:$0xff]  ;;  %v23_v1 = vld [vmem:[%s5475_s1] sm:$0xff] }
   0x2   :  { %66 = vmatpush.msra.mxu0 %v24_v0  ;;  %v15_v2 = vld [vmem:[%s5474_s0] sm:$0xff]  ;;  %3304 = vmatpush.msra.mxu1 %v24_v0  ;;  %v20_v3 = vld [vmem:[%s5474_s0 + $0x28] sm:$0xff] }
   0x4   :  { %67 = vmatpush.msra.mxu0 %v23_v1  ;;  %3305 = vmatpush.msra.mxu1 %v23_v1 }
   0x5   :  { %3159 = vmatmul.msk.f32.vlgmr.msra.gmra.mxu0 %vm27_vm0, %v15_v2  ;;  %3164 = vmatmul.msk.f32.vlgmr.msra.gmra.mxu1 %vm27_vm0, %v20_v3 }
   0x6   :  { %8 = vsyncpa [#allocation3], 0  ;;  %v16_v4 = vld [vmem:[%s5474_s0 + $0x8] sm:$0xff]  ;;  %v21_v5 = vld [vmem:[%s5474_s0 + $0x30] sm:$0xff]  ;;  %s3684_s30 = smov 96   ;;  %s3685_s4 = smov 120  }
   0x7   :  { %v17_v6 = vld [vmem:[%s5474_s0 + $0x10] sm:$0xff]  ;;  %v18_v7 = vld [vmem:[%s5474_s0 + $0x18] sm:$0xff]  ;;  %v19_v8 = vld [vmem:[%s5474_s0 + $0x20] sm:$0xff]  ;;  %s3686_s5 = smov 88   ;;  %s3687_s6 = smov 72  }
   0x8   :  { %v22_v9 = vld [vmem:[%s5474_s0 + $0x38] sm:$0xff]  ;;  %v3760_v10 = vld [vmem:[%s5476_s2] ss:$0 sm:$0xff]  ;;  %s3688_s0 = smov 80   ;;  %s3689_s7 = smov 112  }
   0x9   :  { %s3690_s8 = smov 104   ;;  %s3691_s9 = smov 64  }
   0xa   :  { %s3692_s10 = smov 56   ;;  %s3693_s11 = smov 48  }
   0xb   :  { %s3694_s12 = smov 40   ;;  %s3695_s13 = smov 8  }
   0xc   :  { %s3696_s14 = smov 24   ;;  %s3697_s15 = smov 16  }
   0xd   :  { %3160 = vmatmul.msk.f32.gmra.mxu0 %vm27_vm0, %v16_v4  ;;  %3165 = vmatmul.msk.f32.gmra.mxu1 %vm27_vm0, %v21_v5  ;;  %s3150_s19 = sshll.u32 %s5477_s3, 4  ;;  %s3151_s19 = int_to_ptr.hbm [resolvable:$true] %s3150_s19 }
  0x15   :  { %3161 = vmatmul.msk.f32.gmra.mxu0 %vm27_vm0, %v17_v6  ;;  %3166 = vmatmul.msk.f32.gmra.mxu1 %vm27_vm0, %v22_v9 }
  0x1d   :  { %3162 = vmatmul.msk.f32.gmra.mxu0 %vm27_vm0, %v18_v7 }
  0x25   :  { %3163 = vmatmul.msk.f32.gmra.mxu0 %vm27_vm0, %v19_v8 }
  0x82   :  { %v69_v11 = vpop.f32.mrf.mxu0  ;;  %v3765_v13 = vpop.f32.mrf.mxu1 }
  0x83   :  { %v3763_v12 = vadd.f32 %v3760_v10, %v69_v11 }
  0x85   :  { %v3768_v14 = vmul.f32 0.70710677, %v3763_v12  ;;  %v3831_v8 = vmul.f32 0.5, %v3763_v12 }
  0x87   :  { %v109_v15 = vand.u32 2147483647, %v3768_v14 }
  0x89   :  { %v117_v16 = vmul.f32 0.3275911, %v109_v15  ;;  %v325_v34 = vsub.f32 0.0, %v109_v15 }
  0x8a   :  { %v72_v17 = vpop.f32.mrf.mxu0  ;;  %v87_v20 = vpop.f32.mrf.mxu1 }
  0x8b   :  { %v125_v18 = vadd.f32 1.0, %v117_v16  ;;  %v3772_v19 = vadd.f32 %v3760_v10, %v72_v17  ;;  %v3775_v21 = vadd.f32 %v3760_v10, %v87_v20  ;;  %v333_v40 = vmul.f32 %v325_v34, %v109_v15 }
  0x8d   :  { %3415 = vrcp.f32 %v125_v18  ;;  %v3778_v22 = vmul.f32 0.70710677, %v3772_v19  ;;  %v3781_v23 = vmul.f32 0.70710677, %v3775_v21  ;;  %v144_v47 = vand.u32 2147483648, %v125_v18 }
  0x8e   :  { %vm138_vm2 = vweird.f32 %v125_v18  ;;  %v142_v50 = vand.u32 2147483647, %v125_v18  ;;  %v341_v52 = vmul.f32 1.442695, %v333_v40 }
  0x8f   :  { %v110_v24 = vand.u32 2147483647, %v3778_v22  ;;  %v3785_v27 = vand.u32 2147483647, %v3781_v23  ;;  %v145_v56 = vor.u32 1.1754944e-38, %v144_v47 }
  0x90   :  { %vm143_vm4 = vcmp.eq.f32.partialorder %v142_v50, 8.507059e+37 }
  0x91   :  { %v118_v25 = vmul.f32 0.3275911, %v110_v24  ;;  %v123_v35 = vmul.f32 0.3275911, %v3785_v27  ;;  %v326_v38 = vsub.f32 0.0, %v110_v24  ;;  %v331_v5 = vsub.f32 0.0, %v3785_v27 }
  0x92   :  { %v75_v26 = vpop.f32.mrf.mxu0 }
  0x93   :  { %v3416_v28 = vpop.eup %3415  ;;  %v3787_v29 = vadd.f32 1.0, %v118_v25  ;;  %v3790_v30 = vadd.f32 %v3760_v10, %v75_v26  ;;  %v3798_v42 = vadd.f32 1.0, %v123_v35  ;;  %v334_v49 = vmul.f32 %v326_v38, %v110_v24 }
  0x94   :  { %v134_v31 = vmul.f32 %v3416_v28, %v125_v18  ;;  %vm139_vm1 = vweird.f32 %v3416_v28  ;;  %v3845_v12 = vmul.f32 %v331_v5, %v3785_v27 }
  0x95   :  { %3417 = vrcp.f32 %v3787_v29  ;;  %v3794_v32 = vmul.f32 0.70710677, %v3790_v30  ;;  %vm140_vm3 = vmor %vm138_vm2, %vm139_vm1  ;;  %v343_v57 = vmul.f32 1.442695, %v334_v49  ;;  %v157_v61 = vand.u32 2147483647, %v3787_v29 }
  0x96   :  { %v135_v33 = vsub.f32 1.0, %v134_v31  ;;  %v159_v0 = vand.u32 2147483648, %v3787_v29  ;;  %vm153_vm5 = vweird.f32 %v3787_v29  ;;  %vm228_vm12 = vweird.f32 %v3798_v42 }
  0x97   :  { %v111_v36 = vand.u32 2147483647, %v3794_v32  ;;  %vm3835_vm6 = vcmp.eq.f32.partialorder %v157_v61, 8.507059e+37 }
  0x98   :  { %v136_v37 = vmul.f32 %v3416_v28, %v135_v33  ;;  %v160_v18 = vor.u32 1.1754944e-38, %v159_v0 }
  0x99   :  { %v119_v39 = vmul.f32 0.3275911, %v111_v36  ;;  %v327_v58 = vsub.f32 0.0, %v111_v36 }
  0x9a   :  { %v78_v41 = vpop.f32.mrf.mxu0  ;;  %v137_v43 = vadd.f32 %v3416_v28, %v136_v37 }
  0x9b   :  { %v3800_v44 = vpop.eup %3417  ;;  %v3802_v45 = vadd.f32 1.0, %v119_v39  ;;  %v3805_v46 = vadd.f32 %v3760_v10, %v78_v41  ;;  %v335_v9 = vmul.f32 %v327_v58, %v111_v36 }
  0x9c   :  { %v149_v48 = vmul.f32 %v3800_v44, %v3787_v29  ;;  %v141_v53 = vsel %vm140_vm3, %v3416_v28, %v137_v43  ;;  %vm154_vm7 = vweird.f32 %v3800_v44 }
  0x9d   :  { %3419 = vrcp.f32 %v3802_v45  ;;  %v3811_v51 = vmul.f32 0.70710677, %v3805_v46  ;;  %v3815_v60 = vsel %vm143_vm4, %v145_v56, %v141_v53  ;;  %vm155_vm8 = vmor %vm153_vm5, %vm154_vm7  ;;  %v345_v34 = vmul.f32 1.442695, %v335_v9 }
  0x9e   :  { %3421 = vrcp.f32 %v3798_v42  ;;  %v150_v54 = vsub.f32 1.0, %v149_v48  ;;  %v253_v63 = vmul.f32 1.0614054, %v3815_v60  ;;  %v174_v35 = vand.u32 2147483648, %v3802_v45 }
  0x9f   :  { %v112_v55 = vand.u32 2147483647, %v3811_v51  ;;  %3423 = vpow2.f32 %v341_v52  ;;  %v172_v40 = vand.u32 2147483647, %v3802_v45  ;;  %vm168_vm10 = vweird.f32 %v3802_v45 }
  0xa0   :  { %v151_v2 = vmul.f32 %v3800_v44, %v150_v54  ;;  %3425 = vpow2.f32 %v343_v57  ;;  %v261_v17 = vadd.f32 -1.4531521, %v253_v63  ;;  %v175_v54 = vor.u32 1.1754944e-38, %v174_v35 }
  0xa1   :  { %v120_v59 = vmul.f32 0.3275911, %v112_v55  ;;  %v328_v28 = vsub.f32 0.0, %v112_v55  ;;  %vm173_vm14 = vcmp.eq.f32.partialorder %v172_v40, 8.507059e+37  ;;  %vm373_vm4 = vcmp.ge.f32.partialorder %v3768_v14, 0.0 }
  0xa2   :  { %v81_v62 = vpop.f32.mrf.mxu0  ;;  %v152_v24 = vadd.f32 %v3800_v44, %v151_v2  ;;  %v269_v33 = vmul.f32 %v261_v17, %v3815_v60 }
  0xa3   :  { %v3420_v1 = vpop.eup %3419  ;;  %v3821_v3 = vadd.f32 1.0, %v120_v59  ;;  %v3824_v4 = vadd.f32 %v3760_v10, %v81_v62  ;;  %v336_v48 = vmul.f32 %v328_v28, %v112_v55 }
  0xa4   :  { %v3827_v6 = vpop.eup %3421  ;;  %v164_v7 = vmul.f32 %v3420_v1, %v3802_v45  ;;  %v156_v27 = vsel %vm155_vm8, %v3800_v44, %v152_v24  ;;  %vm169_vm9 = vweird.f32 %v3420_v1  ;;  %v277_v38 = vadd.f32 1.4214138, %v269_v33 }
  0xa5   :  { %3427 = vrcp.f32 %v3821_v3  ;;  %v3840_v16 = vmul.f32 0.70710677, %v3824_v4  ;;  %v224_v20 = vmul.f32 %v3827_v6, %v3798_v42  ;;  %v3849_v25 = vpop.eup %3423  ;;  %v3864_v39 = vsel %vm3835_vm6, %v160_v18, %v156_v27  ;;  %vm170_vm11 = vmor %vm168_vm10, %vm169_vm9 }
  0xa6   :  { %v165_v15 = vsub.f32 1.0, %v164_v7  ;;  %v3859_v36 = vpop.eup %3425  ;;  %v254_v43 = vmul.f32 1.0614054, %v3864_v39  ;;  %v285_v50 = vmul.f32 %v277_v38, %v3815_v60  ;;  %3429 = vpow2.f32 %v345_v34 }
  0xa7   :  { %v3852_v31 = vand.u32 2147483647, %v3840_v16  ;;  %v225_v29 = vsub.f32 1.0, %v224_v20  ;;  %vm183_vm13 = vweird.f32 %v3821_v3  ;;  %v3881_v61 = vmul.f32 1.442695, %v336_v48 }
  0xa8   :  { %v166_v26 = vmul.f32 %v3420_v1, %v165_v15  ;;  %v262_v52 = vadd.f32 -1.4531521, %v254_v43  ;;  %v293_v55 = vadd.f32 -0.28449672, %v285_v50  ;;  %v187_v2 = vand.u32 2147483647, %v3821_v3 }
  0xa9   :  { %v121_v37 = vmul.f32 0.3275911, %v3852_v31  ;;  %v226_v45 = vmul.f32 %v3827_v6, %v225_v29  ;;  %v189_v5 = vand.u32 2147483648, %v3821_v3  ;;  %vm415_vm6 = vcmask 261120  }
  0xaa   :  { %v167_v47 = vadd.f32 %v3420_v1, %v166_v26  ;;  %v270_v57 = vmul.f32 %v262_v52, %v3864_v39  ;;  %v301_v63 = vmul.f32 %v293_v55, %v3815_v60  ;;  %vm188_vm3 = vcmp.eq.f32.partialorder %v187_v2, 8.507059e+37 }
  0xab   :  { %v3428_v41 = vpop.eup %3427  ;;  %v3870_v49 = vadd.f32 1.0, %v121_v37  ;;  %v190_v20 = vor.u32 1.1754944e-38, %v189_v5  ;;  %v227_v29 = vadd.f32 %v3827_v6, %v226_v45  ;;  %vm229_vm7 = vweird.f32 %v3827_v6 }
  0xac   :  { %v179_v44 = vmul.f32 %v3428_v41, %v3821_v3  ;;  %v171_v53 = vsel %vm170_vm11, %v3420_v1, %v167_v47  ;;  %vm184_vm15 = vweird.f32 %v3428_v41  ;;  %v278_v0 = vadd.f32 1.4214138, %v270_v57  ;;  %v3893_v15 = vpop.eup %3429  ;;  %vm3913_vm8 = vmor %vm228_vm12, %vm229_vm7 }
  0xad   :  { %3431 = vrcp.f32 %v3870_v49  ;;  %v3879_v58 = vsel %vm173_vm14, %v175_v54, %v171_v53  ;;  %vm3885_vm1 = vmor %vm183_vm13, %vm184_vm15  ;;  %vm198_vm2 = vweird.f32 %v3870_v49  ;;  %v204_v11 = vand.u32 2147483648, %v3870_v49 }
  0xae   :  { %v180_v56 = vsub.f32 1.0, %v179_v44  ;;  %v255_v62 = vmul.f32 1.0614054, %v3879_v58  ;;  %v309_v17 = vadd.f32 0.2548296, %v301_v63  ;;  %v286_v18 = vmul.f32 %v278_v0, %v3864_v39 }
  0xaf   :  { %v202_v28 = vand.u32 2147483647, %v3870_v49  ;;  %v205_v33 = vor.u32 1.1754944e-38, %v204_v11  ;;  %v232_v50 = vand.u32 2147483647, %v3798_v42  ;;  %v234_v52 = vand.u32 2147483648, %v3798_v42 }
  0xb0   :  { %v181_v59 = vmul.f32 %v3428_v41, %v180_v56  ;;  %v263_v7 = vadd.f32 -1.4531521, %v255_v62  ;;  %v317_v27 = vmul.f32 %v309_v17, %v3815_v60  ;;  %v294_v35 = vadd.f32 -0.28449672, %v286_v18 }
  0xb1   :  { %v231_v56 = vsel %vm3913_vm8, %v3827_v6, %v227_v29  ;;  %vm233_vm10 = vcmp.eq.f32.partialorder %v232_v50, 8.507059e+37  ;;  %vm203_vm11 = vcmp.eq.f32.partialorder %v202_v28, 8.507059e+37  ;;  %v329_v0 = vsub.f32 0.0, %v3852_v31 }
  0xb2   :  { %v182_v9 = vadd.f32 %v3428_v41, %v181_v59  ;;  %v271_v26 = vmul.f32 %v263_v7, %v3879_v58  ;;  %v357_v47 = vmul.f32 %v3849_v25, %v317_v27  ;;  %v235_v59 = vor.u32 1.1754944e-38, %v234_v52 }
  0xb3   :  { %v3432_v24 = vpop.eup %3431  ;;  %3433 = vpow2.f32 %v3881_v61  ;;  %v337_v28 = vmul.f32 %v329_v0, %v3852_v31  ;;  %vm374_vm12 = vcmp.ge.f32.partialorder %v3778_v22, 0.0  ;;  %vm375_vm13 = vcmp.ge.f32.partialorder %v3794_v32, 0.0 }
  0xb4   :  { %v186_v3 = vsel %vm3885_vm1, %v3428_v41, %v182_v9  ;;  %v194_v34 = vmul.f32 %v3432_v24, %v3870_v49  ;;  %v279_v38 = vadd.f32 1.4214138, %v271_v26  ;;  %vm199_vm5 = vweird.f32 %v3432_v24 }
  0xb5   :  { %v3903_v37 = vsel %vm188_vm3, %v190_v20, %v186_v3  ;;  %v302_v41 = vmul.f32 %v294_v35, %v3864_v39  ;;  %v365_v25 = vsub.f32 1.0, %v357_v47  ;;  %vm3926_vm9 = vmor %vm198_vm2, %vm199_vm5  ;;  %v236_v2 = vsel %vm233_vm10, %v235_v59, %v231_v56 }
  0xb6   :  { %v256_v40 = vmul.f32 1.0614054, %v3903_v37  ;;  %v195_v43 = vsub.f32 1.0, %v194_v34  ;;  %v287_v44 = vmul.f32 %v279_v38, %v3879_v58  ;;  %v259_v9 = vmul.f32 1.0614054, %v236_v2 }
  0xb7   :  { %v310_v54 = vadd.f32 0.2548296, %v302_v41  ;;  %v381_v42 = vsub.f32 0.0, %v365_v25  ;;  %v95_v56 = vmul.f32 0.5, %v3790_v30  ;;  %vm376_vm14 = vcmp.ge.f32.partialorder %v3811_v51, 0.0 }
  0xb8   :  { %v264_v60 = vadd.f32 -1.4531521, %v256_v40  ;;  %v196_v53 = vmul.f32 %v3432_v24, %v195_v43  ;;  %v295_v45 = vadd.f32 -0.28449672, %v287_v44  ;;  %v267_v3 = vadd.f32 -1.4531521, %v259_v9 }
  0xb9   :  { %v318_v62 = vmul.f32 %v310_v54, %v3864_v39  ;;  %v389_v49 = vsel %vm373_vm4, %v365_v25, %v381_v42  ;;  %v349_v43 = vmul.f32 1.442695, %v337_v28  ;;  %v3434_v44 = vpop.eup %3433  ;;  %vm377_vm15 = vcmp.ge.f32.partialorder %v3840_v16, 0.0 }
  0xba   :  { %v272_v55 = vmul.f32 %v264_v60, %v3903_v37  ;;  %v197_v63 = vadd.f32 %v3432_v24, %v196_v53  ;;  %v303_v6 = vmul.f32 %v295_v45, %v3879_v58  ;;  %v397_v11 = vadd.f32 1.0, %v389_v49 }
  0xbb   :  { %v358_v5 = vmul.f32 %v3859_v36, %v318_v62  ;;  %v275_v35 = vmul.f32 %v267_v3, %v236_v2  ;;  %vm379_vm1 = vcmp.ge.f32.partialorder %v3781_v23, 0.0  ;;  %v97_v28 = vmul.f32 0.5, %v3824_v4 }
  0xbc   :  { %v280_v1 = vadd.f32 1.4214138, %v272_v55  ;;  %v201_v7 = vsel %vm3926_vm9, %v3432_v24, %v197_v63  ;;  %v311_v17 = vadd.f32 0.2548296, %v303_v6  ;;  %v3942_v14 = vmul.f32 %v397_v11, %v3831_v8 }
  0xbd   :  { %v206_v18 = vsel %vm203_vm11, %v205_v33, %v201_v7  ;;  %v366_v20 = vsub.f32 1.0, %v358_v5  ;;  %v353_v33 = vmul.f32 1.442695, %v3845_v12  ;;  %v94_v8 = vmul.f32 0.5, %v3772_v19 }
  0xbe   :  { %v288_v39 = vmul.f32 %v280_v1, %v3903_v37  ;;  %v257_v26 = vmul.f32 1.0614054, %v206_v18  ;;  %v319_v36 = vmul.f32 %v311_v17, %v3879_v58  ;;  %v416_v61 = vsel %vm415_vm6, %v3942_v14, 0.0 }
  0xbf   :  { %v382_v24 = vsub.f32 0.0, %v366_v20  ;;  %417 = vadd.xlane.f32.xlu0 %v416_v61  ;;  %v283_v29 = vadd.f32 1.4214138, %v275_v35  ;;  %3435 = vpow2.f32 %v353_v33  ;;  %v96_v5 = vmul.f32 0.5, %v3805_v46 }
  0xc0   :  { %v296_v34 = vadd.f32 -0.28449672, %v288_v39  ;;  %v265_v27 = vadd.f32 -1.4531521, %v257_v26  ;;  %v359_v38 = vmul.f32 %v3893_v15, %v319_v36  ;;  %3437 = vpow2.f32 %v349_v43 }
  0xc1   :  { %v390_v40 = vsel %vm374_vm12, %v366_v20, %v382_v24  ;;  %v291_v12 = vmul.f32 %v283_v29, %v236_v2  ;;  %v99_v24 = vmul.f32 0.5, %v3775_v21  ;;  %v3981_v23 = vadd.f32 %v3760_v10, %v3765_v13 }
  0xc2   :  { %v304_v31 = vmul.f32 %v296_v34, %v3903_v37  ;;  %v273_v58 = vmul.f32 %v265_v27, %v206_v18  ;;  %v398_v22 = vadd.f32 1.0, %v390_v40  ;;  %v367_v47 = vsub.f32 1.0, %v359_v38 }
  0xc3   :  { %v299_v52 = vadd.f32 -0.28449672, %v291_v12  ;;  %v3986_v33 = vmul.f32 0.70710677, %v3981_v23 }
  0xc4   :  { %v312_v41 = vadd.f32 0.2548296, %v304_v31  ;;  %v281_v60 = vadd.f32 1.4214138, %v273_v58  ;;  %v3952_v48 = vmul.f32 %v398_v22, %v94_v8  ;;  %v383_v50 = vsub.f32 0.0, %v367_v47  ;;  %v90_v31 = vpop.f32.mrf.mxu1 }
  0xc5   :  { %v307_v57 = vmul.f32 %v299_v52, %v236_v2  ;;  %v3436_v62 = vpop.eup %3435  ;;  %v114_v21 = vand.u32 2147483647, %v3986_v33  ;;  %v3990_v40 = vadd.f32 %v3760_v10, %v90_v31  ;;  %vm378_vm12 = vcmp.ge.f32.partialorder %v3986_v33, 0.0 }
  0xc6   :  { %v320_v15 = vmul.f32 %v312_v41, %v3903_v37  ;;  %v289_v19 = vmul.f32 %v281_v60, %v206_v18  ;;  %v419_v53 = vsel %vm415_vm6, %v3952_v48, 0.0  ;;  %v391_v25 = vsel %vm375_vm13, %v367_v47, %v383_v50  ;;  %v3438_v49 = vpop.eup %3437 }
  0xc7   :  { %v399_v45 = vadd.f32 1.0, %v391_v25  ;;  %420 = vadd.xlane.f32.xlu0 %v419_v53  ;;  %v315_v42 = vadd.f32 0.2548296, %v307_v57  ;;  %v122_v61 = vmul.f32 0.3275911, %v114_v21 }
  0xc8   :  { %v360_v54 = vmul.f32 %v3434_v44, %v320_v15  ;;  %v297_v55 = vadd.f32 -0.28449672, %v289_v19  ;;  %v3993_v13 = vmul.f32 0.70710677, %v3990_v40 }
  0xc9   :  { %v3960_v37 = vmul.f32 %v399_v45, %v95_v56  ;;  %v323_v1 = vmul.f32 %v315_v42, %v236_v2  ;;  %v130_v38 = vadd.f32 1.0, %v122_v61  ;;  %v3683_v56 = vmov 32.0  }
  0xca   :  { %v368_v59 = vsub.f32 1.0, %v360_v54  ;;  %v305_v32 = vmul.f32 %v297_v55, %v206_v18  ;;  %v116_v29 = vand.u32 2147483647, %v3993_v13  ;;  %vm380_vm13 = vcmp.ge.f32.partialorder %v3993_v13, 0.0 }
  0xcb   :  { %v422_v0 = vsel %vm415_vm6, %v3960_v37, 0.0  ;;  %v363_v51 = vmul.f32 %v3436_v62, %v323_v1  ;;  %3439 = vrcp.f32 %v130_v38  ;;  %vm213_vm2 = vweird.f32 %v130_v38 }
  0xcc   :  { %v384_v63 = vsub.f32 0.0, %v368_v59  ;;  %v313_v6 = vadd.f32 0.2548296, %v305_v32  ;;  %423 = vadd.xlane.f32.xlu1 %v422_v0  ;;  %v124_v22 = vmul.f32 0.3275911, %v116_v29  ;;  %v219_v44 = vand.u32 2147483648, %v130_v38 }
  0xcd   :  { %v371_v39 = vsub.f32 1.0, %v363_v51  ;;  %v217_v12 = vand.u32 2147483647, %v130_v38 }
  0xce   :  { %v392_v30 = vsel %vm376_vm14, %v368_v59, %v384_v63  ;;  %v321_v9 = vmul.f32 %v313_v6, %v206_v18  ;;  %v132_v41 = vadd.f32 1.0, %v124_v22  ;;  %v220_v50 = vor.u32 1.1754944e-38, %v219_v44 }
  0xcf   :  { %v400_v7 = vadd.f32 1.0, %v392_v30  ;;  %v387_v3 = vsub.f32 0.0, %v371_v39  ;;  %vm218_vm5 = vcmp.eq.f32.partialorder %v217_v12, 8.507059e+37  ;;  %v330_v6 = vsub.f32 0.0, %v114_v21 }
  0xd0   :  { %v361_v17 = vmul.f32 %v3438_v49, %v321_v9  ;;  %3441 = vrcp.f32 %v132_v41  ;;  %vm243_vm7 = vweird.f32 %v132_v41  ;;  %v249_v57 = vand.u32 2147483648, %v132_v41 }
  0xd1   :  { %v3965_v11 = vmul.f32 %v400_v7, %v96_v5  ;;  %v395_v36 = vsel %vm379_vm1, %v371_v39, %v387_v3  ;;  %v3440_v8 = vpop.eup %3439  ;;  %3443 = vrcp.f32 %v3683_v56  ;;  %v247_v62 = vand.u32 2147483647, %v132_v41 }
  0xd2   :  { %v369_v26 = vsub.f32 1.0, %v361_v17  ;;  %v403_v27 = vadd.f32 1.0, %v395_v36  ;;  %v209_v58 = vmul.f32 %v3440_v8, %v130_v38  ;;  %vm214_vm3 = vweird.f32 %v3440_v8 }
  0xd3   :  { %v425_v20 = vsel %vm415_vm6, %v3965_v11, 0.0  ;;  %vm215_vm4 = vmor %vm213_vm2, %vm214_vm3  ;;  %v250_v63 = vor.u32 1.1754944e-38, %v249_v57  ;;  %vm248_vm10 = vcmp.eq.f32.partialorder %v247_v62, 8.507059e+37  ;;  %v338_v9 = vmul.f32 %v330_v6, %v114_v21 }
  0xd4   :  { %v385_v2 = vsub.f32 0.0, %v369_v26  ;;  %426 = vadd.xlane.f32.xlu1 %v425_v20  ;;  %v3977_v16 = vmul.f32 %v403_v27, %v99_v24  ;;  %v210_v43 = vsub.f32 1.0, %v209_v58  ;;  %v332_v3 = vsub.f32 0.0, %v116_v29 }
  0xd6   :  { %v393_v46 = vsel %vm377_vm15, %v369_v26, %v385_v2  ;;  %v434_v4 = vsel %vm415_vm6, %v3977_v16, 0.0  ;;  %v211_v47 = vmul.f32 %v3440_v8, %v210_v43  ;;  %v3442_v15 = vpop.eup %3441  ;;  %v351_v26 = vmul.f32 1.442695, %v338_v9 }
  0xd7   :  { %v401_v18 = vadd.f32 1.0, %v393_v46  ;;  %v239_v52 = vmul.f32 %v3442_v15, %v132_v41  ;;  %v3444_v59 = vpop.eup %3443  ;;  %vm244_vm8 = vweird.f32 %v3442_v15 }
  0xd8   :  { %v212_v60 = vadd.f32 %v3440_v8, %v211_v47  ;;  %vm245_vm9 = vmor %vm243_vm7, %vm244_vm8  ;;  %v441_v1 = vmul.f32 32.0, %v3444_v59  ;;  %3445 = vpow2.f32 %v351_v26  ;;  %vm445_vm11 = vweird.f32 %v3444_v59  ;;  %v620_v26 = vld [vmem:[%s5475_s1 + $0x28] sm:$0xff] }
  0xd9   :  { %v3972_v34 = vmul.f32 %v401_v18, %v97_v28  ;;  %v240_v25 = vsub.f32 1.0, %v239_v52  ;;  %v340_v18 = vmul.f32 %v332_v3, %v116_v29  ;;  %659 = vmatpush.msrb.mxu1 %v620_v26  ;;  %v619_v3 = vld [vmem:[%s5475_s1 + $0x20] sm:$0xff] }
  0xda   :  { %v216_v10 = vsel %vm215_vm4, %v3440_v8, %v212_v60  ;;  %v442_v51 = vsub.f32 1.0, %v441_v1 }
  0xdb   :  { %v428_v35 = vsel %vm415_vm6, %v3972_v34, 0.0  ;;  %v221_v19 = vsel %vm218_vm5, %v220_v50, %v216_v10  ;;  %v241_v45 = vmul.f32 %v3442_v15, %v240_v25  ;;  %660 = vmatpush.msrb.mxu1 %v619_v3 }
  0xdc   :  { %429 = vadd.xlane.f32.xlu1 %v428_v35  ;;  %v258_v53 = vmul.f32 1.0614054, %v221_v19  ;;  %v443_v2 = vmul.f32 %v3444_v59, %v442_v51  ;;  %v355_v35 = vmul.f32 1.442695, %v340_v18 }
  0xdd   :  { %v242_v42 = vadd.f32 %v3442_v15, %v241_v45 }
  0xde   :  { %v266_v54 = vadd.f32 -1.4531521, %v258_v53  ;;  %v444_v36 = vadd.f32 %v3444_v59, %v443_v2  ;;  %v3446_v38 = vpop.eup %3445  ;;  %3447 = vpow2.f32 %v355_v35 }
  0xdf   :  { %v246_v0 = vsel %vm245_vm9, %v3442_v15, %v242_v42 }
  0xe0   :  { %v274_v55 = vmul.f32 %v266_v54, %v221_v19  ;;  %v251_v49 = vsel %vm248_vm10, %v250_v63, %v246_v0 }
  0xe1   :  { %v260_v5 = vmul.f32 1.0614054, %v251_v49 }
  0xe2   :  { %v282_v32 = vadd.f32 1.4214138, %v274_v55  ;;  %v98_v55 = vmul.f32 0.5, %v3981_v23  ;;  %v100_v23 = vmul.f32 0.5, %v3990_v40 }
  0xe3   :  { %v268_v7 = vadd.f32 -1.4531521, %v260_v5 }
  0xe4   :  { %435 = vadd.xlane.f32.xlu1 %v434_v4  ;;  %v290_v30 = vmul.f32 %v282_v32, %v221_v19  ;;  %v3996_v4 = vsel %vm445_vm11, %v3444_v59, %v444_v36  ;;  %v3448_v60 = vpop.eup %3447 }
  0xe5   :  { %v276_v39 = vmul.f32 %v268_v7, %v251_v49 }
  0xe6   :  { %v298_v17 = vadd.f32 -0.28449672, %v290_v30 }
  0xe7   :  { %v284_v20 = vadd.f32 1.4214138, %v276_v39 }
  0xe8   :  { %v306_v28 = vmul.f32 %v298_v17, %v221_v19 }
  0xe9   :  { %v292_v46 = vmul.f32 %v284_v20, %v251_v49 }
  0xea   :  { %v314_v24 = vadd.f32 0.2548296, %v306_v28 }
  0xeb   :  { %v300_v27 = vadd.f32 -0.28449672, %v292_v46  ;;  %v617_v46 = vld [vmem:[%s5475_s1 + $0x10] sm:$0xff] }
  0xec   :  { %v322_v61 = vmul.f32 %v314_v24, %v221_v19 }
  0xed   :  { %v308_v21 = vmul.f32 %v300_v27, %v251_v49 }
  0xee   :  { %v362_v43 = vmul.f32 %v3446_v38, %v322_v61 }
  0xef   :  { %v316_v22 = vadd.f32 0.2548296, %v308_v21 }
  0xf0   :  { %v370_v41 = vsub.f32 1.0, %v362_v43 }
  0xf1   :  { %v324_v44 = vmul.f32 %v316_v22, %v251_v49 }
  0xf3   :  { %v364_v19 = vmul.f32 %v3448_v60, %v324_v44 }
  0xf5   :  { %v372_v45 = vsub.f32 1.0, %v364_v19 }
  0xf7   :  { %v388_v32 = vsub.f32 0.0, %v372_v45 }
  0xf9   :  { %v396_v63 = vsel %vm380_vm13, %v372_v45, %v388_v32 }
  0xfa   :  { %v404_v49 = vadd.f32 1.0, %v396_v63 }
  0xfc   :  { %v4038_v5 = vmul.f32 %v404_v49, %v100_v23 }
  0xfe   :  { %v437_v9 = vsel %vm415_vm6, %v4038_v5, 0.0 }
 0x132   :  { %v418_v31 = vpop.xlane.xlu0 %417 }
 0x133   :  { %v447_v8 = vmul.f32 %v3996_v4, %v418_v31 }
 0x135   :  { %v4000_v58 = vsub.f32 %v3942_v14, %v447_v8  ;;  %v386_v14 = vsub.f32 0.0, %v370_v41 }
 0x137   :  { %v463_v29 = vmul.f32 %v4000_v58, %v4000_v58  ;;  %v394_v56 = vsel %vm378_vm12, %v370_v41, %v386_v14 }
 0x138   :  { %v402_v57 = vadd.f32 1.0, %v394_v56 }
 0x139   :  { %v471_v47 = vsel %vm415_vm6, %v463_v29, 0.0 }
 0x13a   :  { %472 = vadd.xlane.f32.xlu2 %v471_v47  ;;  %v421_v12 = vpop.xlane.xlu0 %420  ;;  %v4026_v62 = vmul.f32 %v402_v57, %v98_v55 }
 0x13b   :  { %v448_v50 = vmul.f32 %v3996_v4, %v421_v12 }
 0x13c   :  { %v431_v6 = vsel %vm415_vm6, %v4026_v62, 0.0 }
 0x13d   :  { %v4007_v10 = vsub.f32 %v3952_v48, %v448_v50 }
 0x13f   :  { %v424_v15 = vpop.xlane.xlu1 %423  ;;  %v464_v53 = vmul.f32 %v4007_v10, %v4007_v10 }
 0x140   :  { %v449_v52 = vmul.f32 %v3996_v4, %v424_v15  ;;  %v4072_v15 = vld [vmem:[%s5476_s2 + $0x1] ss:$0 sm:$0xff] }
 0x141   :  { %v474_v54 = vsel %vm415_vm6, %v464_v53, 0.0 }
 0x142   :  { %v4014_v25 = vsub.f32 %v3960_v37, %v449_v52  ;;  %475 = vadd.xlane.f32.xlu2 %v474_v54 }
 0x144   :  { %v465_v48 = vmul.f32 %v4014_v25, %v4014_v25 }
 0x146   :  { %v477_v33 = vsel %vm415_vm6, %v465_v48, 0.0  ;;  %v4081_v48 = vld [vmem:[%s5476_s2 + $0x2] ss:$0 sm:$0xff] }
 0x147   :  { %v427_v59 = vpop.xlane.xlu1 %426  ;;  %478 = vadd.xlane.f32.xlu0 %v477_v33 }
 0x148   :  { %v450_v37 = vmul.f32 %v3996_v4, %v427_v59 }
 0x14a   :  { %v4024_v42 = vsub.f32 %v3965_v11, %v450_v37 }
 0x14c   :  { %v466_v0 = vmul.f32 %v4024_v42, %v4024_v42 }
 0x14e   :  { %v480_v1 = vsel %vm415_vm6, %v466_v0, 0.0 }
 0x14f   :  { %v430_v13 = vpop.xlane.xlu1 %429  ;;  %432 = vadd.xlane.f32.xlu0 %v431_v6  ;;  %481 = vadd.xlane.f32.xlu2 %v480_v1 }
 0x150   :  { %v451_v11 = vmul.f32 %v3996_v4, %v430_v13 }
 0x152   :  { %v4036_v30 = vsub.f32 %v3972_v34, %v451_v11 }
 0x154   :  { %v467_v7 = vmul.f32 %v4036_v30, %v4036_v30 }
 0x156   :  { %v483_v40 = vsel %vm415_vm6, %v467_v7, 0.0 }
 0x157   :  { %v436_v51 = vpop.xlane.xlu1 %435  ;;  %484 = vadd.xlane.f32.xlu0 %v483_v40  ;;  %438 = vadd.xlane.f32.xlu2 %v437_v9 }
 0x158   :  { %v453_v17 = vmul.f32 %v3996_v4, %v436_v51 }
 0x15a   :  { %v4047_v39 = vsub.f32 %v3977_v16, %v453_v17  ;;  %v618_v16 = vld [vmem:[%s5475_s1 + $0x18] sm:$0xff] }
 0x15b   :  { %661 = vmatpush.msrb.mxu1 %v618_v16 }
 0x15c   :  { %v469_v34 = vmul.f32 %v4047_v39, %v4047_v39 }
 0x15d   :  { %662 = vmatpush.msrb.mxu1 %v617_v46 }
 0x15e   :  { %v489_v20 = vsel %vm415_vm6, %v469_v34, 0.0 }
 0x15f   :  { %490 = vadd.xlane.f32.xlu2 %v489_v20 }
 0x1ad   :  { %v473_v2 = vpop.xlane.xlu2 %472 }
 0x1ae   :  { %v495_v28 = vmul.f32 %v473_v2, %v3996_v4 }
 0x1b0   :  { %v503_v18 = vadd.f32 1e-05, %v495_v28 }
 0x1b2   :  { %3449 = vrsqrt.f32 %v503_v18  ;;  %vm517_vm15 = vweird.f32 %v503_v18 }
 0x1b5   :  { %v476_v36 = vpop.xlane.xlu2 %475 }
 0x1b6   :  { %v496_v24 = vmul.f32 %v476_v36, %v3996_v4 }
 0x1b8   :  { %v3450_v27 = vpop.eup %3449  ;;  %v504_v35 = vadd.f32 1e-05, %v496_v24 }
 0x1b9   :  { %v512_v21 = vmul.f32 %v3450_v27, %v503_v18  ;;  %vm518_vm14 = vweird.f32 %v3450_v27 }
 0x1ba   :  { %v479_v61 = vpop.xlane.xlu0 %478  ;;  %3451 = vrsqrt.f32 %v504_v35  ;;  %vm519_vm1 = vmor %vm517_vm15, %vm518_vm14  ;;  %vm527_vm3 = vweird.f32 %v504_v35 }
 0x1bb   :  { %v497_v38 = vmul.f32 %v479_v61, %v3996_v4  ;;  %v513_v31 = vmul.f32 %v3450_v27, %v512_v21 }
 0x1bd   :  { %v505_v8 = vadd.f32 1e-05, %v497_v38  ;;  %v514_v43 = vmul.f32 0.5, %v513_v31 }
 0x1bf   :  { %3453 = vrsqrt.f32 %v505_v8  ;;  %v515_v22 = vsub.f32 1.5, %v514_v43  ;;  %vm537_vm7 = vweird.f32 %v505_v8 }
 0x1c0   :  { %v3452_v29 = vpop.eup %3451 }
 0x1c1   :  { %v516_v44 = vmul.f32 %v3450_v27, %v515_v22  ;;  %v522_v60 = vmul.f32 %v3452_v29, %v504_v35  ;;  %vm528_vm2 = vweird.f32 %v3452_v29 }
 0x1c2   :  { %v482_v47 = vpop.xlane.xlu2 %481  ;;  %v433_v41 = vpop.xlane.xlu0 %432  ;;  %vm529_vm4 = vmor %vm527_vm3, %vm528_vm2 }
 0x1c3   :  { %v498_v12 = vmul.f32 %v482_v47, %v3996_v4  ;;  %v452_v50 = vmul.f32 %v3996_v4, %v433_v41  ;;  %v520_v19 = vsel %vm519_vm1, %v3450_v27, %v516_v44  ;;  %v523_v52 = vmul.f32 %v3452_v29, %v522_v60  ;;  %v691_v41 = vld [vmem:[%s5475_s1 + $0x48] sm:$0xff]  ;;  %v690_v44 = vld [vmem:[%s5475_s1 + $0x40] sm:$0xff] }
 0x1c4   :  { %v591_v54 = vmul.f32 %v520_v19, %v4000_v58  ;;  %730 = vmatpush.msra.mxu2 %v691_v41 }
 0x1c5   :  { %v3454_v14 = vpop.eup %3453  ;;  %v506_v53 = vadd.f32 1e-05, %v498_v12  ;;  %v4076_v45 = vsub.f32 %v4026_v62, %v452_v50  ;;  %v524_v55 = vmul.f32 0.5, %v523_v52  ;;  %v688_v50 = vld [vmem:[%s5475_s1 + $0x30] sm:$0xff] }
 0x1c6   :  { %v532_v56 = vmul.f32 %v3454_v14, %v505_v8  ;;  %v600_v57 = vmul.f32 %v4072_v15, %v591_v54  ;;  %vm538_vm5 = vweird.f32 %v3454_v14  ;;  %731 = vmatpush.msra.mxu2 %v690_v44 }
 0x1c7   :  { %3455 = vrsqrt.f32 %v506_v53  ;;  %v468_v59 = vmul.f32 %v4076_v45, %v4076_v45  ;;  %v525_v32 = vsub.f32 1.5, %v524_v55  ;;  %vm539_vm8 = vmor %vm537_vm7, %vm538_vm5  ;;  %vm547_vm10 = vweird.f32 %v506_v53 }
 0x1c8   :  { %v533_v33 = vmul.f32 %v3454_v14, %v532_v56  ;;  %v609_v37 = vadd.f32 %v4081_v48, %v600_v57  ;;  %v4130_v57 = vld [vmem:[%s5476_s2 + $0x3] ss:$0 sm:$0xff] }
 0x1c9   :  { %v486_v63 = vsel %vm415_vm6, %v468_v59, 0.0  ;;  %v526_v23 = vmul.f32 %v3452_v29, %v525_v32 }
 0x1ca   :  { %v534_v58 = vmul.f32 0.5, %v533_v33  ;;  %v439_v62 = vpop.xlane.xlu2 %438  ;;  %v485_v0 = vpop.xlane.xlu0 %484  ;;  %487 = vadd.xlane.f32.xlu1 %v486_v63  ;;  %3167 = vmatmul.msk.f32.vlgmr.msrb.gmra.mxu1 %vm415_vm6, %v609_v37 }
 0x1cb   :  { %v454_v6 = vmul.f32 %v3996_v4, %v439_v62  ;;  %v499_v1 = vmul.f32 %v485_v0, %v3996_v4  ;;  %v530_v40 = vsel %vm529_vm4, %v3452_v29, %v526_v23 }
 0x1cc   :  { %v535_v49 = vsub.f32 1.5, %v534_v58  ;;  %v592_v17 = vmul.f32 %v530_v40, %v4007_v10 }
 0x1cd   :  { %v3456_v13 = vpop.eup %3455  ;;  %v4092_v11 = vsub.f32 %v4038_v5, %v454_v6  ;;  %v507_v7 = vadd.f32 1e-05, %v499_v1 }
 0x1ce   :  { %v536_v9 = vmul.f32 %v3454_v14, %v535_v49  ;;  %v542_v51 = vmul.f32 %v3456_v13, %v506_v53  ;;  %v601_v26 = vmul.f32 %v4072_v15, %v592_v17  ;;  %vm548_vm9 = vweird.f32 %v3456_v13 }
 0x1cf   :  { %3457 = vrsqrt.f32 %v507_v7  ;;  %v470_v34 = vmul.f32 %v4092_v11, %v4092_v11  ;;  %vm549_vm11 = vmor %vm547_vm10, %vm548_vm9  ;;  %vm557_vm13 = vweird.f32 %v507_v7  ;;  %vm771_vm10 = vcmask 64512  }
 0x1d0   :  { %v543_v20 = vmul.f32 %v3456_v13, %v542_v51  ;;  %v540_v3 = vsel %vm539_vm8, %v3454_v14, %v536_v9  ;;  %v610_v28 = vadd.f32 %v4081_v48, %v601_v26 }
 0x1d1   :  { %v492_v2 = vsel %vm415_vm6, %v470_v34, 0.0  ;;  %v593_v5 = vmul.f32 %v540_v3, %v4014_v25 }
 0x1d2   :  { %v544_v16 = vmul.f32 0.5, %v543_v20  ;;  %493 = vadd.xlane.f32.xlu0 %v492_v2  ;;  %3168 = vmatmul.msk.f32.gmra.mxu1 %vm415_vm6, %v610_v28  ;;  %v491_v60 = vpop.xlane.xlu2 %490 }
 0x1d3   :  { %v602_v10 = vmul.f32 %v4072_v15, %v593_v5  ;;  %v501_v12 = vmul.f32 %v491_v60, %v3996_v4 }
 0x1d4   :  { %v545_v46 = vsub.f32 1.5, %v544_v16 }
 0x1d5   :  { %v3458_v18 = vpop.eup %3457  ;;  %v611_v35 = vadd.f32 %v4081_v48, %v602_v10  ;;  %v509_v14 = vadd.f32 1e-05, %v501_v12 }
 0x1d6   :  { %v546_v36 = vmul.f32 %v3456_v13, %v545_v46  ;;  %v552_v24 = vmul.f32 %v3458_v18, %v507_v7  ;;  %vm558_vm12 = vweird.f32 %v3458_v18 }
 0x1d7   :  { %vm559_vm14 = vmor %vm557_vm13, %vm558_vm12  ;;  %3459 = vrsqrt.f32 %v509_v14  ;;  %vm577_vm4 = vweird.f32 %v509_v14 }
 0x1d8   :  { %v553_v27 = vmul.f32 %v3458_v18, %v552_v24  ;;  %v550_v61 = vsel %vm549_vm11, %v3456_v13, %v546_v36  ;;  %vm1444_vm11 = vcmask 195584  }
 0x1d9   :  { %v594_v25 = vmul.f32 %v550_v61, %v4024_v42 }
 0x1da   :  { %v554_v21 = vmul.f32 0.5, %v553_v27  ;;  %3169 = vmatmul.msk.f32.gmra.mxu1 %vm415_vm6, %v611_v35 }
 0x1db   :  { %v603_v31 = vmul.f32 %v4072_v15, %v594_v25 }
 0x1dc   :  { %v555_v38 = vsub.f32 1.5, %v554_v21 }
 0x1dd   :  { %v612_v43 = vadd.f32 %v4081_v48, %v603_v31  ;;  %v3460_v52 = vpop.eup %3459 }
 0x1de   :  { %v556_v8 = vmul.f32 %v3458_v18, %v555_v38  ;;  %v572_v56 = vmul.f32 %v3460_v52, %v509_v14  ;;  %vm578_vm1 = vweird.f32 %v3460_v52 }
 0x1df   :  { %vm579_vm5 = vmor %vm577_vm4, %vm578_vm1 }
 0x1e0   :  { %v560_v22 = vsel %vm559_vm14, %v3458_v18, %v556_v8  ;;  %v573_v33 = vmul.f32 %v3460_v52, %v572_v56 }
 0x1e1   :  { %v595_v29 = vmul.f32 %v560_v22, %v4036_v30  ;;  %v689_v30 = vld [vmem:[%s5475_s1 + $0x38] sm:$0xff] }
 0x1e2   :  { %3170 = vmatmul.msk.f32.gmra.mxu1 %vm415_vm6, %v612_v43  ;;  %732 = vmatpush.msra.mxu2 %v689_v30  ;;  %v574_v62 = vmul.f32 0.5, %v573_v33 }
 0x1e3   :  { %v604_v47 = vmul.f32 %v4072_v15, %v595_v29 }
 0x1e4   :  { %733 = vmatpush.msra.mxu2 %v688_v50  ;;  %v575_v6 = vsub.f32 1.5, %v574_v62 }
 0x1e5   :  { %v613_v42 = vadd.f32 %v4081_v48, %v604_v47 }
 0x1e6   :  { %v576_v9 = vmul.f32 %v3460_v52, %v575_v6 }
 0x1e8   :  { %v580_v2 = vsel %vm579_vm5, %v3460_v52, %v576_v9 }
 0x1e9   :  { %v597_v10 = vmul.f32 %v580_v2, %v4047_v39 }
 0x1ea   :  { %3171 = vmatmul.msk.f32.gmra.mxu1 %vm415_vm6, %v613_v42 }
 0x23d   :  { %v488_v19 = vpop.xlane.xlu1 %487 }
 0x23e   :  { %v500_v53 = vmul.f32 %v488_v19, %v3996_v4 }
 0x240   :  { %v508_v54 = vadd.f32 1e-05, %v500_v53 }
 0x242   :  { %3461 = vrsqrt.f32 %v508_v54  ;;  %vm567_vm2 = vweird.f32 %v508_v54 }
 0x245   :  { %v494_v55 = vpop.xlane.xlu0 %493 }
 0x246   :  { %v502_v59 = vmul.f32 %v494_v55, %v3996_v4 }
 0x247   :  { %v664_v37 = vpop.f32.mrf.mxu1 }
 0x248   :  { %v510_v32 = vadd.f32 1e-05, %v502_v59  ;;  %v3462_v58 = vpop.eup %3461  ;;  %v4134_v0 = vadd.f32 %v4130_v57, %v664_v37 }
 0x249   :  { %v562_v63 = vmul.f32 %v3462_v58, %v508_v54  ;;  %vm568_vm15 = vweird.f32 %v3462_v58 }
 0x24a   :  { %3463 = vrsqrt.f32 %v510_v32  ;;  %3175 = vmatmul.msk.f32.vlgmr.msra.gmra.mxu2 %vm415_vm6, %v4134_v0  ;;  %vm569_vm3 = vmor %vm567_vm2, %vm568_vm15  ;;  %vm587_vm8 = vweird.f32 %v510_v32 }
 0x24b   :  { %v563_v23 = vmul.f32 %v3462_v58, %v562_v63 }
 0x24d   :  { %v564_v1 = vmul.f32 0.5, %v563_v23 }
 0x24f   :  { %v565_v13 = vsub.f32 1.5, %v564_v1  ;;  %v667_v40 = vpop.f32.mrf.mxu1 }
 0x250   :  { %v3464_v49 = vpop.eup %3463  ;;  %v4139_v17 = vadd.f32 %v4130_v57, %v667_v40 }
 0x251   :  { %v582_v7 = vmul.f32 %v3464_v49, %v510_v32  ;;  %v566_v51 = vmul.f32 %v3462_v58, %v565_v13  ;;  %vm588_vm7 = vweird.f32 %v3464_v49 }
 0x252   :  { %3176 = vmatmul.msk.f32.gmra.mxu2 %vm415_vm6, %v4139_v17  ;;  %vm589_vm9 = vmor %vm587_vm8, %vm588_vm7 }
 0x253   :  { %v583_v34 = vmul.f32 %v3464_v49, %v582_v7  ;;  %v570_v20 = vsel %vm569_vm3, %v3462_v58, %v566_v51 }
 0x254   :  { %v596_v3 = vmul.f32 %v570_v20, %v4076_v45  ;;  %v606_v45 = vmul.f32 %v4072_v15, %v597_v10 }
 0x255   :  { %v584_v26 = vmul.f32 0.5, %v583_v34 }
 0x256   :  { %v605_v16 = vmul.f32 %v4072_v15, %v596_v3  ;;  %v615_v35 = vadd.f32 %v4081_v48, %v606_v45 }
 0x257   :  { %v585_v5 = vsub.f32 1.5, %v584_v26  ;;  %v670_v28 = vpop.f32.mrf.mxu1 }
 0x258   :  { %v614_v46 = vadd.f32 %v4081_v48, %v605_v16  ;;  %v4148_v36 = vadd.f32 %v4130_v57, %v670_v28 }
 0x259   :  { %v586_v18 = vmul.f32 %v3464_v49, %v585_v5 }
 0x25a   :  { %3172 = vmatmul.msk.f32.gmra.mxu1 %vm415_vm6, %v614_v46  ;;  %3177 = vmatmul.msk.f32.gmra.mxu2 %vm415_vm6, %v4148_v36 }
 0x25b   :  { %v590_v24 = vsel %vm589_vm9, %v3464_v49, %v586_v18 }
 0x25c   :  { %v598_v39 = vmul.f32 %v590_v24, %v4092_v11  ;;  %v4173_v11 = vld [vmem:[%s5476_s2 + $0x4] ss:$0 sm:$0xff] }
 0x25e   :  { %v607_v25 = vmul.f32 %v4072_v15, %v598_v39 }
 0x25f   :  { %v673_v27 = vpop.f32.mrf.mxu1 }
 0x260   :  { %v4157_v61 = vadd.f32 %v4130_v57, %v673_v27  ;;  %v616_v38 = vadd.f32 %v4081_v48, %v607_v25 }
 0x262   :  { %3173 = vmatmul.msk.f32.gmra.mxu1 %vm415_vm6, %v615_v35  ;;  %3178 = vmatmul.msk.f32.gmra.mxu2 %vm415_vm6, %v4157_v61 }
 0x267   :  { %v676_v21 = vpop.f32.mrf.mxu1 }
 0x268   :  { %v4165_v31 = vadd.f32 %v4130_v57, %v676_v21 }
 0x26a   :  { %3174 = vmatmul.msk.f32.gmra.mxu1 %vm415_vm6, %v616_v38  ;;  %3179 = vmatmul.msk.f32.gmra.mxu2 %vm415_vm6, %v4165_v31 }
 0x2cd   :  { %v735_v8 = vpop.f32.mrf.mxu2 }
 0x2ce   :  { %v4176_v43 = vadd.f32 %v4173_v11, %v735_v8 }
 0x2d0   :  { %763 = vrot.lane.b32.xlu2 %v4176_v43, %s3684_s30  ;;  %914 = vrot.lane.b32.xlu0 %v4176_v43, %s3685_s4 }
 0x2d1   :  { %922 = vrot.lane.b32.xlu1 %v4176_v43, %s3686_s5 }
 0x2d5   :  { %v738_v22 = vpop.f32.mrf.mxu2 }
 0x2d6   :  { %v4196_v29 = vadd.f32 %v4173_v11, %v738_v22 }
 0x2d7   :  { %v679_v15 = vpop.f32.mrf.mxu1 }
 0x2d8   :  { %v4185_v48 = vadd.f32 %v4130_v57, %v679_v15  ;;  %1238 = vrot.lane.b32.xlu2 %v4176_v43, %s3687_s6  ;;  %1080 = vrot.lane.b32.xlu0 %v4176_v43, %s3688_s0  ;;  %v3327_v24 = vpack.i.bf16 %v4176_v43, %v4196_v29 }
 0x2d9   :  { %1072 = vrot.lane.b32.xlu1 %v4176_v43, %s3689_s7 }
 0x2da   :  { %3180 = vmatmul.msk.f32.gmra.mxu2 %vm415_vm6, %v4185_v48 }
 0x2dd   :  { %v741_v60 = vpop.f32.mrf.mxu2 }
 0x2de   :  { %v4221_v30 = vadd.f32 %v4173_v11, %v741_v60 }
 0x2df   :  { %v682_v47 = vpop.f32.mrf.mxu1 }
 0x2e0   :  { %v4199_v42 = vadd.f32 %v4130_v57, %v682_v47  ;;  %924 = vrot.lane.b32.xlu2 %v4196_v29, %s3686_s5  ;;  %765 = vrot.lane.b32.xlu0 %v4196_v29, %s3684_s30 }
 0x2e1   :  { %1230 = vrot.lane.b32.xlu1 %v4176_v43, %s3690_s8 }
 0x2e2   :  { %3181 = vmatmul.msk.f32.gmra.mxu2 %vm415_vm6, %v4199_v42 }
 0x2e5   :  { %v744_v12 = vpop.f32.mrf.mxu2 }
 0x2e6   :  { %v4230_v50 = vadd.f32 %v4173_v11, %v744_v12 }
 0x2e7   :  { %v685_v41 = vpop.f32.mrf.mxu1 }
 0x2e8   :  { %v4210_v44 = vadd.f32 %v4130_v57, %v685_v41  ;;  %1082 = vrot.lane.b32.xlu2 %v4196_v29, %s3688_s0  ;;  %1074 = vrot.lane.b32.xlu0 %v4196_v29, %s3689_s7  ;;  %v3322_v46 = vpack.i.bf16 %v4221_v30, %v4230_v50 }
 0x2e9   :  { %916 = vrot.lane.b32.xlu1 %v4196_v29, %s3685_s4 }
 0x2ea   :  { %3182 = vmatmul.msk.f32.gmra.mxu2 %vm415_vm6, %v4210_v44 }
 0x2ed   :  { %v747_v14 = vpop.f32.mrf.mxu2 }
 0x2ee   :  { %v4257_v19 = vadd.f32 %v4173_v11, %v747_v14 }
 0x2f0   :  { %926 = vrot.lane.b32.xlu0 %v4221_v30, %s3686_s5  ;;  %767 = vrot.lane.b32.xlu2 %v4221_v30, %s3684_s30 }
 0x2f1   :  { %1240 = vrot.lane.b32.xlu1 %v4196_v29, %s3687_s6 }
 0x2f8   :  { %1084 = vrot.lane.b32.xlu0 %v4221_v30, %s3688_s0  ;;  %1086 = vrot.lane.b32.xlu2 %v4230_v50, %s3688_s0 }
 0x2f9   :  { %918 = vrot.lane.b32.xlu1 %v4221_v30, %s3685_s4 }
 0x300   :  { %1242 = vrot.lane.b32.xlu0 %v4221_v30, %s3687_s6  ;;  %1244 = vrot.lane.b32.xlu2 %v4230_v50, %s3687_s6 }
 0x301   :  { %769 = vrot.lane.b32.xlu1 %v4230_v50, %s3684_s30 }
 0x308   :  { %1076 = vrot.lane.b32.xlu0 %v4221_v30, %s3689_s7  ;;  %920 = vrot.lane.b32.xlu2 %v4230_v50, %s3685_s4 }
 0x309   :  { %1232 = vrot.lane.b32.xlu1 %v4196_v29, %s3690_s8 }
 0x310   :  { %1234 = vrot.lane.b32.xlu0 %v4221_v30, %s3690_s8  ;;  %1078 = vrot.lane.b32.xlu2 %v4230_v50, %s3689_s7 }
 0x311   :  { %928 = vrot.lane.b32.xlu1 %v4230_v50, %s3686_s5 }
 0x318   :  { %1236 = vrot.lane.b32.xlu2 %v4230_v50, %s3690_s8  ;;  %1611 = vrot.lane.b32.xlu0 %v4257_v19, %s3686_s5 }
 0x320   :  { %1453 = vrot.lane.b32.xlu2 %v4257_v19, %s3684_s30 }
 0x328   :  { %1603 = vrot.lane.b32.xlu2 %v4257_v19, %s3685_s4 }
 0x32a   :  { %v764_v52 = vpop.permute.xlu2 %763 }
 0x330   :  { %1769 = vrot.lane.b32.xlu2 %v4257_v19, %s3688_s0 }
 0x332   :  { %v4269_v53 = vpop.permute.xlu2 %1238 }
 0x33a   :  { %v4271_v54 = vpop.permute.xlu2 %924 }
 0x342   :  { %v1083_v56 = vpop.permute.xlu2 %1082  ;;  %v4273_v55 = vpop.permute.xlu0 %914 }
 0x343   :  { %v4275_v33 = vpop.permute.xlu1 %922 }
 0x34a   :  { %v768_v57 = vpop.permute.xlu2 %767  ;;  %v1081_v59 = vpop.permute.xlu0 %1080 }
 0x34b   :  { %v1073_v32 = vpop.permute.xlu1 %1072 }
 0x352   :  { %v1087_v58 = vpop.permute.xlu2 %1086  ;;  %v766_v37 = vpop.permute.xlu0 %765 }
 0x353   :  { %v4277_v62 = vpop.permute.xlu1 %1230  ;;  %3207 = vmatpush.xpose.msk.msrb.mxu2 %vm771_vm10, %v1087_v58 }
 0x35a   :  { %v1075_v63 = vpop.permute.xlu0 %1074  ;;  %v1245_v20 = vpop.permute.xlu2 %1244 }
 0x35b   :  { %v4280_v23 = vpop.permute.xlu1 %916 }
 0x35d   :  { %v750_v6 = vpop.f32.mrf.mxu2 }
 0x35e   :  { %v4283_v1 = vadd.f32 %v4173_v11, %v750_v6 }
 0x360   :  { %1455 = vrot.lane.b32.xlu1 %v4283_v1, %s3684_s30  ;;  %1605 = vrot.lane.b32.xlu0 %v4283_v1, %s3685_s4  ;;  %v4396_v25 = vpack.i.bf16 %v4257_v19, %v4283_v1 }
 0x361   :  { %1763 = vrot.lane.b32.xlu2 %v4283_v1, %s3689_s7 }
 0x362   :  { %v927_v49 = vpop.permute.xlu0 %926  ;;  %v921_v2 = vpop.permute.xlu2 %920 }
 0x363   :  { %v1241_v13 = vpop.permute.xlu1 %1240 }
 0x365   :  { %v753_v7 = vpop.f32.mrf.mxu2 }
 0x366   :  { %v4292_v40 = vadd.f32 %v4173_v11, %v753_v7 }
 0x368   :  { %1613 = vrot.lane.b32.xlu1 %v4283_v1, %s3686_s5  ;;  %1457 = vrot.lane.b32.xlu0 %v4292_v40, %s3684_s30 }
 0x369   :  { %1773 = vrot.lane.b32.xlu2 %v4292_v40, %s3688_s0 }
 0x36a   :  { %v1085_v9 = vpop.permute.xlu0 %1084  ;;  %v1079_v18 = vpop.permute.xlu2 %1078 }
 0x36b   :  { %v4300_v51 = vpop.permute.xlu1 %918  ;;  %3208 = vmatpush.xpose.msk.msrb.mxu2 %vm771_vm10, %v1085_v9 }
 0x36d   :  { %v756_v16 = vpop.f32.mrf.mxu2 }
 0x36e   :  { %v4338_v10 = vadd.f32 %v4173_v11, %v756_v16 }
 0x36f   :  { %3209 = vmatpush.xpose.msk.msrb.mxu2 %vm771_vm10, %v1083_v56 }
 0x370   :  { %1771 = vrot.lane.b32.xlu1 %v4283_v1, %s3688_s0  ;;  %1615 = vrot.lane.b32.xlu0 %v4292_v40, %s3686_s5  ;;  %v4385_v35 = vpack.i.bf16 %v4292_v40, %v4338_v10 }
 0x371   :  { %1931 = vrot.lane.b32.xlu2 %v4292_v40, %s3687_s6 }
 0x372   :  { %v1243_v26 = vpop.permute.xlu0 %1242  ;;  %v1237_v45 = vpop.permute.xlu2 %1236 }
 0x373   :  { %v770_v34 = vpop.permute.xlu1 %769  ;;  %3210 = vmatpush.xpose.msk.msrb.mxu2 %vm771_vm10, %v1081_v59 }
 0x374   :  { %3183 = vmatpush.xpose.msk.msra.mxu3 %vm771_vm10, %v770_v34 }
 0x376   :  { %3211 = vmatmul.msk.f32.vlgmr.msrb.gmra.mxu2 %vm771_vm10, %v1073_v32 }
 0x378   :  { %1927 = vrot.lane.b32.xlu1 %v4257_v19, %s3687_s6  ;;  %3184 = vmatpush.xpose.msk.msra.mxu3 %vm771_vm10, %v768_v57 }
 0x379   :  { %1761 = vrot.lane.b32.xlu0 %v4257_v19, %s3689_s7  ;;  %1765 = vrot.lane.b32.xlu2 %v4292_v40, %s3689_s7 }
 0x37a   :  { %v1077_v28 = vpop.permute.xlu0 %1076  ;;  %v1454_v27 = vpop.permute.xlu2 %1453 }
 0x37b   :  { %v4320_v3 = vpop.permute.xlu1 %1232 }
 0x37c   :  { %3185 = vmatpush.xpose.msk.msra.mxu3 %vm771_vm10, %v766_v37 }
 0x37e   :  { %3212 = vmatmul.msk.f32.gmra.mxu2 %vm771_vm10, %v1075_v63 }
 0x380   :  { %1921 = vrot.lane.b32.xlu1 %v4283_v1, %s3690_s8  ;;  %3186 = vmatpush.xpose.msk.msra.mxu3 %vm771_vm10, %v764_v52 }
 0x381   :  { %1929 = vrot.lane.b32.xlu0 %v4283_v1, %s3687_s6  ;;  %1923 = vrot.lane.b32.xlu2 %v4292_v40, %s3690_s8 }
 0x382   :  { %v4387_v39 = vpop.permute.xlu2 %1603  ;;  %v1235_v11 = vpop.permute.xlu0 %1234 }
 0x383   :  { %v929_v5 = vpop.permute.xlu1 %928  ;;  %3187 = vmatmul.msk.f32.vlgmr.msra.gmra.mxu3 %vm771_vm10, %v4176_v43 }
 0x384   :  { %3195 = vmatpush.xpose.msk.msrb.mxu0 %vm771_vm10, %v929_v5 }
 0x386   :  { %3213 = vmatmul.msk.f32.gmra.mxu2 %vm771_vm10, %v1077_v28 }
 0x388   :  { %3323 = vrot.lane.b32.xlu1 %v3322_v46, %s3691_s9  ;;  %3196 = vmatpush.xpose.msk.msrb.mxu0 %vm771_vm10, %v927_v49 }
 0x389   :  { %1919 = vrot.lane.b32.xlu0 %v4257_v19, %s3690_s8  ;;  %1459 = vrot.lane.b32.xlu2 %v4338_v10, %s3684_s30 }
 0x38a   :  { %v4402_v21 = vpop.permute.xlu2 %1769  ;;  %v4421_v43 = vpop.permute.xlu0 %1611 }
 0x38b   :  { %3188 = vmatmul.msk.f32.gmra.mxu3 %vm771_vm10, %v4196_v29 }
 0x38c   :  { %3197 = vmatpush.xpose.msk.msrb.mxu0 %vm771_vm10, %v4271_v54 }
 0x38e   :  { %3214 = vmatmul.msk.f32.gmra.mxu2 %vm771_vm10, %v1079_v18 }
 0x390   :  { %3333 = vrot.lane.b32.xlu1 %v3322_v46, %s3692_s10  ;;  %3198 = vmatpush.xpose.msk.msrb.mxu0 %vm771_vm10, %v4275_v33 }
 0x391   :  { %1607 = vrot.lane.b32.xlu0 %v4292_v40, %s3685_s4  ;;  %3343 = vrot.lane.b32.xlu2 %v3322_v46, %s3693_s11 }
 0x393   :  { %3189 = vmatmul.msk.f32.gmra.mxu3 %vm771_vm10, %v4221_v30  ;;  %3199 = vmatmul.msk.f32.vlgmr.msrb.gmra.mxu0 %vm771_vm10, %v4273_v55 }
 0x394   :  { %3219 = vmatpush.xpose.msk.msra.mxu0 %vm771_vm10, %v1245_v20 }
 0x398   :  { %3220 = vmatpush.xpose.msk.msra.mxu0 %vm771_vm10, %v1243_v26  ;;  %1617 = vrot.lane.b32.xlu1 %v4338_v10, %s3686_s5 }
 0x399   :  { %3328 = vrot.lane.b32.xlu0 %v3327_v24, %s3691_s9  ;;  %3353 = vrot.lane.b32.xlu2 %v3322_v46, %s3694_s12 }
 0x39b   :  { %3190 = vmatmul.msk.f32.gmra.mxu3 %vm771_vm10, %v4230_v50  ;;  %3200 = vmatmul.msk.f32.gmra.mxu0 %vm771_vm10, %v4280_v23 }
 0x39c   :  { %3221 = vmatpush.xpose.msk.msra.mxu0 %vm771_vm10, %v1241_v13 }
 0x3a0   :  { %3222 = vmatpush.xpose.msk.msra.mxu0 %vm771_vm10, %v4269_v53  ;;  %3338 = vrot.lane.b32.xlu1 %v3327_v24, %s3692_s10 }
 0x3a1   :  { %3348 = vrot.lane.b32.xlu0 %v3327_v24, %s3693_s11  ;;  %3358 = vrot.lane.b32.xlu2 %v3327_v24, %s3694_s12 }
 0x3a3   :  { %3201 = vmatmul.msk.f32.gmra.mxu0 %vm771_vm10, %v4300_v51 }
 0x3a8   :  { %1775 = vrot.lane.b32.xlu1 %v4338_v10, %s3688_s0 }
 0x3a9   :  { %1767 = vrot.lane.b32.xlu0 %v4338_v10, %s3689_s7  ;;  %3383 = vrot.lane.b32.xlu2 %v4385_v35, %s3693_s11 }
 0x3ab   :  { %3202 = vmatmul.msk.f32.gmra.mxu0 %vm771_vm10, %v921_v2 }
 0x3b0   :  { %1933 = vrot.lane.b32.xlu1 %v4338_v10, %s3687_s6 }
 0x3b1   :  { %3363 = vrot.lane.b32.xlu0 %v4396_v25, %s3691_s9 }
 0x3b3   :  { %3223 = vmatmul.msk.f32.vlgmr.msra.gmra.mxu0 %vm771_vm10, %v4277_v62 }
 0x3b8   :  { %1609 = vrot.lane.b32.xlu1 %v4338_v10, %s3685_s4 }
 0x3b9   :  { %3368 = vrot.lane.b32.xlu0 %v4396_v25, %s3692_s10 }
 0x3bb   :  { %v4410_v38 = vpop.permute.xlu2 %1763  ;;  %3224 = vmatmul.msk.f32.gmra.mxu0 %vm771_vm10, %v4320_v3 }
 0x3c0   :  { %1925 = vrot.lane.b32.xlu1 %v4338_v10, %s3690_s8 }
 0x3c3   :  { %v4416_v8 = vpop.permute.xlu2 %1773  ;;  %3225 = vmatmul.msk.f32.gmra.mxu0 %vm771_vm10, %v1235_v11 }
 0x3c8   :  { %3373 = vrot.lane.b32.xlu1 %v4385_v35, %s3691_s9 }
 0x3cb   :  { %v4423_v15 = vpop.permute.xlu2 %1931  ;;  %3226 = vmatmul.msk.f32.gmra.mxu0 %vm771_vm10, %v1237_v45 }
 0x3d0   :  { %3378 = vrot.lane.b32.xlu1 %v4385_v35, %s3692_s10 }
 0x3d2   :  { %v1456_v22 = vpop.permute.xlu1 %1455  ;;  %v4428_v29 = vpop.permute.xlu0 %1605 }
 0x3d3   :  { %v4430_v47 = vpop.permute.xlu2 %1765 }
 0x3da   :  { %v1614_v41 = vpop.permute.xlu1 %1613  ;;  %v1458_v60 = vpop.permute.xlu0 %1457 }
 0x3db   :  { %v4432_v30 = vpop.permute.xlu2 %1923 }
 0x3e2   :  { %v4434_v12 = vpop.permute.xlu1 %1771  ;;  %v1616_v50 = vpop.permute.xlu0 %1615 }
 0x3e3   :  { %v1460_v14 = vpop.permute.xlu2 %1459 }
 0x3e4   :  { %3231 = vmatpush.xpose.msk.msra.mxu2 %vm771_vm10, %v1460_v14 }
 0x3e8   :  { %3232 = vmatpush.xpose.msk.msra.mxu2 %vm771_vm10, %v1458_v60 }
 0x3ea   :  { %v4438_v52 = vpop.permute.xlu1 %1927 }
 0x3eb   :  { %v4440_v53 = vpop.permute.xlu0 %1761 }
 0x3ec   :  { %3233 = vmatpush.xpose.msk.msra.mxu2 %vm771_vm10, %v1456_v22 }
 0x3f0   :  { %3234 = vmatpush.xpose.msk.msra.mxu2 %vm771_vm10, %v1454_v27 }
 0x3f2   :  { %v4444_v54 = vpop.permute.xlu1 %1921 }
 0x3f3   :  { %v4446_v56 = vpop.permute.xlu0 %1929  ;;  %3235 = vmatmul.msk.f32.vlgmr.msra.gmra.mxu2 %vm771_vm10, %v4257_v19  ;;  %v3344_v19 = vpop.permute.xlu2 %3343 }
 0x3f4   :  { %v3345_v9 = vunpack.i.l.bf16 %v3344_v19  ;;  %v3346_v26 = vunpack.i.h.bf16 %v3344_v19 }
 0x3f9   :  { %v4450_v55 = vpop.f32.mrf.mxu2 }
 0x3fa   :  { %v3324_v33 = vpop.permute.xlu1 %3323  ;;  %v1133_v57 = vsel %vm415_vm6, %v4450_v55, -inf }
 0x3fb   :  { %v4454_v59 = vpop.permute.xlu0 %1919  ;;  %v3325_v32 = vunpack.i.l.bf16 %v3324_v33  ;;  %1134 = vmax.xlane.f32.xlu1 %v1133_v57  ;;  %3236 = vmatmul.msk.f32.gmra.mxu2 %vm771_vm10, %v4283_v1  ;;  %v3326_v58 = vunpack.i.h.bf16 %v3324_v33  ;;  %v3354_v51 = vpop.permute.xlu2 %3353 }
 0x3fc   :  { %v3355_v24 = vunpack.i.l.bf16 %v3354_v51  ;;  %v3356_v22 = vunpack.i.h.bf16 %v3354_v51 }
 0x3fd   :  { %897 = vmatpush.msrb.mxu3 %v3325_v32 }
 0x3ff   :  { %898 = vmatpush.msrb.mxu3 %v3326_v58 }
 0x401   :  { %v4479_v18 = vpop.f32.mrf.mxu2 }
 0x402   :  { %v3334_v37 = vpop.permute.xlu1 %3333  ;;  %v1136_v60 = vsel %vm415_vm6, %v4479_v18, -inf }
 0x403   :  { %v3335_v62 = vunpack.i.l.bf16 %v3334_v37  ;;  %v4458_v63 = vpop.permute.xlu0 %1607  ;;  %3237 = vmatmul.msk.f32.gmra.mxu2 %vm771_vm10, %v4292_v40  ;;  %v3336_v23 = vunpack.i.h.bf16 %v3334_v37  ;;  %v3359_v27 = vpop.permute.xlu2 %3358 }
 0x404   :  { %v3360_v14 = vunpack.i.l.bf16 %v3359_v27 }
 0x405   :  { %1055 = vmatpush.msra.mxu1 %v3335_v62 }
 0x406   :  { %v4462_v6 = vpop.f32.mrf.mxu3 }
 0x407   :  { %1056 = vmatpush.msra.mxu1 %v3336_v23  ;;  %v817_v49 = vsel %vm415_vm6, %v4462_v6, -inf }
 0x408   :  { %818 = vmax.xlane.f32.xlu0 %v817_v49 }
 0x409   :  { %v4494_v57 = vpop.f32.mrf.mxu2 }
 0x40a   :  { %v1618_v1 = vpop.permute.xlu1 %1617  ;;  %v1139_v62 = vsel %vm415_vm6, %v4494_v57, -inf }
 0x40b   :  { %v3329_v13 = vpop.permute.xlu0 %3328  ;;  %3243 = vmatpush.xpose.msk.msrb.mxu0 %vm771_vm10, %v1618_v1  ;;  %3238 = vmatmul.msk.f32.gmra.mxu2 %vm771_vm10, %v4338_v10 }
 0x40c   :  { %v3330_v7 = vunpack.i.l.bf16 %v3329_v13  ;;  %v3331_v40 = vunpack.i.h.bf16 %v3329_v13 }
 0x40e   :  { %899 = vmatpush.msrb.mxu3 %v3330_v7  ;;  %v4469_v34 = vpop.f32.mrf.mxu3 }
 0x40f   :  { %3244 = vmatpush.xpose.msk.msrb.mxu0 %vm771_vm10, %v1616_v50  ;;  %v820_v20 = vsel %vm415_vm6, %v4469_v34, -inf }
 0x410   :  { %900 = vmatpush.msrb.mxu3 %v3331_v40  ;;  %v4474_v3 = vpop.f32.mrf.mxu0  ;;  %821 = vmax.xlane.f32.xlu1 %v820_v20 }
 0x411   :  { %v975_v2 = vsel %vm415_vm6, %v4474_v3, -inf }
 0x412   :  { %1213 = vmatpush.msra.mxu3 %v3345_v9  ;;  %v3339_v5 = vpop.permute.xlu1 %3338  ;;  %976 = vmax.xlane.f32.xlu2 %v975_v2 }
 0x413   :  { %v3340_v16 = vunpack.i.l.bf16 %v3339_v5  ;;  %v3349_v28 = vpop.permute.xlu0 %3348  ;;  %3245 = vmatpush.xpose.msk.msrb.mxu0 %vm771_vm10, %v1614_v41  ;;  %v3341_v10 = vunpack.i.h.bf16 %v3339_v5 }
 0x414   :  { %1214 = vmatpush.msra.mxu3 %v3346_v26  ;;  %v3350_v46 = vunpack.i.l.bf16 %v3349_v28  ;;  %v3351_v45 = vunpack.i.h.bf16 %v3349_v28 }
 0x415   :  { %1057 = vmatpush.msra.mxu1 %v3340_v16  ;;  %v4584_v16 = vpop.permute.xlu2 %3383 }
 0x416   :  { %1215 = vmatpush.msra.mxu3 %v3350_v46  ;;  %v4492_v33 = vpop.f32.mrf.mxu3 }
 0x417   :  { %1058 = vmatpush.msra.mxu1 %v3341_v10  ;;  %3246 = vmatpush.xpose.msk.msrb.mxu0 %vm771_vm10, %v4421_v43  ;;  %v3361_v43 = vunpack.i.h.bf16 %v3359_v27 }
 0x418   :  { %1216 = vmatpush.msra.mxu3 %v3351_v45  ;;  %v4483_v11 = vpop.f32.mrf.mxu0 }
 0x419   :  { %1371 = vmatpush.msrb.mxu1 %v3355_v24  ;;  %v978_v41 = vsel %vm415_vm6, %v4483_v11, -inf }
 0x41a   :  { %v1776_v50 = vpop.permute.xlu1 %1775  ;;  %979 = vmax.xlane.f32.xlu0 %v978_v41  ;;  %1137 = vmax.xlane.f32.xlu2 %v1136_v60 }
 0x41b   :  { %1372 = vmatpush.msrb.mxu1 %v3356_v22  ;;  %3247 = vmatmul.msk.f32.vlgmr.msrb.gmra.mxu0 %vm771_vm10, %v4387_v39  ;;  %v823_v39 = vsel %vm415_vm6, %v4492_v33, -inf }
 0x41c   :  { %3255 = vmatpush.xpose.msk.msrb.mxu2 %vm771_vm10, %v1776_v50 }
 0x41d   :  { %1373 = vmatpush.msrb.mxu1 %v3360_v14 }
 0x41f   :  { %1374 = vmatpush.msrb.mxu1 %v3361_v43 }
 0x420   :  { %v4496_v32 = vpop.f32.mrf.mxu0  ;;  %3256 = vmatpush.xpose.msk.msrb.mxu2 %vm771_vm10, %v4416_v8  ;;  %v4511_v8 = vpop.f32.mrf.mxu3 }
 0x421   :  { %v981_v58 = vsel %vm415_vm6, %v4496_v32, -inf }
 0x422   :  { %v1934_v37 = vpop.permute.xlu1 %1933  ;;  %982 = vmax.xlane.f32.xlu1 %v981_v58  ;;  %824 = vmax.xlane.f32.xlu2 %v823_v39 }
 0x423   :  { %1140 = vmax.xlane.f32.xlu0 %v1139_v62  ;;  %3248 = vmatmul.msk.f32.gmra.mxu0 %vm771_vm10, %v4428_v29  ;;  %v826_v29 = vsel %vm415_vm6, %v4511_v8, -inf }
 0x424   :  { %3257 = vmatpush.xpose.msk.msrb.mxu2 %vm771_vm10, %v4434_v12  ;;  %3267 = vmatpush.xpose.msk.msra.mxu0 %vm771_vm10, %v1934_v37 }
 0x428   :  { %v4513_v19 = vpop.f32.mrf.mxu0  ;;  %3258 = vmatpush.xpose.msk.msrb.mxu2 %vm771_vm10, %v4402_v21  ;;  %3268 = vmatpush.xpose.msk.msra.mxu0 %vm771_vm10, %v4423_v15  ;;  %v4529_v21 = vpop.f32.mrf.mxu2 }
 0x429   :  { %v984_v23 = vsel %vm415_vm6, %v4513_v19, -inf  ;;  %v1142_v49 = vsel %vm415_vm6, %v4529_v21, -inf }
 0x42a   :  { %985 = vmax.xlane.f32.xlu2 %v984_v23 }
 0x42b   :  { %827 = vmax.xlane.f32.xlu0 %v826_v29  ;;  %3249 = vmatmul.msk.f32.gmra.mxu0 %vm771_vm10, %v4458_v63  ;;  %v1610_v63 = vpop.permute.xlu1 %1609 }
 0x42c   :  { %3259 = vmatmul.msk.f32.vlgmr.msrb.gmra.mxu2 %vm771_vm10, %v4440_v53  ;;  %3269 = vmatpush.xpose.msk.msra.mxu0 %vm771_vm10, %v4446_v56 }
 0x430   :  { %v4531_v15 = vpop.f32.mrf.mxu0  ;;  %3270 = vmatpush.xpose.msk.msra.mxu0 %vm771_vm10, %v4438_v52  ;;  %v1768_v52 = vpop.permute.xlu0 %1767 }
 0x431   :  { %v1291_v12 = vsel %vm415_vm6, %v4531_v15, -inf }
 0x432   :  { %1143 = vmax.xlane.f32.xlu2 %v1142_v49 }
 0x433   :  { %1292 = vmax.xlane.f32.xlu0 %v1291_v12  ;;  %3250 = vmatmul.msk.f32.gmra.mxu0 %vm771_vm10, %v1610_v63 }
 0x434   :  { %3260 = vmatmul.msk.f32.gmra.mxu2 %vm771_vm10, %v4410_v38  ;;  %v1926_v38 = vpop.permute.xlu1 %1925 }
 0x438   :  { %v4542_v53 = vpop.f32.mrf.mxu0  ;;  %v4590_v45 = vpop.permute.xlu0 %3363 }
 0x439   :  { %v1294_v56 = vsel %vm415_vm6, %v4542_v53, -inf }
 0x43a   :  { %1295 = vmax.xlane.f32.xlu1 %v1294_v56 }
 0x43b   :  { %3271 = vmatmul.msk.f32.vlgmr.msra.gmra.mxu0 %vm771_vm10, %v4454_v59 }
 0x43c   :  { %3261 = vmatmul.msk.f32.gmra.mxu2 %vm771_vm10, %v4430_v47  ;;  %v4598_v60 = vpop.permute.xlu1 %3373 }
 0x440   :  { %v4560_v13 = vpop.f32.mrf.mxu0  ;;  %v4600_v50 = vpop.permute.xlu0 %3368 }
 0x443   :  { %3272 = vmatmul.msk.f32.gmra.mxu0 %vm771_vm10, %v4444_v54  ;;  %v1297_v54 = vsel %vm415_vm6, %v4560_v13, -inf }
 0x444   :  { %3262 = vmatmul.msk.f32.gmra.mxu2 %vm771_vm10, %v1768_v52  ;;  %v4610_v62 = vpop.permute.xlu1 %3378 }
 0x448   :  { %v4572_v9 = vpop.f32.mrf.mxu0 }
 0x449   :  { %v1300_v20 = vsel %vm415_vm6, %v4572_v9, -inf }
 0x44b   :  { %3273 = vmatmul.msk.f32.gmra.mxu0 %vm771_vm10, %v4432_v30 }
 0x453   :  { %3274 = vmatmul.msk.f32.gmra.mxu0 %vm771_vm10, %v1926_v38 }
 0x46e   :  { %v1135_v56 = vpop.xlane.xlu1 %1134 }
 0x476   :  { %v4556_v1 = vpop.f32.mrf.mxu2 }
 0x477   :  { %v1506_v59 = vsel %vm415_vm6, %v4556_v1, -inf }
 0x478   :  { %1507 = vmax.xlane.f32.xlu0 %v1506_v59  ;;  %v1145_v59 = vsub.f32 %v4450_v55, %v1135_v56 }
 0x47a   :  { %v1149_v55 = vmul.f32 1.442695, %v1145_v59 }
 0x47b   :  { %v819_v23 = vpop.xlane.xlu0 %818 }
 0x47c   :  { %3465 = vpow2.f32 %v1149_v55 }
 0x47e   :  { %v4562_v47 = vpop.f32.mrf.mxu2 }
 0x47f   :  { %v1509_v7 = vsel %vm415_vm6, %v4562_v47, -inf }
 0x480   :  { %1298 = vmax.xlane.f32.xlu0 %v1297_v54  ;;  %1510 = vmax.xlane.f32.xlu2 %v1509_v7 }
 0x485   :  { %v977_v46 = vpop.xlane.xlu2 %976 }
 0x486   :  { %v4568_v30 = vpop.f32.mrf.mxu2 }
 0x487   :  { %v1512_v40 = vsel %vm415_vm6, %v4568_v30, -inf }
 0x488   :  { %1513 = vmax.xlane.f32.xlu2 %v1512_v40  ;;  %v987_v40 = vsub.f32 %v4474_v3, %v977_v46 }
 0x48d   :  { %v1138_v27 = vpop.xlane.xlu2 %1137  ;;  %v980_v38 = vpop.xlane.xlu0 %979 }
 0x48e   :  { %v4574_v51 = vpop.f32.mrf.mxu2  ;;  %v1146_v3 = vsub.f32 %v4479_v18, %v1138_v27  ;;  %v4645_v27 = vpop.eup %3465 }
 0x48f   :  { %v1515_v26 = vsel %vm415_vm6, %v4574_v51, -inf }
 0x490   :  { %1301 = vmax.xlane.f32.xlu2 %v1300_v20  ;;  %1516 = vmax.xlane.f32.xlu1 %v1515_v26  ;;  %v1151_v18 = vmul.f32 1.442695, %v1146_v3 }
 0x495   :  { %v825_v37 = vpop.xlane.xlu2 %824 }
 0x496   :  { %v4634_v46 = vpop.xlane.xlu0 %1140 }
 0x498   :  { %v4580_v2 = vpop.f32.mrf.mxu0 }
 0x499   :  { %v1664_v5 = vsel %vm415_vm6, %v4580_v2, -inf }
 0x49a   :  { %1665 = vmax.xlane.f32.xlu2 %v1664_v5 }
 0x49d   :  { %v986_v52 = vpop.xlane.xlu2 %985 }
 0x49e   :  { %v990_v54 = vsub.f32 %v4513_v19, %v986_v52 }
 0x4a0   :  { %v4586_v28 = vpop.f32.mrf.mxu0  ;;  %v997_v19 = vmul.f32 1.442695, %v990_v54  ;;  %v831_v54 = vsub.f32 %v4492_v33, %v825_v37 }
 0x4a1   :  { %v1667_v43 = vsel %vm415_vm6, %v4586_v28, -inf }
 0x4a2   :  { %3467 = vpow2.f32 %v997_v19  ;;  %v837_v19 = vmul.f32 1.442695, %v831_v54 }
 0x4a5   :  { %v1144_v37 = vpop.xlane.xlu2 %1143 }
 0x4a8   :  { %v4588_v10 = vpop.f32.mrf.mxu0 }
 0x4a9   :  { %v1670_v49 = vsel %vm415_vm6, %v4588_v10, -inf }
 0x4af   :  { %v4592_v24 = vpop.f32.mrf.mxu2 }
 0x4b0   :  { %v1822_v22 = vsel %vm415_vm6, %v4592_v24, -inf  ;;  %v4596_v41 = vpop.f32.mrf.mxu0 }
 0x4b1   :  { %1823 = vmax.xlane.f32.xlu0 %v1822_v22  ;;  %v1673_v5 = vsel %vm415_vm6, %v4596_v41, -inf }
 0x4b7   :  { %v4602_v14 = vpop.f32.mrf.mxu2 }
 0x4b8   :  { %v1825_v58 = vsel %vm415_vm6, %v4602_v14, -inf  ;;  %v4608_v39 = vpop.f32.mrf.mxu0 }
 0x4b9   :  { %1668 = vmax.xlane.f32.xlu0 %v1667_v43  ;;  %1826 = vmax.xlane.f32.xlu1 %v1825_v58  ;;  %v991_v43 = vmul.f32 1.442695, %v987_v40  ;;  %v829_v58 = vsub.f32 %v4462_v6, %v819_v23  ;;  %v1980_v56 = vsel %vm415_vm6, %v4608_v39, -inf  ;;  %v4647_v6 = vpop.eup %3467  ;;  %v988_v40 = vsub.f32 %v4483_v11, %v980_v38 }
 0x4ba   :  { %v1148_v38 = vsub.f32 %v4529_v21, %v1144_v37 }
 0x4bb   :  { %3469 = vpow2.f32 %v991_v43  ;;  %v833_v59 = vmul.f32 1.442695, %v829_v58  ;;  %v822_v43 = vpop.xlane.xlu1 %821  ;;  %v993_v33 = vmul.f32 1.442695, %v988_v40 }
 0x4bc   :  { %3471 = vpow2.f32 %v1151_v18  ;;  %v830_v58 = vsub.f32 %v4469_v34, %v822_v43 }
 0x4bd   :  { %3473 = vpow2.f32 %v833_v59 }
 0x4be   :  { %3475 = vpow2.f32 %v837_v19  ;;  %v835_v59 = vmul.f32 1.442695, %v830_v58 }
 0x4bf   :  { %v4612_v29 = vpop.f32.mrf.mxu2  ;;  %3477 = vpow2.f32 %v993_v33 }
 0x4c0   :  { %v1828_v12 = vsel %vm415_vm6, %v4612_v29, -inf  ;;  %v4618_v63 = vpop.f32.mrf.mxu0 }
 0x4c1   :  { %1829 = vmax.xlane.f32.xlu1 %v1828_v12  ;;  %1671 = vmax.xlane.f32.xlu0 %v1670_v49  ;;  %v1983_v20 = vsel %vm415_vm6, %v4618_v63, -inf  ;;  %v4649_v23 = vpop.eup %3469 }
 0x4c2   :  { %v999_v55 = vsel %vm415_vm6, %v4649_v23, 0.0  ;;  %v4661_v3 = vpop.eup %3471 }
 0x4c3   :  { %v4663_v11 = vpop.eup %3473  ;;  %v983_v54 = vpop.xlane.xlu1 %982 }
 0x4c4   :  { %v4671_v40 = vpop.eup %3475  ;;  %v989_v21 = vsub.f32 %v4496_v32, %v983_v54  ;;  %v1147_v32 = vsub.f32 %v4494_v57, %v4634_v46 }
 0x4c6   :  { %v995_v33 = vmul.f32 1.442695, %v989_v21 }
 0x4c7   :  { %v4622_v7 = vpop.f32.mrf.mxu2 }
 0x4c8   :  { %v4627_v26 = vpop.f32.mrf.mxu0  ;;  %v1831_v22 = vsel %vm415_vm6, %v4622_v7, -inf }
 0x4c9   :  { %1984 = vmax.xlane.f32.xlu0 %v1983_v20  ;;  %1674 = vmax.xlane.f32.xlu1 %v1673_v5  ;;  %v1986_v12 = vsel %vm415_vm6, %v4627_v26, -inf  ;;  %v1008_v20 = vsel %vm415_vm6, %v4647_v6, 0.0  ;;  %v1157_v5 = vsel %vm415_vm6, %v4645_v27, 0.0 }
 0x4ca   :  { %1832 = vmax.xlane.f32.xlu2 %v1831_v22  ;;  %v4657_v22 = vpop.xlane.xlu0 %827 }
 0x4cb   :  { %v1296_v37 = vpop.xlane.xlu1 %1295  ;;  %v832_v57 = vsub.f32 %v4511_v8, %v4657_v22 }
 0x4d0   :  { %v4639_v49 = vpop.f32.mrf.mxu0 }
 0x4d1   :  { %1987 = vmax.xlane.f32.xlu0 %v1986_v12  ;;  %1981 = vmax.xlane.f32.xlu1 %v1980_v56  ;;  %v1989_v52 = vsel %vm415_vm6, %v4639_v49, -inf  ;;  %v1160_v12 = vsel %vm415_vm6, %v4661_v3, 0.0  ;;  %v841_v56 = vsel %vm415_vm6, %v4663_v11, 0.0 }
 0x4d2   :  { %1990 = vmax.xlane.f32.xlu2 %v1989_v52  ;;  %v1155_v52 = vmul.f32 1.442695, %v1148_v38  ;;  %v1293_v18 = vpop.xlane.xlu0 %1292 }
 0x4d3   :  { %v1303_v34 = vsub.f32 %v4531_v15, %v1293_v18  ;;  %v1304_v15 = vsub.f32 %v4542_v53, %v1296_v37 }
 0x4d4   :  { %3479 = vpow2.f32 %v1155_v52 }
 0x4d5   :  { %3481 = vpow2.f32 %v835_v59  ;;  %v1307_v19 = vmul.f32 1.442695, %v1303_v34  ;;  %v1309_v52 = vmul.f32 1.442695, %v1304_v15  ;;  %v1153_v59 = vmul.f32 1.442695, %v1147_v32 }
 0x4d7   :  { %3483 = vpow2.f32 %v1307_v19 }
 0x4d8   :  { %3485 = vpow2.f32 %v995_v33  ;;  %v839_v33 = vmul.f32 1.442695, %v832_v57 }
 0x4d9   :  { %1009 = vadd.xlane.f32.xlu0 %v1008_v20  ;;  %1158 = vadd.xlane.f32.xlu1 %v1157_v5  ;;  %v4673_v20 = vpop.eup %3477  ;;  %v847_v5 = vsel %vm415_vm6, %v4671_v40, 0.0  ;;  %3487 = vpow2.f32 %v1309_v52 }
 0x4da   :  { %1000 = vadd.xlane.f32.xlu2 %v999_v55  ;;  %v1002_v55 = vsel %vm415_vm6, %v4673_v20, 0.0  ;;  %v4681_v38 = vpop.eup %3479  ;;  %3489 = vpow2.f32 %v1153_v59 }
 0x4db   :  { %v4683_v58 = vpop.eup %3481 }
 0x4dd   :  { %v4692_v34 = vpop.eup %3483 }
 0x4de   :  { %v4694_v21 = vpop.eup %3485  ;;  %v1315_v46 = vsel %vm415_vm6, %v4692_v34, 0.0 }
 0x4df   :  { %v4703_v37 = vpop.eup %3487 }
 0x4e0   :  { %v4705_v15 = vpop.eup %3489  ;;  %v1318_v8 = vsel %vm415_vm6, %v4703_v37, 0.0 }
 0x4e1   :  { %1161 = vadd.xlane.f32.xlu1 %v1160_v12  ;;  %v1166_v12 = vsel %vm415_vm6, %v4681_v38, 0.0  ;;  %v1163_v22 = vsel %vm415_vm6, %v4705_v15, 0.0 }
 0x4e2   :  { %842 = vadd.xlane.f32.xlu2 %v841_v56  ;;  %v844_v56 = vsel %vm415_vm6, %v4683_v58, 0.0 }
 0x4e9   :  { %848 = vadd.xlane.f32.xlu1 %v847_v5  ;;  %v1005_v5 = vsel %vm415_vm6, %v4694_v21, 0.0 }
 0x4ea   :  { %1003 = vadd.xlane.f32.xlu2 %v1002_v55 }
 0x4eb   :  { %v1508_v43 = vpop.xlane.xlu0 %1507 }
 0x4f1   :  { %1167 = vadd.xlane.f32.xlu1 %v1166_v12 }
 0x4f2   :  { %845 = vadd.xlane.f32.xlu2 %v844_v56 }
 0x4f3   :  { %v1511_v18 = vpop.xlane.xlu2 %1510  ;;  %v1299_v54 = vpop.xlane.xlu0 %1298 }
 0x4f4   :  { %v1305_v53 = vsub.f32 %v4560_v13, %v1299_v54  ;;  %v1518_v13 = vsub.f32 %v4556_v1, %v1508_v43  ;;  %v1519_v1 = vsub.f32 %v4562_v47, %v1511_v18 }
 0x4f6   :  { %v1311_v55 = vmul.f32 1.442695, %v1305_v53  ;;  %v1522_v32 = vmul.f32 1.442695, %v1518_v13  ;;  %v1524_v57 = vmul.f32 1.442695, %v1519_v1 }
 0x4f8   :  { %3491 = vpow2.f32 %v1311_v55 }
 0x4f9   :  { %1316 = vadd.xlane.f32.xlu1 %v1315_v46  ;;  %3493 = vpow2.f32 %v839_v33 }
 0x4fa   :  { %1006 = vadd.xlane.f32.xlu2 %v1005_v5  ;;  %3495 = vpow2.f32 %v1522_v32 }
 0x4fb   :  { %v1514_v19 = vpop.xlane.xlu2 %1513 }
 0x4fc   :  { %v1520_v47 = vsub.f32 %v4568_v30, %v1514_v19 }
 0x4fe   :  { %v4713_v52 = vpop.eup %3491  ;;  %v1526_v55 = vmul.f32 1.442695, %v1520_v47 }
 0x4ff   :  { %v4715_v59 = vpop.eup %3493  ;;  %v1321_v43 = vsel %vm415_vm6, %v4713_v52, 0.0 }
 0x500   :  { %v850_v53 = vsel %vm415_vm6, %v4715_v59, 0.0  ;;  %v4722_v46 = vpop.eup %3495 }
 0x501   :  { %1319 = vadd.xlane.f32.xlu1 %v1318_v8  ;;  %v1530_v18 = vsel %vm415_vm6, %v4722_v46, 0.0 }
 0x502   :  { %1164 = vadd.xlane.f32.xlu2 %v1163_v22 }
 0x503   :  { %v1302_v12 = vpop.xlane.xlu2 %1301  ;;  %v1517_v33 = vpop.xlane.xlu1 %1516 }
 0x504   :  { %v1306_v56 = vsub.f32 %v4572_v9, %v1302_v12  ;;  %v1521_v8 = vsub.f32 %v4574_v51, %v1517_v33 }
 0x506   :  { %v1313_v54 = vmul.f32 1.442695, %v1306_v56  ;;  %v1528_v32 = vmul.f32 1.442695, %v1521_v8 }
 0x508   :  { %3497 = vpow2.f32 %v1313_v54 }
 0x509   :  { %1322 = vadd.xlane.f32.xlu1 %v1321_v43  ;;  %3499 = vpow2.f32 %v1524_v57 }
 0x50a   :  { %851 = vadd.xlane.f32.xlu2 %v850_v53  ;;  %3501 = vpow2.f32 %v1526_v55 }
 0x50b   :  { %3503 = vpow2.f32 %v1528_v32 }
 0x50d   :  { %v1666_v12 = vpop.xlane.xlu2 %1665 }
 0x50e   :  { %v4724_v9 = vpop.eup %3497  ;;  %v1676_v30 = vsub.f32 %v4580_v2, %v1666_v12 }
 0x50f   :  { %v1324_v5 = vsel %vm415_vm6, %v4724_v9, 0.0  ;;  %v4731_v13 = vpop.eup %3499 }
 0x510   :  { %1325 = vadd.xlane.f32.xlu0 %v1324_v5  ;;  %v1533_v22 = vsel %vm415_vm6, %v4731_v13, 0.0  ;;  %v4736_v56 = vpop.eup %3501  ;;  %v1680_v54 = vmul.f32 1.442695, %v1676_v30 }
 0x511   :  { %v1536_v19 = vsel %vm415_vm6, %v4736_v56, 0.0  ;;  %v4741_v43 = vpop.eup %3503 }
 0x512   :  { %1531 = vadd.xlane.f32.xlu2 %v1530_v18  ;;  %3505 = vpow2.f32 %v1680_v54  ;;  %v1539_v53 = vsel %vm415_vm6, %v4741_v43, 0.0 }
 0x518   :  { %v4748_v55 = vpop.eup %3505 }
 0x51a   :  { %1534 = vadd.xlane.f32.xlu2 %v1533_v22 }
 0x522   :  { %1537 = vadd.xlane.f32.xlu2 %v1536_v19 }
 0x524   :  { %v1824_v1 = vpop.xlane.xlu0 %1823 }
 0x525   :  { %v1834_v51 = vsub.f32 %v4592_v24, %v1824_v1  ;;  %v1688_v24 = vsel %vm415_vm6, %v4748_v55, 0.0 }
 0x527   :  { %v1838_v57 = vmul.f32 1.442695, %v1834_v51 }
 0x529   :  { %3507 = vpow2.f32 %v1838_v57 }
 0x52a   :  { %1540 = vadd.xlane.f32.xlu2 %v1539_v53 }
 0x52c   :  { %v1827_v5 = vpop.xlane.xlu1 %1826  ;;  %v1669_v47 = vpop.xlane.xlu0 %1668 }
 0x52d   :  { %v1835_v2 = vsub.f32 %v4602_v14, %v1827_v5  ;;  %v1677_v18 = vsub.f32 %v4586_v28, %v1669_v47 }
 0x52f   :  { %v1840_v33 = vmul.f32 1.442695, %v1835_v2  ;;  %v1682_v8 = vmul.f32 1.442695, %v1677_v18  ;;  %v4755_v30 = vpop.eup %3507 }
 0x530   :  { %v1846_v51 = vsel %vm415_vm6, %v4755_v30, 0.0 }
 0x531   :  { %3509 = vpow2.f32 %v1840_v33 }
 0x532   :  { %3511 = vpow2.f32 %v1682_v8  ;;  %1689 = vadd.xlane.f32.xlu2 %v1688_v24 }
 0x534   :  { %v4752_v22 = vpop.xlane.xlu1 %1829  ;;  %v1672_v32 = vpop.xlane.xlu0 %1671 }
 0x535   :  { %v1678_v12 = vsub.f32 %v4588_v10, %v1672_v32 }
 0x537   :  { %v4757_v14 = vpop.eup %3509  ;;  %v1684_v28 = vmul.f32 1.442695, %v1678_v12 }
 0x538   :  { %v4759_v19 = vpop.eup %3511  ;;  %v1849_v54 = vsel %vm415_vm6, %v4757_v14, 0.0 }
 0x539   :  { %1850 = vadd.xlane.f32.xlu0 %v1849_v54  ;;  %v1691_v1 = vsel %vm415_vm6, %v4759_v19, 0.0  ;;  %3513 = vpow2.f32 %v1684_v28 }
 0x53a   :  { %1692 = vadd.xlane.f32.xlu1 %v1691_v1  ;;  %1847 = vadd.xlane.f32.xlu2 %v1846_v51 }
 0x53c   :  { %v1675_v10 = vpop.xlane.xlu1 %1674 }
 0x53d   :  { %v1679_v53 = vsub.f32 %v4596_v41, %v1675_v10  ;;  %v4768_v57 = vpop.xlane.xlu2 %1832 }
 0x53f   :  { %v1686_v5 = vmul.f32 1.442695, %v1679_v53  ;;  %v4770_v47 = vpop.eup %3513  ;;  %v3380_v53 = vunpack.i.l.bf16 %v4610_v62 }
 0x540   :  { %v1694_v2 = vsel %vm415_vm6, %v4770_v47, 0.0 }
 0x541   :  { %3515 = vpow2.f32 %v1686_v5  ;;  %1695 = vadd.xlane.f32.xlu0 %v1694_v2  ;;  %v3381_v2 = vunpack.i.h.bf16 %v4610_v62  ;;  %v3376_v62 = vunpack.i.h.bf16 %v4598_v60 }
 0x544   :  { %v1982_v18 = vpop.xlane.xlu1 %1981 }
 0x545   :  { %v1992_v33 = vsub.f32 %v4608_v39, %v1982_v18  ;;  %v4775_v8 = vpop.xlane.xlu2 %1990  ;;  %v3370_v18 = vunpack.i.l.bf16 %v4600_v50 }
 0x547   :  { %v4777_v24 = vpop.eup %3515  ;;  %v1996_v32 = vmul.f32 1.442695, %v1992_v33 }
 0x548   :  { %v1697_v41 = vsel %vm415_vm6, %v4777_v24, 0.0 }
 0x549   :  { %3517 = vpow2.f32 %v1996_v32  ;;  %1698 = vadd.xlane.f32.xlu2 %v1697_v41  ;;  %v3371_v32 = vunpack.i.h.bf16 %v4600_v50  ;;  %v1985_v41 = vpop.xlane.xlu0 %1984 }
 0x54c   :  { %v4781_v28 = vpop.xlane.xlu1 %1158 }
 0x54d   :  { %v1001_v12 = vpop.xlane.xlu2 %1000 }
 0x54e   :  { %3519 = vrcp.f32 %v1001_v12 }
 0x54f   :  { %v4783_v54 = vpop.eup %3517 }
 0x550   :  { %v2004_v1 = vsel %vm415_vm6, %v4783_v54, 0.0 }
 0x551   :  { %2005 = vadd.xlane.f32.xlu0 %v2004_v1  ;;  %v3375_v1 = vunpack.i.l.bf16 %v4598_v60  ;;  %v1988_v60 = vpop.xlane.xlu0 %1987 }
 0x553   :  { %3388 = vrot.lane.b32.xlu1 %v4396_v25, %s3693_s11 }
 0x554   :  { %v3520_v39 = vpop.eup %3519  ;;  %v4791_v5 = vpop.xlane.xlu1 %1161 }
 0x555   :  { %v843_v51 = vpop.xlane.xlu2 %842  ;;  %v1015_v10 = vmul.f32 %v3520_v39, %v4649_v23  ;;  %v3365_v39 = vunpack.i.l.bf16 %v4590_v45 }
 0x556   :  { %3521 = vrcp.f32 %v843_v51 }
 0x557   :  { %3203 = vmatmul.msk.f32.vlgmr.msra.gmra.mxu1 %vm415_vm6, %v1015_v10  ;;  %v3366_v10 = vunpack.i.h.bf16 %v4590_v45 }
 0x558   :  { %1744 = vmatpush.msra.mxu1 %v3380_v53 }
 0x55a   :  { %1745 = vmatpush.msra.mxu1 %v3381_v2 }
 0x55c   :  { %v3522_v33 = vpop.eup %3521  ;;  %1746 = vmatpush.msra.mxu1 %v3370_v18  ;;  %v849_v50 = vpop.xlane.xlu1 %848 }
 0x55d   :  { %v1004_v12 = vpop.xlane.xlu2 %1003  ;;  %v857_v23 = vmul.f32 %v3522_v33, %v4663_v11 }
 0x55e   :  { %3523 = vrcp.f32 %v1004_v12  ;;  %1747 = vmatpush.msra.mxu1 %v3371_v32  ;;  %v1995_v12 = vsub.f32 %v4639_v49, %v4775_v8  ;;  %v1994_v8 = vsub.f32 %v4627_v26, %v1988_v60 }
 0x55f   :  { %3191 = vmatmul.msk.f32.vlgmr.msrb.gmra.mxu3 %vm415_vm6, %v857_v23 }
 0x560   :  { %1586 = vmatpush.msrb.mxu3 %v3375_v1 }
 0x561   :  { %3393 = vrot.lane.b32.xlu2 %v4385_v35, %s3694_s12  ;;  %v1993_v35 = vsub.f32 %v4618_v63, %v1985_v41 }
 0x562   :  { %1587 = vmatpush.msrb.mxu3 %v3376_v62 }
 0x563   :  { %v1998_v32 = vmul.f32 1.442695, %v1993_v35 }
 0x564   :  { %v3524_v51 = vpop.eup %3523  ;;  %1588 = vmatpush.msrb.mxu3 %v3365_v39  ;;  %v4810_v18 = vpop.xlane.xlu1 %1167  ;;  %v1836_v39 = vsub.f32 %v4612_v29, %v4752_v22  ;;  %v1837_v29 = vsub.f32 %v4622_v7, %v4768_v57 }
 0x565   :  { %3398 = vrot.lane.b32.xlu0 %v4396_v25, %s3694_s12  ;;  %v846_v11 = vpop.xlane.xlu2 %845  ;;  %v1016_v53 = vmul.f32 %v3524_v51, %v4673_v20  ;;  %v1010_v25 = vpop.xlane.xlu0 %1009 }
 0x566   :  { %3525 = vrcp.f32 %v846_v11  ;;  %1589 = vmatpush.msrb.mxu3 %v3366_v10  ;;  %v1842_v51 = vmul.f32 1.442695, %v1836_v39  ;;  %v2000_v11 = vmul.f32 1.442695, %v1994_v8  ;;  %v1844_v35 = vmul.f32 1.442695, %v1837_v29 }
 0x567   :  { %3204 = vmatmul.msk.f32.gmra.mxu1 %vm415_vm6, %v1016_v53  ;;  %3527 = vrcp.f32 %v849_v50 }
 0x56c   :  { %v3526_v2 = vpop.eup %3525  ;;  %v1317_v62 = vpop.xlane.xlu1 %1316 }
 0x56d   :  { %v1007_v33 = vpop.xlane.xlu2 %1006  ;;  %v858_v45 = vmul.f32 %v3526_v2, %v4683_v58  ;;  %v3528_v20 = vpop.eup %3527  ;;  %v2002_v58 = vmul.f32 1.442695, %v1995_v12 }
 0x56e   :  { %3529 = vrcp.f32 %v1007_v33  ;;  %v859_v41 = vmul.f32 %v3528_v20, %v4671_v40 }
 0x56f   :  { %3192 = vmatmul.msk.f32.gmra.mxu3 %vm415_vm6, %v858_v45  ;;  %3531 = vpow2.f32 %v1998_v32 }
 0x570   :  { %3533 = vrcp.f32 %v1010_v25 }
 0x571   :  { %3535 = vpow2.f32 %v2002_v58 }
 0x572   :  { %3537 = vrcp.f32 %v1317_v62  ;;  %v3386_v62 = vunpack.i.h.bf16 %v4584_v16 }
 0x574   :  { %v3530_v23 = vpop.eup %3529  ;;  %v1320_v22 = vpop.xlane.xlu1 %1319 }
 0x575   :  { %v4816_v63 = vpop.xlane.xlu2 %1164  ;;  %v1017_v1 = vmul.f32 %v3530_v23, %v4694_v21  ;;  %v4824_v50 = vpop.eup %3531  ;;  %v3385_v23 = vunpack.i.l.bf16 %v4584_v16 }
 0x576   :  { %v3534_v49 = vpop.eup %3533  ;;  %v2007_v40 = vsel %vm415_vm6, %v4824_v50, 0.0 }
 0x577   :  { %3193 = vmatmul.msk.f32.gmra.mxu3 %vm415_vm6, %v859_v41  ;;  %3205 = vmatmul.msk.f32.gmra.mxu1 %vm415_vm6, %v1017_v1  ;;  %v1018_v10 = vmul.f32 %v3534_v49, %v4647_v6  ;;  %v4833_v26 = vpop.eup %3535 }
 0x578   :  { %v3538_v53 = vpop.eup %3537  ;;  %v2013_v6 = vsel %vm415_vm6, %v4833_v26, 0.0 }
 0x579   :  { %v1331_v2 = vmul.f32 %v3538_v53, %v4692_v34 }
 0x57c   :  { %v1323_v25 = vpop.xlane.xlu1 %1322 }
 0x57d   :  { %2008 = vadd.xlane.f32.xlu1 %v2007_v40  ;;  %v852_v21 = vpop.xlane.xlu2 %851 }
 0x57e   :  { %3539 = vrcp.f32 %v852_v21 }
 0x57f   :  { %3206 = vmatmul.msk.f32.gmra.mxu1 %vm415_vm6, %v1018_v10  ;;  %3541 = vpow2.f32 %v1842_v51 }
 0x580   :  { %3543 = vpow2.f32 %v2000_v11 }
 0x581   :  { %3545 = vrcp.f32 %v4781_v28 }
 0x582   :  { %3547 = vrcp.f32 %v1320_v22 }
 0x583   :  { %3549 = vpow2.f32 %v1844_v35  ;;  %v1326_v58 = vpop.xlane.xlu0 %1325 }
 0x584   :  { %v3540_v60 = vpop.eup %3539  ;;  %3551 = vrcp.f32 %v4791_v5 }
 0x585   :  { %2014 = vadd.xlane.f32.xlu1 %v2013_v6  ;;  %v1532_v33 = vpop.xlane.xlu2 %1531  ;;  %v860_v45 = vmul.f32 %v3540_v60, %v4715_v59  ;;  %v4840_v7 = vpop.eup %3541  ;;  %3553 = vrcp.f32 %v1323_v25 }
 0x586   :  { %v4844_v57 = vpop.eup %3543  ;;  %v1852_v28 = vsel %vm415_vm6, %v4840_v7, 0.0  ;;  %3555 = vrcp.f32 %v4816_v63 }
 0x587   :  { %3194 = vmatmul.msk.f32.gmra.mxu3 %vm415_vm6, %v860_v45  ;;  %3227 = vmatmul.msk.f32.vlgmr.msrb.gmra.mxu1 %vm415_vm6, %v1331_v2  ;;  %v3546_v32 = vpop.eup %3545  ;;  %v2010_v41 = vsel %vm415_vm6, %v4844_v57, 0.0  ;;  %3557 = vrcp.f32 %v1326_v58 }
 0x588   :  { %v3548_v34 = vpop.eup %3547  ;;  %v1173_v59 = vmul.f32 %v3546_v32, %v4645_v27  ;;  %3559 = vrcp.f32 %v4810_v18 }
 0x589   :  { %v4850_v12 = vpop.eup %3549  ;;  %v1332_v1 = vmul.f32 %v3548_v34, %v4703_v37  ;;  %3561 = vrcp.f32 %v1532_v33 }
 0x58a   :  { %1853 = vadd.xlane.f32.xlu2 %v1852_v28  ;;  %v1855_v27 = vsel %vm415_vm6, %v4850_v12, 0.0  ;;  %v3552_v5 = vpop.eup %3551 }
 0x58b   :  { %v3554_v39 = vpop.eup %3553  ;;  %v1174_v49 = vmul.f32 %v3552_v5, %v4661_v3 }
 0x58c   :  { %v1333_v8 = vmul.f32 %v3554_v39, %v4713_v52  ;;  %v3556_v16 = vpop.eup %3555 }
 0x58d   :  { %v1535_v20 = vpop.xlane.xlu2 %1534  ;;  %v3558_v51 = vpop.eup %3557  ;;  %v1175_v21 = vmul.f32 %v3556_v16, %v4705_v15 }
 0x58e   :  { %v1334_v10 = vmul.f32 %v3558_v51, %v4724_v9  ;;  %v3560_v3 = vpop.eup %3559 }
 0x58f   :  { %2011 = vadd.xlane.f32.xlu0 %v2010_v41  ;;  %3215 = vmatmul.msk.f32.vlgmr.msra.gmra.mxu3 %vm415_vm6, %v1173_v59  ;;  %v1176_v63 = vmul.f32 %v3560_v3, %v4681_v38  ;;  %v3562_v11 = vpop.eup %3561 }
 0x590   :  { %3228 = vmatmul.msk.f32.gmra.mxu1 %vm415_vm6, %v1332_v1  ;;  %1902 = vmatpush.msra.mxu3 %v3385_v23  ;;  %v1546_v15 = vmul.f32 %v3562_v11, %v4722_v46 }
 0x592   :  { %1856 = vadd.xlane.f32.xlu2 %v1855_v27  ;;  %1903 = vmatpush.msra.mxu3 %v3386_v62 }
 0x595   :  { %v1538_v37 = vpop.xlane.xlu2 %1537 }
 0x597   :  { %3216 = vmatmul.msk.f32.gmra.mxu3 %vm415_vm6, %v1174_v49 }
 0x598   :  { %3229 = vmatmul.msk.f32.gmra.mxu1 %vm415_vm6, %v1333_v8 }
 0x59d   :  { %v1541_v40 = vpop.xlane.xlu2 %1540 }
 0x59f   :  { %3217 = vmatmul.msk.f32.gmra.mxu3 %vm415_vm6, %v1175_v21 }
 0x5a0   :  { %3230 = vmatmul.msk.f32.gmra.mxu1 %vm415_vm6, %v1334_v10 }
 0x5a5   :  { %v1690_v52 = vpop.xlane.xlu2 %1689 }
 0x5a6   :  { %3563 = vrcp.f32 %v1690_v52 }
 0x5a7   :  { %3218 = vmatmul.msk.f32.gmra.mxu3 %vm415_vm6, %v1176_v63  ;;  %3565 = vrcp.f32 %v1535_v20 }
 0x5ac   :  { %v3564_v29 = vpop.eup %3563  ;;  %v1851_v18 = vpop.xlane.xlu0 %1850 }
 0x5ad   :  { %v1704_v9 = vmul.f32 %v3564_v29, %v4748_v55  ;;  %v1693_v22 = vpop.xlane.xlu1 %1692  ;;  %v3566_v53 = vpop.eup %3565 }
 0x5ae   :  { %3567 = vrcp.f32 %v1693_v22  ;;  %v1848_v38 = vpop.xlane.xlu2 %1847  ;;  %v1547_v6 = vmul.f32 %v3566_v53, %v4731_v13 }
 0x5af   :  { %3239 = vmatmul.msk.f32.vlgmr.msrb.gmra.mxu3 %vm415_vm6, %v1546_v15  ;;  %3251 = vmatmul.msk.f32.vlgmr.msra.gmra.mxu1 %vm415_vm6, %v1704_v9  ;;  %3569 = vrcp.f32 %v1538_v37 }
 0x5b4   :  { %v3568_v60 = vpop.eup %3567  ;;  %v1696_v35 = vpop.xlane.xlu0 %1695 }
 0x5b5   :  { %v1705_v2 = vmul.f32 %v3568_v60, %v4759_v19  ;;  %3571 = vrcp.f32 %v1696_v35  ;;  %v3570_v46 = vpop.eup %3569 }
 0x5b6   :  { %3573 = vrcp.f32 %v1541_v40  ;;  %v1548_v45 = vmul.f32 %v3570_v46, %v4736_v56 }
 0x5b7   :  { %3240 = vmatmul.msk.f32.gmra.mxu3 %vm415_vm6, %v1547_v6  ;;  %3252 = vmatmul.msk.f32.gmra.mxu1 %vm415_vm6, %v1705_v2 }
 0x5bb   :  { %v3572_v55 = vpop.eup %3571 }
 0x5bc   :  { %v1699_v33 = vpop.xlane.xlu2 %1698  ;;  %v1706_v28 = vmul.f32 %v3572_v55, %v4770_v47  ;;  %v3574_v13 = vpop.eup %3573 }
 0x5bd   :  { %3575 = vrcp.f32 %v1699_v33  ;;  %v1549_v59 = vmul.f32 %v3574_v13, %v4741_v43 }
 0x5be   :  { %3577 = vrcp.f32 %v1848_v38 }
 0x5bf   :  { %3241 = vmatmul.msk.f32.gmra.mxu3 %vm415_vm6, %v1548_v45  ;;  %3253 = vmatmul.msk.f32.gmra.mxu1 %vm415_vm6, %v1706_v28  ;;  %3579 = vrcp.f32 %v1851_v18 }
 0x5c3   :  { %v3576_v19 = vpop.eup %3575 }
 0x5c4   :  { %v3394_v32 = vpop.permute.xlu2 %3393  ;;  %v1707_v23 = vmul.f32 %v3576_v19, %v4777_v24  ;;  %v3578_v47 = vpop.eup %3577 }
 0x5c5   :  { %v3395_v25 = vunpack.i.l.bf16 %v3394_v32  ;;  %v3389_v34 = vpop.permute.xlu1 %3388  ;;  %v3396_v41 = vunpack.i.h.bf16 %v3394_v32  ;;  %v1862_v1 = vmul.f32 %v3578_v47, %v4755_v30  ;;  %v2006_v62 = vpop.xlane.xlu0 %2005  ;;  %v2137_v47 = vld [vmem:[%s5475_s1 + $0x50] sm:$0xff] }
 0x5c6   :  { %v3390_v20 = vunpack.i.l.bf16 %v3389_v34  ;;  %v3391_v56 = vunpack.i.h.bf16 %v3389_v34  ;;  %v3580_v43 = vpop.eup %3579  ;;  %3581 = vrcp.f32 %v2006_v62 }
 0x5c7   :  { %2060 = vmatpush.msrb.mxu1 %v3395_v25  ;;  %3242 = vmatmul.msk.f32.gmra.mxu3 %vm415_vm6, %v1549_v59  ;;  %v1863_v27 = vmul.f32 %v3580_v43, %v4757_v14  ;;  %v2140_v59 = vld [vmem:[%s5475_s1 + $0x68] sm:$0xff] }
 0x5c8   :  { %1904 = vmatpush.msra.mxu3 %v3390_v20  ;;  %3254 = vmatmul.msk.f32.gmra.mxu1 %vm415_vm6, %v1707_v23 }
 0x5c9   :  { %2061 = vmatpush.msrb.mxu1 %v3396_v41  ;;  %2179 = vmatpush.msra.mxu2 %v2140_v59  ;;  %v2139_v41 = vld [vmem:[%s5475_s1 + $0x60] sm:$0xff] }
 0x5ca   :  { %1905 = vmatpush.msra.mxu3 %v3391_v56  ;;  %v2138_v56 = vld [vmem:[%s5475_s1 + $0x58] sm:$0xff] }
 0x5cb   :  { %2180 = vmatpush.msra.mxu2 %v2139_v41 }
 0x5cc   :  { %v3582_v58 = vpop.eup %3581 }
 0x5cd   :  { %v2020_v30 = vmul.f32 %v3582_v58, %v4783_v54  ;;  %2181 = vmatpush.msra.mxu2 %v2138_v56 }
 0x5cf   :  { %3263 = vmatmul.msk.f32.vlgmr.msra.gmra.mxu3 %vm415_vm6, %v1862_v1  ;;  %2182 = vmatpush.msra.mxu2 %v2137_v47 }
 0x5d4   :  { %v1060_v24 = vpop.f32.mrf.mxu1 }
 0x5d5   :  { %1392 = vrot.lane.b32.xlu2 %v1060_v24, %s3695_s13 }
 0x5d7   :  { %v3399_v5 = vpop.permute.xlu0 %3398  ;;  %3264 = vmatmul.msk.f32.gmra.mxu3 %vm415_vm6, %v1863_v27 }
 0x5d8   :  { %v3400_v39 = vunpack.i.l.bf16 %v3399_v5  ;;  %v3401_v37 = vunpack.i.h.bf16 %v3399_v5 }
 0x5da   :  { %2062 = vmatpush.msrb.mxu1 %v3400_v39 }
 0x5dc   :  { %2063 = vmatpush.msrb.mxu1 %v3401_v37 }
 0x5dd   :  { %3275 = vmatmul.msk.f32.vlgmr.msrb.gmra.mxu1 %vm415_vm6, %v2020_v30 }
 0x5e2   :  { %v4897_v8 = vpop.f32.mrf.mxu3 }
 0x5e4   :  { %v1063_v49 = vpop.f32.mrf.mxu1 }
 0x5e5   :  { %1394 = vrot.lane.b32.xlu2 %v1063_v49, %s3695_s13 }
 0x5f0   :  { %v2009_v14 = vpop.xlane.xlu1 %2008 }
 0x5f1   :  { %3583 = vrcp.f32 %v2009_v14 }
 0x5f2   :  { %v4900_v40 = vpop.f32.mrf.mxu3 }
 0x5f4   :  { %v1066_v16 = vpop.f32.mrf.mxu1 }
 0x5f5   :  { %1396 = vrot.lane.b32.xlu2 %v1066_v16, %s3695_s13 }
 0x5f7   :  { %v3584_v51 = vpop.eup %3583 }
 0x5f8   :  { %v2021_v21 = vmul.f32 %v3584_v51, %v4824_v50  ;;  %v2015_v50 = vpop.xlane.xlu1 %2014 }
 0x5fa   :  { %3276 = vmatmul.msk.f32.gmra.mxu1 %vm415_vm6, %v2021_v21  ;;  %v4905_v3 = vpop.f32.mrf.mxu3 }
 0x5fc   :  { %v1069_v54 = vpop.f32.mrf.mxu1 }
 0x5fd   :  { %v1854_v10 = vpop.xlane.xlu2 %1853  ;;  %1398 = vrot.lane.b32.xlu2 %v1069_v54, %s3695_s13 }
 0x5fe   :  { %3585 = vrcp.f32 %v1854_v10 }
 0x602   :  { %v2012_v52 = vpop.xlane.xlu0 %2011 }
 0x603   :  { %3587 = vrcp.f32 %v2012_v52 }
 0x604   :  { %v3586_v63 = vpop.eup %3585  ;;  %v1376_v11 = vpop.f32.mrf.mxu1 }
 0x605   :  { %v1857_v29 = vpop.xlane.xlu2 %1856  ;;  %1424 = vrot.lane.b32.xlu0 %v1376_v11, %s3696_s14  ;;  %v1864_v18 = vmul.f32 %v3586_v63, %v4840_v7 }
 0x606   :  { %3589 = vrcp.f32 %v1857_v29 }
 0x607   :  { %3265 = vmatmul.msk.f32.gmra.mxu3 %vm415_vm6, %v1864_v18  ;;  %3591 = vrcp.f32 %v2015_v50 }
 0x609   :  { %v3588_v15 = vpop.eup %3587 }
 0x60a   :  { %v4910_v9 = vpop.f32.mrf.mxu3  ;;  %v2022_v22 = vmul.f32 %v3588_v15, %v4844_v57 }
 0x60c   :  { %v3590_v53 = vpop.eup %3589  ;;  %3277 = vmatmul.msk.f32.gmra.mxu1 %vm415_vm6, %v2022_v22 }
 0x60d   :  { %v1379_v60 = vpop.f32.mrf.mxu1  ;;  %v1865_v38 = vmul.f32 %v3590_v53, %v4850_v12  ;;  %v3592_v35 = vpop.eup %3591 }
 0x60e   :  { %1426 = vrot.lane.b32.xlu0 %v1379_v60, %s3696_s14  ;;  %v2023_v6 = vmul.f32 %v3592_v35, %v4833_v26 }
 0x60f   :  { %3266 = vmatmul.msk.f32.gmra.mxu3 %vm415_vm6, %v1865_v38 }
 0x612   :  { %v1218_v7 = vpop.f32.mrf.mxu3 }
 0x613   :  { %1408 = vrot.lane.b32.xlu1 %v1218_v7, %s3697_s15 }
 0x614   :  { %3278 = vmatmul.msk.f32.gmra.mxu1 %vm415_vm6, %v2023_v6 }
 0x615   :  { %v1382_v57 = vpop.f32.mrf.mxu1 }
 0x616   :  { %1428 = vrot.lane.b32.xlu0 %v1382_v57, %s3696_s14 }
 0x61a   :  { %v1221_v2 = vpop.f32.mrf.mxu3 }
 0x61b   :  { %1410 = vrot.lane.b32.xlu1 %v1221_v2, %s3697_s15 }
 0x61d   :  { %v1385_v12 = vpop.f32.mrf.mxu1 }
 0x61e   :  { %1430 = vrot.lane.b32.xlu0 %v1385_v12, %s3696_s14 }
 0x622   :  { %v1224_v46 = vpop.f32.mrf.mxu3 }
 0x623   :  { %1412 = vrot.lane.b32.xlu1 %v1224_v46, %s3697_s15 }
 0x62a   :  { %v1227_v55 = vpop.f32.mrf.mxu3 }
 0x62b   :  { %1414 = vrot.lane.b32.xlu1 %v1227_v55, %s3697_s15 }
 0x62c   :  { %v1749_v26 = vpop.f32.mrf.mxu1 }
 0x62d   :  { %2081 = vrot.lane.b32.xlu2 %v1749_v26, %s3695_s13 }
 0x62f   :  { %v1393_v62 = vpop.permute.xlu2 %1392 }
 0x630   :  { %v1436_v24 = vsel %vm771_vm10, %v4897_v8, %v1393_v62 }
 0x632   :  { %v4926_v33 = vpop.f32.mrf.mxu3 }
 0x634   :  { %v1752_v45 = vpop.f32.mrf.mxu1 }
 0x635   :  { %2083 = vrot.lane.b32.xlu2 %v1752_v45, %s3695_s13 }
 0x63a   :  { %v4929_v28 = vpop.f32.mrf.mxu3 }
 0x63c   :  { %v1755_v13 = vpop.f32.mrf.mxu1 }
 0x63d   :  { %2085 = vrot.lane.b32.xlu2 %v1755_v13, %s3695_s13 }
 0x63f   :  { %v1395_v39 = vpop.permute.xlu2 %1394 }
 0x640   :  { %v1437_v14 = vsel %vm771_vm10, %v4900_v40, %v1395_v39 }
 0x642   :  { %v4932_v19 = vpop.f32.mrf.mxu3 }
 0x645   :  { %v1758_v32 = vpop.f32.mrf.mxu1 }
 0x646   :  { %2087 = vrot.lane.b32.xlu2 %v1758_v32, %s3695_s13 }
 0x64a   :  { %v4935_v25 = vpop.f32.mrf.mxu3 }
 0x64f   :  { %v1397_v21 = vpop.permute.xlu2 %1396 }
 0x650   :  { %v1438_v63 = vsel %vm771_vm10, %v4905_v3, %v1397_v21 }
 0x652   :  { %v1907_v34 = vpop.f32.mrf.mxu3 }
 0x653   :  { %2097 = vrot.lane.b32.xlu1 %v1907_v34, %s3697_s15 }
 0x657   :  { %v1399_v18 = vpop.permute.xlu2 %1398 }
 0x658   :  { %v1439_v50 = vsel %vm771_vm10, %v4910_v9, %v1399_v18 }
 0x65a   :  { %v2065_v20 = vpop.f32.mrf.mxu1  ;;  %v1910_v23 = vpop.f32.mrf.mxu3 }
 0x65b   :  { %2113 = vrot.lane.b32.xlu0 %v2065_v20, %s3696_s14  ;;  %2099 = vrot.lane.b32.xlu1 %v1910_v23, %s3697_s15 }
 0x677   :  { %v2068_v1 = vpop.f32.mrf.mxu1  ;;  %v1425_v43 = vpop.permute.xlu0 %1424 }
 0x678   :  { %2115 = vrot.lane.b32.xlu0 %v2068_v1, %s3696_s14 }
 0x680   :  { %v1427_v30 = vpop.permute.xlu0 %1426 }
 0x685   :  { %v1409_v27 = vpop.permute.xlu1 %1408 }
 0x686   :  { %v1440_v5 = vsel %vm27_vm0, %v1436_v24, %v1409_v27 }
 0x687   :  { %v1445_v58 = vsel %vm1444_vm11, %v1440_v5, %v1425_v43  ;;  %v2082_v3 = vpop.permute.xlu2 %2081 }
 0x688   :  { %3279 = vmatmul.msk.f32.vlgmr.msra.gmra.mxu2 %vm415_vm6, %v1445_v58  ;;  %v1429_v52 = vpop.permute.xlu0 %1428  ;;  %v2125_v35 = vsel %vm771_vm10, %v4926_v33, %v2082_v3 }
 0x689   :  { %v2071_v37 = vpop.f32.mrf.mxu1 }
 0x68a   :  { %2117 = vrot.lane.b32.xlu0 %v2071_v37, %s3696_s14  ;;  %v1913_v49 = vpop.f32.mrf.mxu3 }
 0x68b   :  { %2101 = vrot.lane.b32.xlu1 %v1913_v49, %s3697_s15 }
 0x68d   :  { %v1411_v16 = vpop.permute.xlu1 %1410 }
 0x68e   :  { %v1441_v8 = vsel %vm27_vm0, %v1437_v14, %v1411_v16 }
 0x68f   :  { %v1446_v51 = vsel %vm1444_vm11, %v1441_v8, %v1427_v30  ;;  %v2084_v9 = vpop.permute.xlu2 %2083 }
 0x690   :  { %3280 = vmatmul.msk.f32.gmra.mxu2 %vm415_vm6, %v1446_v51  ;;  %v1431_v22 = vpop.permute.xlu0 %1430  ;;  %v2126_v12 = vsel %vm771_vm10, %v4929_v28, %v2084_v9 }
 0x691   :  { %v2074_v54 = vpop.f32.mrf.mxu1 }
 0x692   :  { %2119 = vrot.lane.b32.xlu0 %v2074_v54, %s3696_s14  ;;  %v1916_v10 = vpop.f32.mrf.mxu3 }
 0x693   :  { %2103 = vrot.lane.b32.xlu1 %v1916_v10, %s3697_s15  ;;  %s3698_s15 = smov [#allocation2]  }
 0x694   :  { %s3148_s16 = sshll.u32 %s3698_s15, 4  ;;  %s3149_s16 = int_to_ptr.vmem [resolvable:$true] %s3148_s16 }
 0x695   :  { %v1413_v11 = vpop.permute.xlu1 %1412 }
 0x696   :  { %v1442_v40 = vsel %vm27_vm0, %v1438_v63, %v1413_v11 }
 0x697   :  { %v1447_v29 = vsel %vm1444_vm11, %v1442_v40, %v1429_v52  ;;  %v2086_v33 = vpop.permute.xlu2 %2085 }
 0x698   :  { %3281 = vmatmul.msk.f32.gmra.mxu2 %vm415_vm6, %v1447_v29  ;;  %v2127_v13 = vsel %vm771_vm10, %v4932_v19, %v2086_v33  ;;  %v3407_v19 = vld [vmem:[%s5476_s2 + $0x5] ss:$0 sm:$0xff] }
 0x69d   :  { %v1415_v15 = vpop.permute.xlu1 %1414 }
 0x69e   :  { %v1443_v53 = vsel %vm27_vm0, %v1439_v50, %v1415_v15 }
 0x69f   :  { %v1448_v60 = vsel %vm1444_vm11, %v1443_v53, %v1431_v22 }
 0x6a0   :  { %3282 = vmatmul.msk.f32.gmra.mxu2 %vm415_vm6, %v1448_v60  ;;  %v2088_v28 = vpop.permute.xlu2 %2087 }
 0x6a1   :  { %v2128_v20 = vsel %vm771_vm10, %v4935_v25, %v2088_v28 }
 0x6c5   :  { %v2098_v38 = vpop.permute.xlu1 %2097 }
 0x6c6   :  { %v2129_v7 = vsel %vm27_vm0, %v2125_v35, %v2098_v38 }
 0x6cd   :  { %v2114_v6 = vpop.permute.xlu0 %2113  ;;  %v2100_v2 = vpop.permute.xlu1 %2099 }
 0x6ce   :  { %v2133_v57 = vsel %vm1444_vm11, %v2129_v7, %v2114_v6  ;;  %v2130_v46 = vsel %vm27_vm0, %v2126_v12, %v2100_v2 }
 0x6cf   :  { %3283 = vmatmul.msk.f32.gmra.mxu2 %vm415_vm6, %v2133_v57 }
 0x6ea   :  { %v2116_v55 = vpop.permute.xlu0 %2115 }
 0x6eb   :  { %v2134_v26 = vsel %vm1444_vm11, %v2130_v46, %v2116_v55 }
 0x6ec   :  { %3284 = vmatmul.msk.f32.gmra.mxu2 %vm415_vm6, %v2134_v26 }
 0x6fc   :  { %v2118_v45 = vpop.permute.xlu0 %2117 }
 0x6fd   :  { %v2102_v32 = vpop.permute.xlu1 %2101 }
 0x6fe   :  { %v2131_v34 = vsel %vm27_vm0, %v2127_v13, %v2102_v32 }
 0x6ff   :  { %v2135_v59 = vsel %vm1444_vm11, %v2131_v34, %v2118_v45 }
 0x700   :  { %3285 = vmatmul.msk.f32.gmra.mxu2 %vm415_vm6, %v2135_v59 }
 0x704   :  { %v2120_v41 = vpop.permute.xlu0 %2119 }
 0x705   :  { %v2104_v23 = vpop.permute.xlu1 %2103 }
 0x706   :  { %v2132_v56 = vsel %vm27_vm0, %v2128_v20, %v2104_v23 }
 0x707   :  { %v2136_v47 = vsel %vm1444_vm11, %v2132_v56, %v2120_v41 }
 0x708   :  { %3286 = vmatmul.msk.f32.gmra.mxu2 %vm415_vm6, %v2136_v47 }
 0x70b   :  { %v2184_v1 = vpop.f32.mrf.mxu2 }
 0x70c   :  { %v2185_v62 = vadd.f32 %v3407_v19, %v2184_v1 }
 0x70e   :  { %v2208_v43 = vadd.f32 %v2185_v62, %v4134_v0  ;;  %v2415_v62 = vld [vmem:[%s5475_s1 + $0x88] sm:$0xff] }
 0x70f   :  { %2454 = vmatpush.msrb.mxu3 %v2415_v62 }
 0x710   :  { %v2218_v24 = vsel %vm415_vm6, %v2208_v43, 0.0 }
 0x711   :  { %2219 = vadd.xlane.f32.xlu2 %v2218_v24 }
 0x713   :  { %v2187_v25 = vpop.f32.mrf.mxu2 }
 0x714   :  { %v2188_v27 = vadd.f32 %v3407_v19, %v2187_v25  ;;  %v2414_v25 = vld [vmem:[%s5475_s1 + $0x80] sm:$0xff] }
 0x715   :  { %2455 = vmatpush.msrb.mxu3 %v2414_v25 }
 0x716   :  { %v2209_v5 = vadd.f32 %v2188_v27, %v4139_v17 }
 0x718   :  { %v2221_v58 = vsel %vm415_vm6, %v2209_v5, 0.0 }
 0x719   :  { %2222 = vadd.xlane.f32.xlu1 %v2221_v58  ;;  %v2413_v58 = vld [vmem:[%s5475_s1 + $0x78] sm:$0xff] }
 0x71a   :  { %2456 = vmatpush.msrb.mxu3 %v2413_v58 }
 0x71b   :  { %v2190_v39 = vpop.f32.mrf.mxu2 }
 0x71c   :  { %v2191_v37 = vadd.f32 %v3407_v19, %v2190_v39 }
 0x71e   :  { %v2210_v30 = vadd.f32 %v2191_v37, %v4148_v36 }
 0x720   :  { %v2224_v49 = vsel %vm415_vm6, %v2210_v30, 0.0 }
 0x721   :  { %2225 = vadd.xlane.f32.xlu0 %v2224_v49 }
 0x723   :  { %v2193_v14 = vpop.f32.mrf.mxu2 }
 0x724   :  { %v2194_v16 = vadd.f32 %v3407_v19, %v2193_v14 }
 0x726   :  { %v2211_v0 = vadd.f32 %v2194_v16, %v4157_v61 }
 0x728   :  { %v2227_v8 = vsel %vm415_vm6, %v2211_v0, 0.0 }
 0x729   :  { %2228 = vadd.xlane.f32.xlu2 %v2227_v8 }
 0x752   :  { %v2196_v51 = vpop.f32.mrf.mxu2 }
 0x753   :  { %v2197_v21 = vadd.f32 %v3407_v19, %v2196_v51 }
 0x755   :  { %v2212_v17 = vadd.f32 %v2197_v21, %v4165_v31 }
 0x757   :  { %v2230_v54 = vsel %vm415_vm6, %v2212_v17, 0.0 }
 0x758   :  { %2231 = vadd.xlane.f32.xlu1 %v2230_v54 }
 0x76f   :  { %v2199_v10 = vpop.f32.mrf.mxu2 }
 0x770   :  { %v2200_v52 = vadd.f32 %v3407_v19, %v2199_v10 }
 0x772   :  { %v2213_v36 = vadd.f32 %v2200_v52, %v4185_v48 }
 0x774   :  { %v2233_v63 = vsel %vm415_vm6, %v2213_v36, 0.0 }
 0x775   :  { %2234 = vadd.xlane.f32.xlu0 %v2233_v63 }
 0x783   :  { %v2202_v11 = vpop.f32.mrf.mxu2 }
 0x784   :  { %v2203_v40 = vadd.f32 %v3407_v19, %v2202_v11  ;;  %v2220_v61 = vpop.xlane.xlu2 %2219 }
 0x785   :  { %v2242_v29 = vmul.f32 %v2220_v61, %v3996_v4 }
 0x786   :  { %v2214_v18 = vadd.f32 %v2203_v40, %v4199_v42 }
 0x787   :  { %v5014_v50 = vsub.f32 %v2208_v43, %v2242_v29 }
 0x788   :  { %v2236_v31 = vsel %vm415_vm6, %v2214_v18, 0.0 }
 0x789   :  { %2237 = vadd.xlane.f32.xlu1 %v2236_v31  ;;  %v2258_v15 = vmul.f32 %v5014_v50, %v5014_v50 }
 0x78b   :  { %v2205_v22 = vpop.f32.mrf.mxu2  ;;  %v2266_v48 = vsel %vm415_vm6, %v2258_v15, 0.0  ;;  %v5082_v15 = vld [vmem:[%s5476_s2 + $0x6] ss:$0 sm:$0xff] }
 0x78c   :  { %v2206_v53 = vadd.f32 %v3407_v19, %v2205_v22  ;;  %2267 = vadd.xlane.f32.xlu2 %v2266_v48  ;;  %v2223_v60 = vpop.xlane.xlu1 %2222 }
 0x78d   :  { %v2243_v3 = vmul.f32 %v2223_v60, %v3996_v4  ;;  %v5088_v60 = vld [vmem:[%s5476_s2 + $0x7] ss:$0 sm:$0xff] }
 0x78e   :  { %v2215_v38 = vadd.f32 %v2206_v53, %v4210_v44 }
 0x78f   :  { %v5022_v35 = vsub.f32 %v2209_v5, %v2243_v3 }
 0x790   :  { %v2239_v7 = vsel %vm415_vm6, %v2215_v38, 0.0 }
 0x791   :  { %v2259_v42 = vmul.f32 %v5022_v35, %v5022_v35 }
 0x793   :  { %v2269_v6 = vsel %vm415_vm6, %v2259_v42, 0.0 }
 0x794   :  { %v2226_v57 = vpop.xlane.xlu0 %2225  ;;  %2240 = vadd.xlane.f32.xlu2 %v2239_v7  ;;  %2270 = vadd.xlane.f32.xlu0 %v2269_v6 }
 0x795   :  { %v2244_v9 = vmul.f32 %v2226_v57, %v3996_v4 }
 0x797   :  { %v5029_v2 = vsub.f32 %v2210_v30, %v2244_v9  ;;  %v2412_v30 = vld [vmem:[%s5475_s1 + $0x70] sm:$0xff] }
 0x798   :  { %2457 = vmatpush.msrb.mxu3 %v2412_v30 }
 0x799   :  { %v2260_v12 = vmul.f32 %v5029_v2, %v5029_v2 }
 0x79b   :  { %v2272_v44 = vsel %vm415_vm6, %v2260_v12, 0.0 }
 0x79c   :  { %v2229_v46 = vpop.xlane.xlu2 %2228  ;;  %2273 = vadd.xlane.f32.xlu1 %v2272_v44 }
 0x79d   :  { %v2245_v55 = vmul.f32 %v2229_v46, %v3996_v4 }
 0x79f   :  { %v5035_v26 = vsub.f32 %v2211_v0, %v2245_v55 }
 0x7a1   :  { %v2261_v33 = vmul.f32 %v5035_v26, %v5035_v26 }
 0x7a3   :  { %v2275_v45 = vsel %vm415_vm6, %v2261_v33, 0.0 }
 0x7a4   :  { %2276 = vadd.xlane.f32.xlu0 %v2275_v45 }
 0x7cb   :  { %v2232_v13 = vpop.xlane.xlu1 %2231 }
 0x7cc   :  { %v2246_v32 = vmul.f32 %v2232_v13, %v3996_v4 }
 0x7ce   :  { %v5041_v34 = vsub.f32 %v2212_v17, %v2246_v32 }
 0x7d0   :  { %v2262_v59 = vmul.f32 %v5041_v34, %v5041_v34 }
 0x7d2   :  { %v2278_v28 = vsel %vm415_vm6, %v2262_v59, 0.0 }
 0x7d3   :  { %2279 = vadd.xlane.f32.xlu2 %v2278_v28 }
 0x7e8   :  { %v2235_v20 = vpop.xlane.xlu0 %2234 }
 0x7e9   :  { %v2247_v23 = vmul.f32 %v2235_v20, %v3996_v4 }
 0x7eb   :  { %v5047_v41 = vsub.f32 %v2213_v36, %v2247_v23 }
 0x7ed   :  { %v2263_v56 = vmul.f32 %v5047_v41, %v5047_v41 }
 0x7ef   :  { %v2281_v47 = vsel %vm415_vm6, %v2263_v56, 0.0 }
 0x7f0   :  { %2282 = vadd.xlane.f32.xlu1 %v2281_v47 }
 0x7fc   :  { %v2238_v19 = vpop.xlane.xlu1 %2237 }
 0x7fd   :  { %v2248_v1 = vmul.f32 %v2238_v19, %v3996_v4 }
 0x7ff   :  { %v5056_v43 = vsub.f32 %v2214_v18, %v2248_v1  ;;  %v2268_v24 = vpop.xlane.xlu2 %2267 }
 0x800   :  { %v2290_v27 = vmul.f32 %v2268_v24, %v3996_v4 }
 0x801   :  { %v2264_v5 = vmul.f32 %v5056_v43, %v5056_v43 }
 0x802   :  { %v2298_v39 = vadd.f32 1e-05, %v2290_v27 }
 0x803   :  { %v2284_v37 = vsel %vm415_vm6, %v2264_v5, 0.0 }
 0x804   :  { %3593 = vrsqrt.f32 %v2298_v39  ;;  %2285 = vadd.xlane.f32.xlu0 %v2284_v37  ;;  %vm2312_vm12 = vweird.f32 %v2298_v39 }
 0x807   :  { %v2241_v49 = vpop.xlane.xlu2 %2240  ;;  %v2271_v14 = vpop.xlane.xlu0 %2270 }
 0x808   :  { %v2249_v16 = vmul.f32 %v2241_v49, %v3996_v4  ;;  %v2291_v0 = vmul.f32 %v2271_v14, %v3996_v4 }
 0x80a   :  { %v3594_v8 = vpop.eup %3593  ;;  %v5073_v51 = vsub.f32 %v2215_v38, %v2249_v16  ;;  %v2299_v21 = vadd.f32 1e-05, %v2291_v0 }
 0x80b   :  { %v2307_v17 = vmul.f32 %v3594_v8, %v2298_v39  ;;  %vm2313_vm0 = vweird.f32 %v3594_v8 }
 0x80c   :  { %3595 = vrsqrt.f32 %v2299_v21  ;;  %v2265_v54 = vmul.f32 %v5073_v51, %v5073_v51  ;;  %vm2314_vm13 = vmor %vm2312_vm12, %vm2313_vm0  ;;  %vm2322_vm15 = vweird.f32 %v2299_v21 }
 0x80d   :  { %v2308_v10 = vmul.f32 %v3594_v8, %v2307_v17 }
 0x80e   :  { %v2287_v52 = vsel %vm415_vm6, %v2265_v54, 0.0 }
 0x80f   :  { %v2309_v36 = vmul.f32 0.5, %v2308_v10  ;;  %2288 = vadd.xlane.f32.xlu2 %v2287_v52  ;;  %v2274_v63 = vpop.xlane.xlu1 %2273 }
 0x810   :  { %v2292_v11 = vmul.f32 %v2274_v63, %v3996_v4 }
 0x811   :  { %v2310_v40 = vsub.f32 1.5, %v2309_v36 }
 0x812   :  { %v3596_v61 = vpop.eup %3595  ;;  %v2300_v29 = vadd.f32 1e-05, %v2292_v11 }
 0x813   :  { %v2311_v18 = vmul.f32 %v3594_v8, %v2310_v40  ;;  %v2317_v31 = vmul.f32 %v3596_v61, %v2299_v21  ;;  %vm2323_vm14 = vweird.f32 %v3596_v61 }
 0x814   :  { %3597 = vrsqrt.f32 %v2300_v29  ;;  %vm2324_vm1 = vmor %vm2322_vm15, %vm2323_vm14  ;;  %vm2332_vm3 = vweird.f32 %v2300_v29 }
 0x815   :  { %v2315_v22 = vsel %vm2314_vm13, %v3594_v8, %v2311_v18  ;;  %v2318_v48 = vmul.f32 %v3596_v61, %v2317_v31 }
 0x816   :  { %v2386_v53 = vmul.f32 %v2315_v22, %v5014_v50 }
 0x817   :  { %v2319_v3 = vmul.f32 0.5, %v2318_v48  ;;  %v2277_v38 = vpop.xlane.xlu0 %2276 }
 0x818   :  { %v2395_v42 = vmul.f32 %v5082_v15, %v2386_v53  ;;  %v2293_v7 = vmul.f32 %v2277_v38, %v3996_v4 }
 0x819   :  { %v2320_v6 = vsub.f32 1.5, %v2319_v3 }
 0x81a   :  { %v3598_v57 = vpop.eup %3597  ;;  %v2301_v9 = vadd.f32 1e-05, %v2293_v7  ;;  %v5093_v12 = vadd.f32 %v5088_v60, %v2395_v42 }
 0x81b   :  { %v2321_v44 = vmul.f32 %v3596_v61, %v2320_v6  ;;  %v2327_v50 = vmul.f32 %v3598_v57, %v2300_v29  ;;  %vm2333_vm2 = vweird.f32 %v3598_v57 }
 0x81c   :  { %3599 = vrsqrt.f32 %v2301_v9  ;;  %3287 = vmatmul.msk.f32.vlgmr.msrb.gmra.mxu3 %vm415_vm6, %v5093_v12  ;;  %vm2334_vm4 = vmor %vm2332_vm3, %vm2333_vm2  ;;  %vm2342_vm7 = vweird.f32 %v2301_v9 }
 0x81d   :  { %v2325_v46 = vsel %vm2324_vm1, %v3596_v61, %v2321_v44  ;;  %v2328_v55 = vmul.f32 %v3598_v57, %v2327_v50 }
 0x81e   :  { %v2387_v33 = vmul.f32 %v2325_v46, %v5022_v35 }
 0x81f   :  { %v2329_v45 = vmul.f32 0.5, %v2328_v55 }
 0x820   :  { %v2396_v13 = vmul.f32 %v5082_v15, %v2387_v33 }
 0x821   :  { %v2330_v32 = vsub.f32 1.5, %v2329_v45 }
 0x822   :  { %v3600_v59 = vpop.eup %3599  ;;  %v5100_v28 = vadd.f32 %v5088_v60, %v2396_v13 }
 0x823   :  { %v2331_v20 = vmul.f32 %v3598_v57, %v2330_v32  ;;  %v2337_v23 = vmul.f32 %v3600_v59, %v2301_v9  ;;  %vm2343_vm5 = vweird.f32 %v3600_v59 }
 0x824   :  { %3288 = vmatmul.msk.f32.gmra.mxu3 %vm415_vm6, %v5100_v28  ;;  %vm2344_vm8 = vmor %vm2342_vm7, %vm2343_vm5 }
 0x825   :  { %v2335_v56 = vsel %vm2334_vm4, %v3598_v57, %v2331_v20  ;;  %v2338_v47 = vmul.f32 %v3600_v59, %v2337_v23 }
 0x826   :  { %v2388_v35 = vmul.f32 %v2335_v56, %v5029_v2 }
 0x827   :  { %v2339_v19 = vmul.f32 0.5, %v2338_v47 }
 0x828   :  { %v2397_v1 = vmul.f32 %v5082_v15, %v2388_v35 }
 0x829   :  { %v2340_v62 = vsub.f32 1.5, %v2339_v19 }
 0x82a   :  { %v5107_v24 = vadd.f32 %v5088_v60, %v2397_v1 }
 0x82b   :  { %v2341_v25 = vmul.f32 %v3600_v59, %v2340_v62  ;;  %v5148_v62 = vld [vmem:[%s5476_s2 + $0x8] ss:$0 sm:$0xff] }
 0x82c   :  { %3289 = vmatmul.msk.f32.gmra.mxu3 %vm415_vm6, %v5107_v24 }
 0x82d   :  { %v2345_v27 = vsel %vm2344_vm8, %v3600_v59, %v2341_v25 }
 0x82e   :  { %v2389_v5 = vmul.f32 %v2345_v27, %v5035_v26 }
 0x830   :  { %v2398_v58 = vmul.f32 %v5082_v15, %v2389_v5 }
 0x832   :  { %v5114_v2 = vadd.f32 %v5088_v60, %v2398_v58 }
 0x834   :  { %3290 = vmatmul.msk.f32.gmra.mxu3 %vm415_vm6, %v5114_v2 }
 0x846   :  { %v2280_v39 = vpop.xlane.xlu2 %2279 }
 0x847   :  { %v2294_v37 = vmul.f32 %v2280_v39, %v3996_v4 }
 0x849   :  { %v2302_v30 = vadd.f32 1e-05, %v2294_v37 }
 0x84b   :  { %3601 = vrsqrt.f32 %v2302_v30  ;;  %vm2352_vm10 = vweird.f32 %v2302_v30 }
 0x851   :  { %v3602_v49 = vpop.eup %3601 }
 0x852   :  { %v2347_v14 = vmul.f32 %v3602_v49, %v2302_v30  ;;  %vm2353_vm9 = vweird.f32 %v3602_v49 }
 0x853   :  { %vm2354_vm11 = vmor %vm2352_vm10, %vm2353_vm9 }
 0x854   :  { %v2348_v16 = vmul.f32 %v3602_v49, %v2347_v14 }
 0x856   :  { %v2349_v0 = vmul.f32 0.5, %v2348_v16 }
 0x858   :  { %v2350_v8 = vsub.f32 1.5, %v2349_v0 }
 0x85a   :  { %v2351_v26 = vmul.f32 %v3602_v49, %v2350_v8 }
 0x85c   :  { %v2355_v21 = vsel %vm2354_vm11, %v3602_v49, %v2351_v26 }
 0x85d   :  { %v2390_v17 = vmul.f32 %v2355_v21, %v5041_v34 }
 0x85f   :  { %v2399_v54 = vmul.f32 %v5082_v15, %v2390_v17  ;;  %v2810_v17 = vld [vmem:[%s5475_s1 + $0xc8] sm:$0xff] }
 0x860   :  { %2846 = vmatpush.msrb.mxu0 %v2810_v17 }
 0x861   :  { %v5122_v10 = vadd.f32 %v5088_v60, %v2399_v54 }
 0x863   :  { %v2283_v52 = vpop.xlane.xlu1 %2282  ;;  %3291 = vmatmul.msk.f32.gmra.mxu3 %vm415_vm6, %v5122_v10 }
 0x864   :  { %v2295_v36 = vmul.f32 %v2283_v52, %v3996_v4 }
 0x866   :  { %v2303_v63 = vadd.f32 1e-05, %v2295_v36  ;;  %v2809_v36 = vld [vmem:[%s5475_s1 + $0xc0] sm:$0xff] }
 0x867   :  { %2847 = vmatpush.msrb.mxu0 %v2809_v36 }
 0x868   :  { %3603 = vrsqrt.f32 %v2303_v63  ;;  %vm2362_vm12 = vweird.f32 %v2303_v63 }
 0x86e   :  { %v3604_v11 = vpop.eup %3603 }
 0x86f   :  { %v2357_v40 = vmul.f32 %v3604_v11, %v2303_v63  ;;  %vm2363_vm0 = vweird.f32 %v3604_v11 }
 0x870   :  { %vm2364_vm13 = vmor %vm2362_vm12, %vm2363_vm0 }
 0x871   :  { %v2358_v61 = vmul.f32 %v3604_v11, %v2357_v40 }
 0x873   :  { %v2359_v29 = vmul.f32 0.5, %v2358_v61 }
 0x875   :  { %v2360_v18 = vsub.f32 1.5, %v2359_v29  ;;  %v2808_v29 = vld [vmem:[%s5475_s1 + $0xb8] sm:$0xff] }
 0x876   :  { %2848 = vmatpush.msrb.mxu0 %v2808_v29 }
 0x877   :  { %v2361_v34 = vmul.f32 %v3604_v11, %v2360_v18  ;;  %v2286_v31 = vpop.xlane.xlu0 %2285 }
 0x878   :  { %v2296_v22 = vmul.f32 %v2286_v31, %v3996_v4 }
 0x879   :  { %v2365_v48 = vsel %vm2364_vm13, %v3604_v11, %v2361_v34 }
 0x87a   :  { %v2391_v53 = vmul.f32 %v2365_v48, %v5047_v41  ;;  %v2304_v3 = vadd.f32 1e-05, %v2296_v22  ;;  %v2807_v22 = vld [vmem:[%s5475_s1 + $0xb0] sm:$0xff] }
 0x87b   :  { %2849 = vmatpush.msrb.mxu0 %v2807_v22 }
 0x87c   :  { %3605 = vrsqrt.f32 %v2304_v3  ;;  %v2400_v38 = vmul.f32 %v5082_v15, %v2391_v53  ;;  %vm2372_vm15 = vweird.f32 %v2304_v3 }
 0x87e   :  { %v5131_v42 = vadd.f32 %v5088_v60, %v2400_v38 }
 0x880   :  { %3292 = vmatmul.msk.f32.gmra.mxu3 %vm415_vm6, %v5131_v42 }
 0x882   :  { %v3606_v7 = vpop.eup %3605  ;;  %v2289_v6 = vpop.xlane.xlu2 %2288 }
 0x883   :  { %v2367_v57 = vmul.f32 %v3606_v7, %v2304_v3  ;;  %v2297_v9 = vmul.f32 %v2289_v6, %v3996_v4  ;;  %vm2373_vm14 = vweird.f32 %v3606_v7 }
 0x884   :  { %vm2374_vm1 = vmor %vm2372_vm15, %vm2373_vm14 }
 0x885   :  { %v2368_v44 = vmul.f32 %v3606_v7, %v2367_v57  ;;  %v2305_v50 = vadd.f32 1e-05, %v2297_v9  ;;  %v2806_v57 = vld [vmem:[%s5475_s1 + $0xa8] sm:$0xff] }
 0x886   :  { %2850 = vmatpush.msrb.mxu0 %v2806_v57 }
 0x887   :  { %v2369_v46 = vmul.f32 0.5, %v2368_v44  ;;  %3607 = vrsqrt.f32 %v2305_v50  ;;  %vm2382_vm3 = vweird.f32 %v2305_v50 }
 0x889   :  { %v2370_v41 = vsub.f32 1.5, %v2369_v46  ;;  %v2805_v46 = vld [vmem:[%s5475_s1 + $0xa0] sm:$0xff] }
 0x88a   :  { %2851 = vmatpush.msrb.mxu0 %v2805_v46 }
 0x88b   :  { %v2371_v55 = vmul.f32 %v3606_v7, %v2370_v41 }
 0x88d   :  { %v3608_v33 = vpop.eup %3607  ;;  %v2375_v45 = vsel %vm2374_vm1, %v3606_v7, %v2371_v55 }
 0x88e   :  { %v2392_v13 = vmul.f32 %v2375_v45, %v5056_v43  ;;  %v2377_v32 = vmul.f32 %v3608_v33, %v2305_v50  ;;  %vm2383_vm2 = vweird.f32 %v3608_v33 }
 0x88f   :  { %vm2384_vm4 = vmor %vm2382_vm3, %vm2383_vm2 }
 0x890   :  { %v2378_v59 = vmul.f32 %v3608_v33, %v2377_v32  ;;  %v2401_v20 = vmul.f32 %v5082_v15, %v2392_v13  ;;  %v2804_v32 = vld [vmem:[%s5475_s1 + $0x98] sm:$0xff] }
 0x891   :  { %2852 = vmatpush.msrb.mxu0 %v2804_v32 }
 0x892   :  { %v2379_v23 = vmul.f32 0.5, %v2378_v59  ;;  %v5139_v56 = vadd.f32 %v5088_v60, %v2401_v20 }
 0x894   :  { %v2380_v47 = vsub.f32 1.5, %v2379_v23  ;;  %3293 = vmatmul.msk.f32.gmra.mxu3 %vm415_vm6, %v5139_v56 }
 0x896   :  { %v2381_v35 = vmul.f32 %v3608_v33, %v2380_v47 }
 0x898   :  { %v2385_v19 = vsel %vm2384_vm4, %v3608_v33, %v2381_v35  ;;  %v2803_v35 = vld [vmem:[%s5475_s1 + $0x90] sm:$0xff] }
 0x899   :  { %v2393_v1 = vmul.f32 %v2385_v19, %v5073_v51  ;;  %2853 = vmatpush.msrb.mxu0 %v2803_v35 }
 0x89b   :  { %v2402_v43 = vmul.f32 %v5082_v15, %v2393_v1 }
 0x89d   :  { %v5151_v25 = vadd.f32 %v5088_v60, %v2402_v43 }
 0x89f   :  { %v2459_v27 = vpop.f32.mrf.mxu3  ;;  %3294 = vmatmul.msk.f32.gmra.mxu3 %vm415_vm6, %v5151_v25 }
 0x8a0   :  { %v5156_v5 = vadd.f32 %v5148_v62, %v2459_v27 }
 0x8a2   :  { %v5159_v58 = vmul.f32 0.70710677, %v5156_v5 }
 0x8a4   :  { %v2499_v51 = vand.u32 2147483647, %v5159_v58  ;;  %vm2763_vm4 = vcmp.ge.f32.partialorder %v5159_v58, 0.0 }
 0x8a6   :  { %v2507_v15 = vmul.f32 0.3275911, %v2499_v51  ;;  %v2715_v6 = vsub.f32 0.0, %v2499_v51 }
 0x8a7   :  { %v2462_v39 = vpop.f32.mrf.mxu3 }
 0x8a8   :  { %v2515_v37 = vadd.f32 1.0, %v2507_v15  ;;  %v5163_v30 = vadd.f32 %v5148_v62, %v2462_v39  ;;  %v2723_v45 = vmul.f32 %v2715_v6, %v2499_v51 }
 0x8aa   :  { %3609 = vrcp.f32 %v2515_v37  ;;  %v5166_v60 = vmul.f32 0.70710677, %v5163_v30  ;;  %v2534_v63 = vand.u32 2147483648, %v2515_v37  ;;  %v2532_v61 = vand.u32 2147483647, %v2515_v37 }
 0x8ab   :  { %vm2528_vm7 = vweird.f32 %v2515_v37  ;;  %v2731_v39 = vmul.f32 1.442695, %v2723_v45 }
 0x8ac   :  { %v5169_v49 = vand.u32 2147483647, %v5166_v60  ;;  %v2535_v48 = vor.u32 1.1754944e-38, %v2534_v63  ;;  %vm2533_vm9 = vcmp.eq.f32.partialorder %v2532_v61, 8.507059e+37 }
 0x8ae   :  { %v2508_v14 = vmul.f32 0.3275911, %v5169_v49  ;;  %v2716_v17 = vsub.f32 0.0, %v5169_v49 }
 0x8af   :  { %v2465_v16 = vpop.f32.mrf.mxu3 }
 0x8b0   :  { %v3610_v0 = vpop.eup %3609  ;;  %v5173_v8 = vadd.f32 %v5148_v62, %v2465_v16  ;;  %v5175_v21 = vadd.f32 1.0, %v2508_v14 }
 0x8b1   :  { %v2524_v26 = vmul.f32 %v3610_v0, %v2515_v37  ;;  %vm2529_vm5 = vweird.f32 %v3610_v0 }
 0x8b2   :  { %v5181_v54 = vmul.f32 0.70710677, %v5173_v8  ;;  %3611 = vrcp.f32 %v5175_v21  ;;  %vm2530_vm8 = vmor %vm2528_vm7, %vm2529_vm5  ;;  %v2549_v13 = vand.u32 2147483648, %v5175_v21  ;;  %v2547_v20 = vand.u32 2147483647, %v5175_v21 }
 0x8b3   :  { %v2525_v52 = vsub.f32 1.0, %v2524_v26  ;;  %vm2543_vm11 = vweird.f32 %v5175_v21 }
 0x8b4   :  { %v5188_v11 = vand.u32 2147483647, %v5181_v54  ;;  %v2550_v51 = vor.u32 1.1754944e-38, %v2549_v13  ;;  %vm2548_vm12 = vcmp.eq.f32.partialorder %v2547_v20, 8.507059e+37 }
 0x8b5   :  { %v2526_v40 = vmul.f32 %v3610_v0, %v2525_v52 }
 0x8b6   :  { %v2509_v18 = vmul.f32 0.3275911, %v5188_v11  ;;  %v2717_v6 = vsub.f32 0.0, %v5188_v11 }
 0x8b7   :  { %v2527_v34 = vadd.f32 %v3610_v0, %v2526_v40  ;;  %v2468_v31 = vpop.f32.mrf.mxu3 }
 0x8b8   :  { %v5197_v53 = vadd.f32 1.0, %v2509_v18  ;;  %v5200_v3 = vadd.f32 %v5148_v62, %v2468_v31  ;;  %v3612_v38 = vpop.eup %3611  ;;  %v2725_v32 = vmul.f32 %v2717_v6, %v5188_v11 }
 0x8b9   :  { %v2531_v7 = vsel %vm2530_vm8, %v3610_v0, %v2527_v34  ;;  %v2539_v44 = vmul.f32 %v3612_v38, %v5175_v21  ;;  %vm2544_vm10 = vweird.f32 %v3612_v38  ;;  %v2724_v34 = vmul.f32 %v2716_v17, %v5169_v49 }
 0x8ba   :  { %v2536_v9 = vsel %vm2533_vm9, %v2535_v48, %v2531_v7  ;;  %3613 = vrcp.f32 %v5197_v53  ;;  %v5211_v55 = vmul.f32 0.70710677, %v5200_v3  ;;  %vm2545_vm0 = vmor %vm2543_vm11, %vm2544_vm10  ;;  %v2562_v21 = vand.u32 2147483647, %v5197_v53 }
 0x8bb   :  { %v2643_v50 = vmul.f32 1.0614054, %v2536_v9  ;;  %v2540_v41 = vsub.f32 1.0, %v2539_v44  ;;  %v2564_v52 = vand.u32 2147483648, %v5197_v53  ;;  %vm2558_vm14 = vweird.f32 %v5197_v53 }
 0x8bc   :  { %v5219_v23 = vand.u32 2147483647, %v5211_v55  ;;  %vm2563_vm1 = vcmp.eq.f32.partialorder %v2562_v21, 8.507059e+37  ;;  %vm2813_vm8 = vcmask 523264   ;;  %vm2764_vm9 = vcmp.ge.f32.partialorder %v5166_v60, 0.0 }
 0x8bd   :  { %v2651_v33 = vadd.f32 -1.4531521, %v2643_v50  ;;  %v2541_v59 = vmul.f32 %v3612_v38, %v2540_v41  ;;  %v2565_v31 = vor.u32 1.1754944e-38, %v2564_v52  ;;  %vm2765_vm10 = vcmp.ge.f32.partialorder %v5181_v54, 0.0 }
 0x8be   :  { %v2510_v1 = vmul.f32 0.3275911, %v5219_v23  ;;  %vm2766_vm11 = vcmp.ge.f32.partialorder %v5211_v55, 0.0 }
 0x8bf   :  { %v2659_v47 = vmul.f32 %v2651_v33, %v2536_v9  ;;  %v2542_v43 = vadd.f32 %v3612_v38, %v2541_v59 }
 0x8c0   :  { %v3614_v19 = vpop.eup %3613  ;;  %v2518_v37 = vadd.f32 1.0, %v2510_v1 }
 0x8c1   :  { %v2667_v27 = vadd.f32 1.4214138, %v2659_v47  ;;  %v2554_v15 = vmul.f32 %v3614_v19, %v5197_v53  ;;  %v2546_v14 = vsel %vm2545_vm0, %v3612_v38, %v2542_v43  ;;  %vm2559_vm13 = vweird.f32 %v3614_v19 }
 0x8c2   :  { %v5227_v26 = vsel %vm2548_vm12, %v2550_v51, %v2546_v14  ;;  %3615 = vrcp.f32 %v2518_v37  ;;  %vm2560_vm15 = vmor %vm2558_vm14, %vm2559_vm13  ;;  %v2733_v53 = vmul.f32 1.442695, %v2724_v34  ;;  %v2577_v59 = vand.u32 2147483647, %v2518_v37 }
 0x8c3   :  { %v2675_v16 = vmul.f32 %v2667_v27, %v2536_v9  ;;  %v2555_v0 = vsub.f32 1.0, %v2554_v15  ;;  %v2644_v40 = vmul.f32 1.0614054, %v5227_v26  ;;  %3617 = vpow2.f32 %v2731_v39 }
 0x8c4   :  { %v2579_v20 = vand.u32 2147483648, %v2518_v37  ;;  %3619 = vpow2.f32 %v2733_v53  ;;  %vm2573_vm3 = vweird.f32 %v2518_v37  ;;  %v2735_v39 = vmul.f32 1.442695, %v2725_v32 }
 0x8c5   :  { %v2683_v36 = vadd.f32 -0.28449672, %v2675_v16  ;;  %v2556_v63 = vmul.f32 %v3614_v19, %v2555_v0  ;;  %v2652_v29 = vadd.f32 -1.4531521, %v2644_v40  ;;  %vm2578_vm7 = vcmp.eq.f32.partialorder %v2577_v59, 8.507059e+37 }
 0x8c6   :  { %v2580_v11 = vor.u32 1.1754944e-38, %v2579_v20  ;;  %3621 = vpow2.f32 %v2735_v39  ;;  %v2484_v53 = vmul.f32 0.5, %v5163_v30 }
 0x8c7   :  { %v2691_v61 = vmul.f32 %v2683_v36, %v2536_v9  ;;  %v2557_v18 = vadd.f32 %v3614_v19, %v2556_v63  ;;  %v2660_v48 = vmul.f32 %v2652_v29, %v5227_v26 }
 0x8c8   :  { %v3616_v7 = vpop.eup %3615 }
 0x8c9   :  { %v2699_v22 = vadd.f32 0.2548296, %v2691_v61  ;;  %v2561_v38 = vsel %vm2560_vm15, %v3614_v19, %v2557_v18  ;;  %v2569_v50 = vmul.f32 %v3616_v7, %v2518_v37  ;;  %v2668_v46 = vadd.f32 1.4214138, %v2660_v48  ;;  %v3618_v41 = vpop.eup %3617 }
 0x8ca   :  { %v2566_v57 = vsel %vm2563_vm1, %v2565_v31, %v2561_v38  ;;  %vm2574_vm2 = vweird.f32 %v3616_v7  ;;  %v3620_v40 = vpop.eup %3619 }
 0x8cb   :  { %v2707_v44 = vmul.f32 %v2699_v22, %v2536_v9  ;;  %v2645_v33 = vmul.f32 1.0614054, %v2566_v57  ;;  %v2570_v13 = vsub.f32 1.0, %v2569_v50  ;;  %v2676_v49 = vmul.f32 %v2668_v46, %v5227_v26  ;;  %vm2575_vm5 = vmor %vm2573_vm3, %vm2574_vm2 }
 0x8cc   :  { %v2483_v9 = vmul.f32 0.5, %v5156_v5  ;;  %v2718_v5 = vsub.f32 0.0, %v5219_v23  ;;  %v3622_v50 = vpop.eup %3621 }
 0x8cd   :  { %v2747_v45 = vmul.f32 %v3618_v41, %v2707_v44  ;;  %v2653_v47 = vadd.f32 -1.4531521, %v2645_v33  ;;  %v2571_v19 = vmul.f32 %v3616_v7, %v2570_v13  ;;  %v2684_v1 = vadd.f32 -0.28449672, %v2676_v49 }
 0x8ce   :  { %v2726_v34 = vmul.f32 %v2718_v5, %v5219_v23 }
 0x8cf   :  { %v2755_v35 = vsub.f32 1.0, %v2747_v45  ;;  %v2661_v43 = vmul.f32 %v2653_v47, %v2566_v57  ;;  %v2572_v51 = vadd.f32 %v3616_v7, %v2571_v19  ;;  %v2692_v15 = vmul.f32 %v2684_v1, %v5227_v26 }
 0x8d0   :  { %v2737_v44 = vmul.f32 1.442695, %v2726_v34 }
 0x8d1   :  { %v2771_v27 = vsub.f32 0.0, %v2755_v35  ;;  %v2669_v14 = vadd.f32 1.4214138, %v2661_v43  ;;  %v2576_v0 = vsel %vm2575_vm5, %v3616_v7, %v2572_v51  ;;  %v2700_v17 = vadd.f32 0.2548296, %v2692_v15 }
 0x8d2   :  { %v2581_v52 = vsel %vm2578_vm7, %v2580_v11, %v2576_v0  ;;  %3623 = vpow2.f32 %v2737_v44  ;;  %v2486_v11 = vmul.f32 0.5, %v5200_v3 }
 0x8d3   :  { %v2779_v16 = vsel %vm2763_vm4, %v2755_v35, %v2771_v27  ;;  %v2677_v36 = vmul.f32 %v2669_v14, %v2566_v57  ;;  %v2646_v63 = vmul.f32 1.0614054, %v2581_v52  ;;  %v2708_v37 = vmul.f32 %v2700_v17, %v5227_v26 }
 0x8d4   :  { %v2787_v21 = vadd.f32 1.0, %v2779_v16 }
 0x8d5   :  { %v2685_v58 = vadd.f32 -0.28449672, %v2677_v36  ;;  %v2654_v29 = vadd.f32 -1.4531521, %v2646_v63  ;;  %v2748_v18 = vmul.f32 %v3620_v40, %v2708_v37 }
 0x8d6   :  { %v2795_v61 = vmul.f32 %v2787_v21, %v2483_v9 }
 0x8d7   :  { %v2693_v31 = vmul.f32 %v2685_v58, %v2566_v57  ;;  %v2662_v22 = vmul.f32 %v2654_v29, %v2581_v52  ;;  %v2756_v48 = vsub.f32 1.0, %v2748_v18 }
 0x8d8   :  { %3295 = vmatmul.msk.f32.vlgmr.msrb.gmra.mxu0 %vm2813_vm8, %v2795_v61  ;;  %v3624_v19 = vpop.eup %3623 }
 0x8d9   :  { %v2701_v38 = vadd.f32 0.2548296, %v2693_v31  ;;  %v2670_v7 = vadd.f32 1.4214138, %v2662_v22  ;;  %v2772_v6 = vsub.f32 0.0, %v2756_v48 }
 0x8db   :  { %v2709_v26 = vmul.f32 %v2701_v38, %v2566_v57  ;;  %v2678_v46 = vmul.f32 %v2670_v7, %v2581_v52  ;;  %v2780_v41 = vsel %vm2764_vm9, %v2756_v48, %v2772_v6  ;;  %v2485_v57 = vmul.f32 0.5, %v5173_v8 }
 0x8dc   :  { %v2788_v33 = vadd.f32 1.0, %v2780_v41 }
 0x8dd   :  { %v2749_v45 = vmul.f32 %v3622_v50, %v2709_v26  ;;  %v2686_v23 = vadd.f32 -0.28449672, %v2678_v46 }
 0x8de   :  { %v2796_v13 = vmul.f32 %v2788_v33, %v2484_v53 }
 0x8df   :  { %v2757_v49 = vsub.f32 1.0, %v2749_v45  ;;  %v2694_v32 = vmul.f32 %v2686_v23, %v2581_v52 }
 0x8e0   :  { %3296 = vmatmul.msk.f32.gmra.mxu0 %vm2813_vm8, %v2796_v13 }
 0x8e1   :  { %v2773_v59 = vsub.f32 0.0, %v2757_v49  ;;  %v2702_v60 = vadd.f32 0.2548296, %v2694_v32 }
 0x8e3   :  { %v2781_v20 = vsel %vm2765_vm10, %v2757_v49, %v2773_v59  ;;  %v2710_v47 = vmul.f32 %v2702_v60, %v2581_v52 }
 0x8e4   :  { %v2789_v35 = vadd.f32 1.0, %v2781_v20 }
 0x8e5   :  { %v2750_v1 = vmul.f32 %v3624_v19, %v2710_v47 }
 0x8e6   :  { %v2471_v30 = vpop.f32.mrf.mxu3  ;;  %v2797_v43 = vmul.f32 %v2789_v35, %v2485_v57 }
 0x8e7   :  { %v5252_v9 = vadd.f32 %v5148_v62, %v2471_v30  ;;  %v2758_v27 = vsub.f32 1.0, %v2750_v1 }
 0x8e8   :  { %3297 = vmatmul.msk.f32.gmra.mxu0 %vm2813_vm8, %v2797_v43 }
 0x8e9   :  { %v5255_v51 = vmul.f32 0.70710677, %v5252_v9  ;;  %v2774_v54 = vsub.f32 0.0, %v2758_v27  ;;  %v2487_v43 = vmul.f32 0.5, %v5252_v9 }
 0x8eb   :  { %v2503_v15 = vand.u32 2147483647, %v5255_v51  ;;  %v2782_v8 = vsel %vm2766_vm11, %v2758_v27, %v2774_v54  ;;  %vm2767_vm15 = vcmp.ge.f32.partialorder %v5255_v51, 0.0 }
 0x8ec   :  { %v2790_v14 = vadd.f32 1.0, %v2782_v8 }
 0x8ed   :  { %v2511_v39 = vmul.f32 0.3275911, %v2503_v15  ;;  %v2719_v61 = vsub.f32 0.0, %v2503_v15 }
 0x8ee   :  { %v2798_v0 = vmul.f32 %v2790_v14, %v2486_v11 }
 0x8ef   :  { %v2519_v16 = vadd.f32 1.0, %v2511_v39  ;;  %v2727_v31 = vmul.f32 %v2719_v61, %v2503_v15 }
 0x8f0   :  { %3298 = vmatmul.msk.f32.gmra.mxu0 %vm2813_vm8, %v2798_v0 }
 0x8f1   :  { %3625 = vrcp.f32 %v2519_v16  ;;  %v2594_v5 = vand.u32 2147483648, %v2519_v16  ;;  %v2592_v63 = vand.u32 2147483647, %v2519_v16  ;;  %vm2588_vm12 = vweird.f32 %v2519_v16 }
 0x8f2   :  { %v2739_v6 = vmul.f32 1.442695, %v2727_v31 }
 0x8f3   :  { %v2595_v55 = vor.u32 1.1754944e-38, %v2594_v5  ;;  %vm2593_vm14 = vcmp.eq.f32.partialorder %v2592_v63, 8.507059e+37 }
 0x8f4   :  { %3627 = vpow2.f32 %v2739_v6 }
 0x8f7   :  { %v3626_v17 = vpop.eup %3625 }
 0x8f8   :  { %v2584_v21 = vmul.f32 %v3626_v17, %v2519_v16  ;;  %vm2589_vm0 = vweird.f32 %v3626_v17 }
 0x8f9   :  { %vm2590_vm13 = vmor %vm2588_vm12, %vm2589_vm0 }
 0x8fa   :  { %v2585_v52 = vsub.f32 1.0, %v2584_v21  ;;  %v3628_v45 = vpop.eup %3627 }
 0x8fc   :  { %v2586_v36 = vmul.f32 %v3626_v17, %v2585_v52 }
 0x8fe   :  { %v2587_v37 = vadd.f32 %v3626_v17, %v2586_v36 }
 0x900   :  { %v2591_v40 = vsel %vm2590_vm13, %v3626_v17, %v2587_v37 }
 0x901   :  { %v2596_v3 = vsel %vm2593_vm14, %v2595_v55, %v2591_v40 }
 0x902   :  { %v2647_v58 = vmul.f32 1.0614054, %v2596_v3 }
 0x903   :  { %v2474_v29 = vpop.f32.mrf.mxu3 }
 0x904   :  { %v2655_v18 = vadd.f32 -1.4531521, %v2647_v58  ;;  %v5263_v34 = vadd.f32 %v5148_v62, %v2474_v29 }
 0x906   :  { %v2663_v22 = vmul.f32 %v2655_v18, %v2596_v3  ;;  %v5266_v48 = vmul.f32 0.70710677, %v5263_v34 }
 0x908   :  { %v2671_v38 = vadd.f32 1.4214138, %v2663_v22  ;;  %v2504_v7 = vand.u32 2147483647, %v5266_v48  ;;  %vm2768_vm11 = vcmp.ge.f32.partialorder %v5266_v48, 0.0 }
 0x90a   :  { %v2679_v44 = vmul.f32 %v2671_v38, %v2596_v3  ;;  %v2512_v26 = vmul.f32 0.3275911, %v2504_v7  ;;  %v2720_v14 = vsub.f32 0.0, %v2504_v7 }
 0x90c   :  { %v2687_v50 = vadd.f32 -0.28449672, %v2679_v44  ;;  %v2520_v46 = vadd.f32 1.0, %v2512_v26  ;;  %v2728_v52 = vmul.f32 %v2720_v14, %v2504_v7 }
 0x90e   :  { %v2695_v41 = vmul.f32 %v2687_v50, %v2596_v3  ;;  %3629 = vrcp.f32 %v2520_v46  ;;  %v2609_v57 = vand.u32 2147483648, %v2520_v46  ;;  %v2607_v19 = vand.u32 2147483647, %v2520_v46 }
 0x90f   :  { %vm2603_vm2 = vweird.f32 %v2520_v46  ;;  %v2741_v55 = vmul.f32 1.442695, %v2728_v52 }
 0x910   :  { %v2703_v53 = vadd.f32 0.2548296, %v2695_v41  ;;  %v2610_v15 = vor.u32 1.1754944e-38, %v2609_v57  ;;  %vm2608_vm4 = vcmp.eq.f32.partialorder %v2607_v19, 8.507059e+37  ;;  %v2488_v19 = vmul.f32 0.5, %v5263_v34 }
 0x912   :  { %v2711_v33 = vmul.f32 %v2703_v53, %v2596_v3 }
 0x914   :  { %v3630_v23 = vpop.eup %3629  ;;  %v2751_v13 = vmul.f32 %v3628_v45, %v2711_v33 }
 0x915   :  { %v2599_v49 = vmul.f32 %v3630_v23, %v2520_v46  ;;  %vm2604_vm1 = vweird.f32 %v3630_v23 }
 0x916   :  { %v2759_v32 = vsub.f32 1.0, %v2751_v13  ;;  %vm2605_vm3 = vmor %vm2603_vm2, %vm2604_vm1 }
 0x917   :  { %v2600_v59 = vsub.f32 1.0, %v2599_v49  ;;  %v2477_v60 = vpop.f32.mrf.mxu3 }
 0x918   :  { %v2775_v20 = vsub.f32 0.0, %v2759_v32  ;;  %v5270_v47 = vadd.f32 %v5148_v62, %v2477_v60 }
 0x919   :  { %v2601_v35 = vmul.f32 %v3630_v23, %v2600_v59 }
 0x91a   :  { %v2783_v30 = vsel %vm2767_vm15, %v2759_v32, %v2775_v20  ;;  %v5274_v1 = vmul.f32 0.70710677, %v5270_v47 }
 0x91b   :  { %v2791_v27 = vadd.f32 1.0, %v2783_v30  ;;  %v2602_v54 = vadd.f32 %v3630_v23, %v2601_v35 }
 0x91c   :  { %v2505_v8 = vand.u32 2147483647, %v5274_v1  ;;  %vm2769_vm15 = vcmp.ge.f32.partialorder %v5274_v1, 0.0 }
 0x91d   :  { %v2799_v39 = vmul.f32 %v2791_v27, %v2487_v43  ;;  %v2606_v11 = vsel %vm2605_vm3, %v3630_v23, %v2602_v54 }
 0x91e   :  { %v2611_v51 = vsel %vm2608_vm4, %v2610_v15, %v2606_v11  ;;  %v2513_v16 = vmul.f32 0.3275911, %v2505_v8  ;;  %v2721_v23 = vsub.f32 0.0, %v2505_v8 }
 0x91f   :  { %v2648_v0 = vmul.f32 1.0614054, %v2611_v51  ;;  %3299 = vmatmul.msk.f32.gmra.mxu0 %vm2813_vm8, %v2799_v39 }
 0x920   :  { %v2521_v17 = vadd.f32 1.0, %v2513_v16  ;;  %v2729_v57 = vmul.f32 %v2721_v23, %v2505_v8  ;;  %v3411_v23 = vld [vmem:[%s5476_s2 + $0x9] ss:$0 sm:$0xff] }
 0x921   :  { %v2656_v21 = vadd.f32 -1.4531521, %v2648_v0 }
 0x922   :  { %3631 = vrcp.f32 %v2521_v17  ;;  %v2480_v9 = vpop.f32.mrf.mxu3  ;;  %v2622_v7 = vand.u32 2147483647, %v2521_v17  ;;  %v2624_v6 = vand.u32 2147483648, %v2521_v17  ;;  %vm2618_vm7 = vweird.f32 %v2521_v17 }
 0x923   :  { %v2664_v5 = vmul.f32 %v2656_v21, %v2611_v51  ;;  %v5280_v36 = vadd.f32 %v5148_v62, %v2480_v9  ;;  %3633 = vpow2.f32 %v2741_v55  ;;  %v2743_v14 = vmul.f32 1.442695, %v2729_v57 }
 0x924   :  { %v2625_v41 = vor.u32 1.1754944e-38, %v2624_v6  ;;  %vm2623_vm10 = vcmp.eq.f32.partialorder %v2622_v7, 8.507059e+37 }
 0x925   :  { %v2672_v63 = vadd.f32 1.4214138, %v2664_v5  ;;  %v5283_v37 = vmul.f32 0.70710677, %v5280_v36 }
 0x927   :  { %v2680_v40 = vmul.f32 %v2672_v63, %v2611_v51  ;;  %v2506_v3 = vand.u32 2147483647, %v5283_v37  ;;  %vm2770_vm1 = vcmp.ge.f32.partialorder %v5283_v37, 0.0 }
 0x928   :  { %v3632_v61 = vpop.eup %3631 }
 0x929   :  { %v2688_v58 = vadd.f32 -0.28449672, %v2680_v40  ;;  %v2614_v29 = vmul.f32 %v3632_v61, %v2521_v17  ;;  %v2514_v18 = vmul.f32 0.3275911, %v2506_v3  ;;  %vm2619_vm5 = vweird.f32 %v3632_v61  ;;  %v3634_v46 = vpop.eup %3633 }
 0x92a   :  { %vm2620_vm9 = vmor %vm2618_vm7, %vm2619_vm5  ;;  %v2722_v21 = vsub.f32 0.0, %v2506_v3 }
 0x92b   :  { %v2696_v31 = vmul.f32 %v2688_v58, %v2611_v51  ;;  %v2615_v22 = vsub.f32 1.0, %v2614_v29  ;;  %v2522_v38 = vadd.f32 1.0, %v2514_v18 }
 0x92c   :  { %v2730_v55 = vmul.f32 %v2722_v21, %v2506_v3 }
 0x92d   :  { %v2704_v62 = vadd.f32 0.2548296, %v2696_v31  ;;  %v2616_v44 = vmul.f32 %v3632_v61, %v2615_v22  ;;  %3635 = vrcp.f32 %v2522_v38  ;;  %v2639_v27 = vand.u32 2147483648, %v2522_v38 }
 0x92e   :  { %v2637_v39 = vand.u32 2147483647, %v2522_v38  ;;  %vm2633_vm12 = vweird.f32 %v2522_v38  ;;  %3637 = vpow2.f32 %v2743_v14  ;;  %v2745_v31 = vmul.f32 1.442695, %v2730_v55 }
 0x92f   :  { %v2712_v26 = vmul.f32 %v2704_v62, %v2611_v51  ;;  %v2617_v50 = vadd.f32 %v3632_v61, %v2616_v44  ;;  %v2640_v17 = vor.u32 1.1754944e-38, %v2639_v27 }
 0x930   :  { %vm2638_vm14 = vcmp.eq.f32.partialorder %v2637_v39, 8.507059e+37  ;;  %3639 = vpow2.f32 %v2745_v31 }
 0x931   :  { %v2752_v53 = vmul.f32 %v3634_v46, %v2712_v26  ;;  %v2621_v33 = vsel %vm2620_vm9, %v3632_v61, %v2617_v50  ;;  %v2489_v26 = vmul.f32 0.5, %v5270_v47  ;;  %v2490_v47 = vmul.f32 0.5, %v5280_v36 }
 0x932   :  { %v2626_v45 = vsel %vm2623_vm10, %v2625_v41, %v2621_v33 }
 0x933   :  { %v3636_v13 = vpop.eup %3635  ;;  %v2760_v49 = vsub.f32 1.0, %v2752_v53  ;;  %v2649_v32 = vmul.f32 1.0614054, %v2626_v45 }
 0x934   :  { %v2629_v59 = vmul.f32 %v3636_v13, %v2522_v38  ;;  %vm2634_vm0 = vweird.f32 %v3636_v13  ;;  %v3638_v58 = vpop.eup %3637 }
 0x935   :  { %v2776_v60 = vsub.f32 0.0, %v2760_v49  ;;  %v2657_v20 = vadd.f32 -1.4531521, %v2649_v32  ;;  %vm2635_vm13 = vmor %vm2633_vm12, %vm2634_vm0 }
 0x936   :  { %v2630_v35 = vsub.f32 1.0, %v2629_v59  ;;  %v3640_v53 = vpop.eup %3639 }
 0x937   :  { %v2784_v30 = vsel %vm2768_vm11, %v2760_v49, %v2776_v60  ;;  %v2665_v43 = vmul.f32 %v2657_v20, %v2626_v45 }
 0x938   :  { %v2792_v54 = vadd.f32 1.0, %v2784_v30  ;;  %v2631_v15 = vmul.f32 %v3636_v13, %v2630_v35 }
 0x939   :  { %v2673_v11 = vadd.f32 1.4214138, %v2665_v43 }
 0x93a   :  { %v2800_v51 = vmul.f32 %v2792_v54, %v2488_v19  ;;  %v2632_v16 = vadd.f32 %v3636_v13, %v2631_v15 }
 0x93b   :  { %v2681_v0 = vmul.f32 %v2673_v11, %v2626_v45 }
 0x93c   :  { %v2636_v48 = vsel %vm2635_vm13, %v3636_v13, %v2632_v16  ;;  %3300 = vmatmul.msk.f32.gmra.mxu0 %vm2813_vm8, %v2800_v51 }
 0x93d   :  { %v2689_v34 = vadd.f32 -0.28449672, %v2681_v0  ;;  %v2641_v8 = vsel %vm2638_vm14, %v2640_v17, %v2636_v48 }
 0x93e   :  { %v2650_v52 = vmul.f32 1.0614054, %v2641_v8 }
 0x93f   :  { %v2697_v9 = vmul.f32 %v2689_v34, %v2626_v45 }
 0x940   :  { %v2658_v5 = vadd.f32 -1.4531521, %v2650_v52 }
 0x941   :  { %v2705_v63 = vadd.f32 0.2548296, %v2697_v9 }
 0x942   :  { %v2666_v40 = vmul.f32 %v2658_v5, %v2641_v8 }
 0x943   :  { %v2713_v61 = vmul.f32 %v2705_v63, %v2626_v45 }
 0x944   :  { %v2674_v29 = vadd.f32 1.4214138, %v2666_v40 }
 0x945   :  { %v2753_v18 = vmul.f32 %v3638_v58, %v2713_v61 }
 0x946   :  { %v2682_v22 = vmul.f32 %v2674_v29, %v2641_v8 }
 0x947   :  { %v2761_v38 = vsub.f32 1.0, %v2753_v18 }
 0x948   :  { %v2690_v7 = vadd.f32 -0.28449672, %v2682_v22 }
 0x949   :  { %v2777_v6 = vsub.f32 0.0, %v2761_v38 }
 0x94a   :  { %v2698_v62 = vmul.f32 %v2690_v7, %v2641_v8 }
 0x94b   :  { %v2785_v44 = vsel %vm2769_vm15, %v2761_v38, %v2777_v6 }
 0x94c   :  { %v2793_v50 = vadd.f32 1.0, %v2785_v44  ;;  %v2706_v46 = vadd.f32 0.2548296, %v2698_v62 }
 0x94e   :  { %v2801_v3 = vmul.f32 %v2793_v50, %v2489_v26  ;;  %v2714_v41 = vmul.f32 %v2706_v46, %v2641_v8 }
 0x950   :  { %v2754_v33 = vmul.f32 %v3640_v53, %v2714_v41  ;;  %3301 = vmatmul.msk.f32.gmra.mxu0 %vm2813_vm8, %v2801_v3 }
 0x952   :  { %v2762_v45 = vsub.f32 1.0, %v2754_v33 }
 0x954   :  { %v2778_v13 = vsub.f32 0.0, %v2762_v45 }
 0x955   :  { %v2855_v1 = vpop.f32.mrf.mxu0 }
 0x956   :  { %v2786_v49 = vsel %vm2770_vm1, %v2762_v45, %v2778_v13  ;;  %v2856_v32 = vadd.f32 %v3411_v23, %v2855_v1 }
 0x957   :  { %v2794_v59 = vadd.f32 1.0, %v2786_v49 }
 0x958   :  { %v2879_v60 = vadd.f32 %v2856_v32, %v5093_v12 }
 0x959   :  { %v2802_v20 = vmul.f32 %v2794_v59, %v2490_v47 }
 0x95a   :  { %v2889_v57 = vsel %vm415_vm6, %v2879_v60, 0.0 }
 0x95b   :  { %3302 = vmatmul.msk.f32.gmra.mxu0 %vm2813_vm8, %v2802_v20  ;;  %2890 = vadd.xlane.f32.xlu1 %v2889_v57 }
 0x95d   :  { %v2858_v35 = vpop.f32.mrf.mxu0 }
 0x95e   :  { %v2859_v19 = vadd.f32 %v3411_v23, %v2858_v35 }
 0x960   :  { %v2880_v30 = vadd.f32 %v2859_v19, %v5100_v28 }
 0x962   :  { %v2892_v37 = vsel %vm415_vm6, %v2880_v30, 0.0 }
 0x963   :  { %2893 = vadd.xlane.f32.xlu0 %v2892_v37 }
 0x965   :  { %v2861_v43 = vpop.f32.mrf.mxu0 }
 0x966   :  { %v2862_v27 = vadd.f32 %v3411_v23, %v2861_v43 }
 0x968   :  { %v2881_v36 = vadd.f32 %v2862_v27, %v5107_v24 }
 0x96a   :  { %v2895_v54 = vsel %vm415_vm6, %v2881_v36, 0.0 }
 0x96b   :  { %2896 = vadd.xlane.f32.xlu0 %v2895_v54 }
 0x96d   :  { %v2864_v12 = vpop.f32.mrf.mxu0 }
 0x96e   :  { %v2865_v0 = vadd.f32 %v3411_v23, %v2864_v12 }
 0x970   :  { %v2882_v24 = vadd.f32 %v2865_v0, %v5114_v2 }
 0x972   :  { %v2898_v48 = vsel %vm415_vm6, %v2882_v24, 0.0 }
 0x99c   :  { %v2867_v15 = vpop.f32.mrf.mxu0 }
 0x99d   :  { %v2868_v39 = vadd.f32 %v3411_v23, %v2867_v15 }
 0x99f   :  { %v2883_v11 = vadd.f32 %v2868_v39, %v5122_v10 }
 0x9a1   :  { %v2901_v51 = vsel %vm415_vm6, %v2883_v11, 0.0 }
 0x9a2   :  { %2902 = vadd.xlane.f32.xlu2 %v2901_v51 }
 0x9b9   :  { %v2870_v14 = vpop.f32.mrf.mxu0 }
 0x9ba   :  { %v2871_v28 = vadd.f32 %v3411_v23, %v2870_v14 }
 0x9bc   :  { %v2884_v16 = vadd.f32 %v2871_v28, %v5131_v42 }
 0x9be   :  { %v2904_v17 = vsel %vm415_vm6, %v2884_v16, 0.0 }
 0x9bf   :  { %2905 = vadd.xlane.f32.xlu1 %v2904_v17 }
 0x9c7   :  { %2899 = vadd.xlane.f32.xlu1 %v2898_v48 }
 0x9cd   :  { %v2873_v34 = vpop.f32.mrf.mxu0 }
 0x9ce   :  { %v2874_v8 = vadd.f32 %v3411_v23, %v2873_v34  ;;  %v2891_v21 = vpop.xlane.xlu1 %2890 }
 0x9cf   :  { %v2913_v10 = vmul.f32 %v2891_v21, %v3996_v4 }
 0x9d0   :  { %v2885_v52 = vadd.f32 %v2874_v8, %v5139_v56 }
 0x9d1   :  { %v5312_v9 = vsub.f32 %v2879_v60, %v2913_v10 }
 0x9d2   :  { %v2907_v42 = vsel %vm415_vm6, %v2885_v52, 0.0 }
 0x9d3   :  { %2908 = vadd.xlane.f32.xlu2 %v2907_v42  ;;  %v2929_v5 = vmul.f32 %v5312_v9, %v5312_v9 }
 0x9d5   :  { %v2937_v61 = vsel %vm415_vm6, %v2929_v5, 0.0 }
 0x9d6   :  { %v2894_v63 = vpop.xlane.xlu0 %2893 }
 0x9d7   :  { %v2914_v55 = vmul.f32 %v2894_v63, %v3996_v4 }
 0x9d8   :  { %v2876_v2 = vpop.f32.mrf.mxu0 }
 0x9d9   :  { %v2877_v40 = vadd.f32 %v3411_v23, %v2876_v2  ;;  %v5319_v58 = vsub.f32 %v2880_v30, %v2914_v55 }
 0x9db   :  { %v2886_v29 = vadd.f32 %v2877_v40, %v5151_v25  ;;  %2938 = vadd.xlane.f32.xlu2 %v2937_v61  ;;  %v2930_v18 = vmul.f32 %v5319_v58, %v5319_v58 }
 0x9dd   :  { %v2910_v56 = vsel %vm415_vm6, %v2886_v29, 0.0  ;;  %v2940_v31 = vsel %vm415_vm6, %v2930_v18, 0.0 }
 0x9de   :  { %2911 = vadd.xlane.f32.xlu0 %v2910_v56  ;;  %v2897_v22 = vpop.xlane.xlu0 %2896  ;;  %2941 = vadd.xlane.f32.xlu1 %v2940_v31 }
 0x9df   :  { %v2915_v38 = vmul.f32 %v2897_v22, %v3996_v4 }
 0x9e1   :  { %v5327_v7 = vsub.f32 %v2881_v36, %v2915_v38 }
 0x9e3   :  { %v2931_v6 = vmul.f32 %v5327_v7, %v5327_v7 }
 0x9e5   :  { %v2943_v25 = vsel %vm415_vm6, %v2931_v6, 0.0 }
 0x9e6   :  { %2944 = vadd.xlane.f32.xlu1 %v2943_v25 }
 0xa15   :  { %v2903_v62 = vpop.xlane.xlu2 %2902 }
 0xa16   :  { %v2917_v44 = vmul.f32 %v2903_v62, %v3996_v4 }
 0xa18   :  { %v5333_v26 = vsub.f32 %v2883_v11, %v2917_v44 }
 0xa1a   :  { %v2933_v50 = vmul.f32 %v5333_v26, %v5333_v26 }
 0xa1c   :  { %v2949_v46 = vsel %vm415_vm6, %v2933_v50, 0.0 }
 0xa1d   :  { %2950 = vadd.xlane.f32.xlu0 %v2949_v46 }
 0xa32   :  { %v2906_v3 = vpop.xlane.xlu1 %2905 }
 0xa33   :  { %v2918_v41 = vmul.f32 %v2906_v3, %v3996_v4 }
 0xa35   :  { %v5339_v53 = vsub.f32 %v2884_v16, %v2918_v41 }
 0xa37   :  { %v2934_v33 = vmul.f32 %v5339_v53, %v5339_v53 }
 0xa39   :  { %v2952_v45 = vsel %vm415_vm6, %v2934_v33, 0.0 }
 0xa3a   :  { %2953 = vadd.xlane.f32.xlu2 %v2952_v45  ;;  %v2900_v23 = vpop.xlane.xlu1 %2899 }
 0xa3b   :  { %v2916_v13 = vmul.f32 %v2900_v23, %v3996_v4 }
 0xa3d   :  { %v5345_v1 = vsub.f32 %v2882_v24, %v2916_v13 }
 0xa3f   :  { %v2932_v49 = vmul.f32 %v5345_v1, %v5345_v1 }
 0xa41   :  { %v2946_v32 = vsel %vm415_vm6, %v2932_v49, 0.0 }
 0xa42   :  { %2947 = vadd.xlane.f32.xlu2 %v2946_v32 }
 0xa46   :  { %v2909_v47 = vpop.xlane.xlu2 %2908 }
 0xa47   :  { %v2919_v59 = vmul.f32 %v2909_v47, %v3996_v4 }
 0xa49   :  { %v5351_v60 = vsub.f32 %v2885_v52, %v2919_v59 }
 0xa4b   :  { %v2935_v20 = vmul.f32 %v5351_v60, %v5351_v60 }
 0xa4d   :  { %v2955_v57 = vsel %vm415_vm6, %v2935_v20, 0.0 }
 0xa4e   :  { %2956 = vadd.xlane.f32.xlu0 %v2955_v57  ;;  %v2939_v36 = vpop.xlane.xlu2 %2938 }
 0xa4f   :  { %v2961_v15 = vmul.f32 %v2939_v36, %v3996_v4 }
 0xa51   :  { %v2912_v35 = vpop.xlane.xlu0 %2911  ;;  %v2942_v27 = vpop.xlane.xlu1 %2941  ;;  %v2969_v51 = vadd.f32 1e-05, %v2961_v15 }
 0xa52   :  { %v2920_v19 = vmul.f32 %v2912_v35, %v3996_v4  ;;  %v2962_v12 = vmul.f32 %v2942_v27, %v3996_v4 }
 0xa53   :  { %vm2983_vm5 = vweird.f32 %v2969_v51 }
 0xa54   :  { %v5357_v30 = vsub.f32 %v2886_v29, %v2920_v19  ;;  %v2970_v11 = vadd.f32 1e-05, %v2962_v12  ;;  %v5398_v12 = vld [vmem:[%s5476_s2 + $0xa] ss:$0 sm:$0xff] }
 0xa56   :  { %v2936_v37 = vmul.f32 %v5357_v30, %v5357_v30  ;;  %3641 = vrsqrt.f32 %v2970_v11  ;;  %vm2993_vm3 = vweird.f32 %v2970_v11 }
 0xa57   :  { %3643 = vrsqrt.f32 %v2969_v51 }
 0xa58   :  { %v2958_v43 = vsel %vm415_vm6, %v2936_v37, 0.0 }
 0xa59   :  { %2959 = vadd.xlane.f32.xlu1 %v2958_v43  ;;  %v2945_v54 = vpop.xlane.xlu1 %2944 }
 0xa5a   :  { %v2963_v39 = vmul.f32 %v2945_v54, %v3996_v4 }
 0xa5c   :  { %v2971_v14 = vadd.f32 1e-05, %v2963_v39  ;;  %v3642_v0 = vpop.eup %3641 }
 0xa5d   :  { %v3644_v24 = vpop.eup %3643  ;;  %v2988_v8 = vmul.f32 %v3642_v0, %v2970_v11  ;;  %vm2994_vm8 = vweird.f32 %v3642_v0 }
 0xa5e   :  { %3645 = vrsqrt.f32 %v2971_v14  ;;  %v2978_v21 = vmul.f32 %v3644_v24, %v2969_v51  ;;  %vm2984_vm2 = vweird.f32 %v3644_v24  ;;  %vm2995_vm7 = vmor %vm2993_vm3, %vm2994_vm8  ;;  %vm3003_vm10 = vweird.f32 %v2971_v14 }
 0xa5f   :  { %v2989_v63 = vmul.f32 %v3642_v0, %v2988_v8  ;;  %vm5386_vm9 = vmor %vm2983_vm5, %vm2984_vm2 }
 0xa60   :  { %v2979_v55 = vmul.f32 %v3644_v24, %v2978_v21 }
 0xa61   :  { %v2990_v29 = vmul.f32 0.5, %v2989_v63 }
 0xa62   :  { %v2980_v56 = vmul.f32 0.5, %v2979_v55 }
 0xa63   :  { %v2991_v22 = vsub.f32 1.5, %v2990_v29 }
 0xa64   :  { %v3646_v48 = vpop.eup %3645  ;;  %v2981_v6 = vsub.f32 1.5, %v2980_v56 }
 0xa65   :  { %v2998_v52 = vmul.f32 %v3646_v48, %v2971_v14  ;;  %v2992_v3 = vmul.f32 %v3642_v0, %v2991_v22  ;;  %vm3004_vm4 = vweird.f32 %v3646_v48 }
 0xa66   :  { %v2982_v45 = vmul.f32 %v3644_v24, %v2981_v6  ;;  %vm3005_vm11 = vmor %vm3003_vm10, %vm3004_vm4 }
 0xa67   :  { %v2999_v40 = vmul.f32 %v3646_v48, %v2998_v52  ;;  %v2996_v20 = vsel %vm2995_vm7, %v3642_v0, %v2992_v3 }
 0xa68   :  { %v2986_v19 = vsel %vm5386_vm9, %v3644_v24, %v2982_v45  ;;  %v3058_v27 = vmul.f32 %v2996_v20, %v5319_v58 }
 0xa69   :  { %v3000_v18 = vmul.f32 0.5, %v2999_v40  ;;  %v3057_v15 = vmul.f32 %v2986_v19, %v5312_v9  ;;  %v3115_v9 = vld [vmem:[%s5475_s1 + $0xe0] sm:$0xff] }
 0xa6b   :  { %v3001_v62 = vsub.f32 1.5, %v3000_v18 }
 0xa6d   :  { %v3002_v13 = vmul.f32 %v3646_v48, %v3001_v62 }
 0xa6f   :  { %v3006_v37 = vsel %vm3005_vm11, %v3646_v48, %v3002_v13  ;;  %v3116_v48 = vld [vmem:[%s5475_s1 + $0xe8] sm:$0xff] }
 0xa70   :  { %v3059_v39 = vmul.f32 %v3006_v37, %v5327_v7  ;;  %v5415_v7 = vld [vmem:[%s5476_s2 + $0xb] ss:$0 sm:$0xff]  ;;  %3134 = vmatpush.msra.mxu1 %v3116_v48 }
 0xa72   :  { %3135 = vmatpush.msra.mxu1 %v3115_v9 }
 0xa90   :  { %v2951_v16 = vpop.xlane.xlu0 %2950 }
 0xa91   :  { %v2965_v34 = vmul.f32 %v2951_v16, %v3996_v4  ;;  %v3067_v16 = vmul.f32 %v5398_v12, %v3058_v27 }
 0xa93   :  { %v5369_v42 = vadd.f32 1e-05, %v2965_v34  ;;  %v3068_v34 = vmul.f32 %v5398_v12, %v3059_v39  ;;  %v3076_v63 = vadd.f32 %v5415_v7, %v3067_v16 }
 0xa95   :  { %v3077_v56 = vadd.f32 %v5415_v7, %v3068_v34  ;;  %vm3023_vm3 = vweird.f32 %v5369_v42  ;;  %v3084_v6 = vsel %vm415_vm6, %v3076_v63, 0.0 }
 0xaad   :  { %v2954_v28 = vpop.xlane.xlu2 %2953 }
 0xaae   :  { %v2966_v17 = vmul.f32 %v2954_v28, %v3996_v4 }
 0xab0   :  { %v5367_v10 = vadd.f32 1e-05, %v2966_v17 }
 0xab2   :  { %3647 = vrsqrt.f32 %v5367_v10  ;;  %vm3033_vm1 = vweird.f32 %v5367_v10 }
 0xab3   :  { %3649 = vrsqrt.f32 %v5369_v42 }
 0xab5   :  { %v2948_v5 = vpop.xlane.xlu2 %2947 }
 0xab6   :  { %v2964_v2 = vmul.f32 %v2948_v5, %v3996_v4  ;;  %v3114_v5 = vld [vmem:[%s5475_s1 + $0xd8] sm:$0xff] }
 0xab7   :  { %3136 = vmatpush.msra.mxu1 %v3114_v5  ;;  %v3414_v5 = vld [vmem:[%s5476_s2 + $0xc] ss:$0 sm:$0xff] }
 0xab8   :  { %v2972_v61 = vadd.f32 1e-05, %v2964_v2  ;;  %v5374_v31 = vpop.eup %3647 }
 0xab9   :  { %v5376_v38 = vpop.eup %3649  ;;  %v3028_v44 = vmul.f32 %v5374_v31, %v5367_v10  ;;  %vm3034_vm14 = vweird.f32 %v5374_v31 }
 0xaba   :  { %3651 = vrsqrt.f32 %v2972_v61  ;;  %v3018_v41 = vmul.f32 %v5376_v38, %v5369_v42  ;;  %vm3013_vm12 = vweird.f32 %v2972_v61  ;;  %vm3024_vm15 = vweird.f32 %v5376_v38  ;;  %vm5434_vm8 = vmor %vm3033_vm1, %vm3034_vm14 }
 0xabb   :  { %v3029_v49 = vmul.f32 %v5374_v31, %v3028_v44  ;;  %vm3025_vm4 = vmor %vm3023_vm3, %vm3024_vm15  ;;  %v3086_v42 = vsel %vm415_vm6, %v3077_v56, 0.0 }
 0xabc   :  { %v3019_v57 = vmul.f32 %v5376_v38, %v3018_v41 }
 0xabd   :  { %v3030_v43 = vmul.f32 0.5, %v3029_v49 }
 0xabe   :  { %v3020_v54 = vmul.f32 0.5, %v3019_v57 }
 0xabf   :  { %v3031_v14 = vsub.f32 1.5, %v3030_v43 }
 0xac0   :  { %v3652_v25 = vpop.eup %3651  ;;  %v3021_v24 = vsub.f32 1.5, %v3020_v54 }
 0xac1   :  { %v3008_v50 = vmul.f32 %v3652_v25, %v2972_v61  ;;  %v2957_v46 = vpop.xlane.xlu0 %2956  ;;  %vm3014_vm0 = vweird.f32 %v3652_v25  ;;  %v3032_v52 = vmul.f32 %v5374_v31, %v3031_v14  ;;  %v3113_v61 = vld [vmem:[%s5475_s1 + $0xd0] sm:$0xff] }
 0xac2   :  { %v2967_v33 = vmul.f32 %v2957_v46, %v3996_v4  ;;  %vm3015_vm13 = vmor %vm3013_vm12, %vm3014_vm0  ;;  %v3022_v40 = vmul.f32 %v5376_v38, %v3021_v24  ;;  %3137 = vmatpush.msra.mxu1 %v3113_v61  ;;  %vm3111_vm0 = vcmask 1040384  }
 0xac3   :  { %v3009_v23 = vmul.f32 %v3652_v25, %v3008_v50  ;;  %v3036_v10 = vsel %vm5434_vm8, %v5374_v31, %v3032_v52 }
 0xac4   :  { %v5384_v32 = vadd.f32 1e-05, %v2967_v33  ;;  %v3026_v44 = vsel %vm3025_vm4, %v5376_v38, %v3022_v40  ;;  %v3062_v3 = vmul.f32 %v3036_v10, %v5339_v53 }
 0xac5   :  { %v3010_v47 = vmul.f32 0.5, %v3009_v23  ;;  %v3061_v45 = vmul.f32 %v3026_v44, %v5333_v26 }
 0xac6   :  { %3653 = vrsqrt.f32 %v5384_v32  ;;  %vm3043_vm5 = vweird.f32 %v5384_v32  ;;  %v3071_v38 = vmul.f32 %v5398_v12, %v3062_v3 }
 0xac7   :  { %v3011_v35 = vsub.f32 1.5, %v3010_v47  ;;  %v3070_v20 = vmul.f32 %v5398_v12, %v3061_v45 }
 0xac9   :  { %v3012_v36 = vmul.f32 %v3652_v25, %v3011_v35  ;;  %v3080_v35 = vadd.f32 %v5415_v7, %v3071_v38  ;;  %v3079_v37 = vadd.f32 %v5415_v7, %v3070_v20 }
 0xacb   :  { %v3016_v11 = vsel %vm3015_vm13, %v3652_v25, %v3012_v36  ;;  %v3098_v27 = vsel %vm415_vm6, %v3080_v35, 0.0 }
 0xacc   :  { %v3654_v51 = vpop.eup %3653  ;;  %v2960_v28 = vpop.xlane.xlu1 %2959  ;;  %v3060_v58 = vmul.f32 %v3016_v11, %v5345_v1  ;;  %v3066_v1 = vmul.f32 %v5398_v12, %v3057_v15  ;;  %v3097_v15 = vsel %vm415_vm6, %v3079_v37, 0.0 }
 0xacd   :  { %v3038_v0 = vmul.f32 %v3654_v51, %v5384_v32  ;;  %v2968_v17 = vmul.f32 %v2960_v28, %v3996_v4  ;;  %vm3044_vm2 = vweird.f32 %v3654_v51 }
 0xace   :  { %v3069_v2 = vmul.f32 %v5398_v12, %v3060_v58  ;;  %v3075_v29 = vadd.f32 %v5415_v7, %v3066_v1  ;;  %vm3045_vm7 = vmor %vm3043_vm5, %vm3044_vm2 }
 0xacf   :  { %v3039_v8 = vmul.f32 %v3654_v51, %v3038_v0  ;;  %v2976_v21 = vadd.f32 1e-05, %v2968_v17 }
 0xad0   :  { %v3078_v25 = vadd.f32 %v5415_v7, %v3069_v2  ;;  %v3083_v46 = vsel %vm415_vm6, %v3075_v29, 0.0 }
 0xad1   :  { %v3040_v55 = vmul.f32 0.5, %v3039_v8  ;;  %3655 = vrsqrt.f32 %v2976_v21  ;;  %v3085_v41 = vadd.f32 %v3084_v6, %v3083_v46  ;;  %vm3053_vm10 = vweird.f32 %v2976_v21 }
 0xad2   :  { %v3088_v23 = vsel %vm415_vm6, %v3078_v25, 0.0 }
 0xad3   :  { %v3041_v22 = vsub.f32 1.5, %v3040_v55  ;;  %v3087_v49 = vadd.f32 %v3086_v42, %v3085_v41 }
 0xad5   :  { %v3042_v62 = vmul.f32 %v3654_v51, %v3041_v22  ;;  %v3089_v47 = vadd.f32 %v3088_v23, %v3087_v49 }
 0xad7   :  { %v3656_v50 = vpop.eup %3655  ;;  %v3046_v31 = vsel %vm3045_vm7, %v3654_v51, %v3042_v62  ;;  %v3090_v19 = vrot.slane %v3089_v47, 4  ;;  %v3099_v51 = vadd.f32 %v3098_v27, %v3097_v15 }
 0xad8   :  { %v3048_v33 = vmul.f32 %v3656_v50, %v2976_v21  ;;  %v3063_v13 = vmul.f32 %v3046_v31, %v5351_v60  ;;  %vm3054_vm9 = vweird.f32 %v3656_v50 }
 0xad9   :  { %vm3055_vm11 = vmor %vm3053_vm10, %vm3054_vm9  ;;  %v3091_v54 = vadd.f32 %v3090_v19, %v3089_v47 }
 0xada   :  { %v3049_v32 = vmul.f32 %v3656_v50, %v3048_v33  ;;  %v3072_v57 = vmul.f32 %v5398_v12, %v3063_v13 }
 0xadb   :  { %v3092_v16 = vrot.slane %v3091_v54, 2 }
 0xadc   :  { %v3050_v59 = vmul.f32 0.5, %v3049_v32  ;;  %v3081_v60 = vadd.f32 %v5415_v7, %v3072_v57 }
 0xadd   :  { %v3093_v24 = vadd.f32 %v3092_v16, %v3091_v54 }
 0xade   :  { %v3051_v53 = vsub.f32 1.5, %v3050_v59  ;;  %v3100_v39 = vsel %vm415_vm6, %v3081_v60, 0.0 }
 0xadf   :  { %v3101_v28 = vadd.f32 %v3100_v39, %v3099_v51  ;;  %v3094_v9 = vrot.slane %v3093_v24, 1 }
 0xae0   :  { %v3052_v26 = vmul.f32 %v3656_v50, %v3051_v53 }
 0xae1   :  { %v3095_v34 = vadd.f32 %v3094_v9, %v3093_v24 }
 0xae2   :  { %v3056_v43 = vsel %vm3055_vm11, %v3656_v50, %v3052_v26 }
 0xae3   :  { %v3064_v36 = vmul.f32 %v3056_v43, %v5357_v30 }
 0xae5   :  { %v3073_v11 = vmul.f32 %v5398_v12, %v3064_v36  ;;  %v3096_v12 = vmul.f32 %v3095_v34, %v3996_v4 }
 0xae7   :  { %v3082_v14 = vadd.f32 %v5415_v7, %v3073_v11 }
 0xae9   :  { %v3102_v58 = vsel %vm415_vm6, %v3082_v14, 0.0 }
 0xaea   :  { %v3103_v0 = vadd.f32 %v3102_v58, %v3101_v28 }
 0xaec   :  { %v3104_v17 = vrot.slane %v3103_v0, 4 }
 0xaee   :  { %v3105_v48 = vadd.f32 %v3104_v17, %v3103_v0 }
 0xaf0   :  { %v3106_v30 = vrot.slane %v3105_v48, 2 }
 0xaf2   :  { %v3107_v1 = vadd.f32 %v3106_v30, %v3105_v48 }
 0xaf4   :  { %v3108_v8 = vrot.slane %v3107_v1, 1 }
 0xaf6   :  { %v3109_v21 = vadd.f32 %v3108_v8, %v3107_v1 }
 0xaf8   :  { %v3110_v52 = vmul.f32 %v3109_v21, %v3996_v4 }
 0xafa   :  { %v3112_v7 = vsel %vm3111_vm0, %v3096_v12, %v3110_v52 }
 0xafb   :  { %3303 = vmatmul.msk.f32.vlgmr.msra.gmra.mxu1 %vm415_vm6, %v3112_v7 }
 0xb78   :  { %v3139_v63 = vpop.f32.mrf.mxu1 }
 0xb79   :  { %v3140_v2 = vadd.f32 %v3414_v5, %v3139_v63 }
 0xb7b   :  { %3142 = vst [vmem:[#allocation2] sm:$0x3] %v3140_v2 }
 0xb7c   :  { %3153 = dma.vmem_to_hbm [thread:$0]  %s3149_s16, 32, %s3151_s19, [#allocation3]  }
 0xb7d   :  { %3681 = dma.done.wait [#allocation3], 32  }
 0xb7e   :  { %3682 = vsyncadd [#allocation3], 4294967264 }
 0xb7f   :  { %3158 = vsyncpa [#allocation3], 1 }

</bundles_post_ra>
